<compile_context>
chip_gen: v7x
topology: tpu7x:2x2x1
jax: 0.10.0
libtpu: 0.0.40
codegen_flags: <defaults>
</compile_context>

<pallas_src>
import jax
import jax.numpy as jnp
from jax import lax
from jax.experimental import pallas as pl
from jax.experimental.pallas import tpu as pltpu

H = W = 7     # spatial size of the conv5 feature maps
KH = KW = 3   # MyConvLSTMCell kernel size (stride 1, padding 1)


def convlstm_step_kernel(xpre_ref, wh_ref, wfc_ref, bfc_ref,
                         logits_ref, c_ref, hpad_ref):
    """One ConvLSTM timestep per grid iteration; classifier at the last step.

    xpre_ref : (1, B*49, 4M) f32  precomputed conv_xx(x_t) + bias, gates stacked
    wh_ref   : (9*M, 4M)     bf16 hidden conv weights, taps folded into K
    wfc_ref  : (M, NCp) f32,  bfc_ref : (1, NCp) f32   (NC padded to 128 lanes)
    logits_ref : (B, NCp) out     c_ref : (B*49, M) out (resident across t)
    hpad_ref : (B, H+2, W+2, M) f32 scratch; zero border == padding=1
    """
    t = pl.program_id(0)
    B = hpad_ref.shape[0]
    M = hpad_ref.shape[3]
    R = c_ref.shape[0]                      # B * H * W

    @pl.when(t == 0)
    def _init():
        hpad_ref[...] = jnp.zeros_like(hpad_ref)
        c_ref[...] = jnp.zeros_like(c_ref)

    # im2col of the (padded) hidden state: 9 taps folded into the K dim,
    # then ONE wide MXU matmul (K = 9*M, N = 4*M) instead of 36+ small dots.
    taps = [hpad_ref[:, di:di + H, dj:dj + W, :]
            for di in range(KH) for dj in range(KW)]
    him = jnp.concatenate(taps, axis=-1).reshape(R, KH * KW * M)
    pre = xpre_ref[0] + jnp.dot(him.astype(jnp.bfloat16), wh_ref[...],
                                preferred_element_type=jnp.float32)   # (R, 4M)

    # gating in f32 (gate order i, f, c, o)
    it = jax.nn.sigmoid(pre[:, 0 * M:1 * M])
    ft = jax.nn.sigmoid(pre[:, 1 * M:2 * M])
    gt = jnp.tanh(pre[:, 2 * M:3 * M])
    ot = jax.nn.sigmoid(pre[:, 3 * M:4 * M])

    ct = ft * c_ref[...] + it * gt
    ht = ot * jnp.tanh(ct)

    c_ref[...] = ct                                   # resident output block
    hpad_ref[:, 1:1 + H, 1:1 + W, :] = ht.reshape(B, H, W, M)

    @pl.when(t == pl.num_programs(0) - 1)
    def _finalize():
        # feats = AvgPool2d(7)(c_T).view(B, -1); dropout is identity in eval.
        feats = jnp.mean(ct.reshape(B, H * W, M), axis=1)          # (B, M)
        logits_ref[...] = (jnp.dot(feats, wfc_ref[...],
                                   preferred_element_type=jnp.float32)
                           + bfc_ref[...])


def common_conv_lstm_forward(feat1, feat2, params):
    """feat1, feat2: (T, B, Cf, 7, 7) NCHW feature maps (two streams)."""
    wx, bx, wh, wfc, bfc = params
    T, B, Cf, _, _ = feat1.shape
    Cin = 2 * Cf
    M = wh.shape[-1]
    NC = wfc.shape[-1]
    NCp = ((NC + 127) // 128) * 128         # lane-dense logits store
    R = B * H * W

    # feat_conv = torch.cat((feature_conv, feature_conv2), 1)  [NCHW -> NHWC]
    x = jnp.concatenate([feat1, feat2], axis=2)                   # (T,B,Cin,7,7)
    x = jnp.transpose(x, (0, 1, 3, 4, 2)).astype(jnp.float32)     # (T,B,7,7,Cin)

    # ---- hoisted input-to-hidden path: one gate-stacked conv over all T ----
    # wx (4,3,3,Cin,M) -> HWIO with the 4 gates stacked on the output channels.
    wx_s = jnp.transpose(wx, (1, 2, 3, 0, 4)).reshape(KH, KW, Cin, 4 * M)
    bx_s = bx.reshape(4 * M)
    xpre = lax.conv_general_dilated(
        x.reshape(T * B, H, W, Cin).astype(jnp.bfloat16),
        wx_s.astype(jnp.bfloat16),
        window_strides=(1, 1), padding="SAME",
        dimension_numbers=("NHWC", "HWIO", "NHWC"),
        preferred_element_type=jnp.float32)                       # (T*B,7,7,4M)
    xpre = xpre.reshape(T, R, 4 * M) + bx_s[None, None, :]

    # hidden conv weights: taps folded into K, gates stacked on N; bf16 operands.
    wh_s = jnp.transpose(wh, (1, 2, 3, 0, 4)).reshape(
        KH * KW * M, 4 * M).astype(jnp.bfloat16)

    wfc_p = jnp.zeros((M, NCp), jnp.float32).at[:, :NC].set(wfc)
    bfc_p = jnp.zeros((1, NCp), jnp.float32).at[:, :NC].set(bfc)

    grid_spec = pltpu.PrefetchScalarGridSpec(
        num_scalar_prefetch=0,
        grid=(T,),
        in_specs=[
            pl.BlockSpec((1, R, 4 * M), lambda t: (t, 0, 0)),      # x preacts
            pl.BlockSpec((KH * KW * M, 4 * M), lambda t: (0, 0)),  # wh (resident)
            pl.BlockSpec((M, NCp), lambda t: (0, 0)),
            pl.BlockSpec((1, NCp), lambda t: (0, 0)),
        ],
        out_specs=[
            pl.BlockSpec((B, NCp), lambda t: (0, 0)),              # logits
            pl.BlockSpec((R, M), lambda t: (0, 0)),                # cell state
        ],
        scratch_shapes=[
            pltpu.VMEM((B, H + 2, W + 2, M), jnp.float32),         # padded h
        ],
    )

    logits_p, c_flat = pl.pallas_call(
        convlstm_step_kernel,
        out_shape=(jax.ShapeDtypeStruct((B, NCp), jnp.float32),
                   jax.ShapeDtypeStruct((R, M), jnp.float32)),
        grid_spec=grid_spec,
        compiler_params=pltpu.CompilerParams(
            dimension_semantics=("arbitrary",),        # time steps sequential
            vmem_limit_bytes=64 * 1024 * 1024),
    )(xpre, wh_s, wfc_p, bfc_p)

    logits = logits_p[:, :NC]
    c_final = c_flat.reshape(B, H, W, M)
    return logits, c_final


def reference_forward(feat1, feat2, params):
    """Pure-JAX f32 reference (lax.conv) with identical semantics."""
    wx, bx, wh, wfc, bfc = params
    T, B, Cf, _, _ = feat1.shape
    M = wh.shape[-1]
    x = jnp.concatenate([feat1, feat2], axis=2)
    x = jnp.transpose(x, (0, 1, 3, 4, 2)).astype(jnp.float32)

    def conv(inp, w):
        return lax.conv_general_dilated(
            inp, w, (1, 1), "SAME",
            dimension_numbers=("NHWC", "HWIO", "NHWC"),
            precision=lax.Precision.HIGHEST)

    h = jnp.zeros((B, H, W, M), jnp.float32)
    c = jnp.zeros((B, H, W, M), jnp.float32)
    for t in range(T):
        xt = x[t]
        pre = [conv(xt, wx[g]) + bx[g].reshape(1, 1, 1, M) + conv(h, wh[g])
               for g in range(4)]
        it = jax.nn.sigmoid(pre[0])
        ft = jax.nn.sigmoid(pre[1])
        ct_tilde = jnp.tanh(pre[2])
        c = ft * c + it * ct_tilde
        ot = jax.nn.sigmoid(pre[3])
        h = ot * jnp.tanh(c)
    feats = jnp.mean(c, axis=(1, 2))
    logits = feats @ wfc + bfc
    return logits, c


if __name__ == "__main__":
    # Small, module-consistent shapes: seq=3, batch=2, per-stream feature
    # channels Cf=32 (stand-in for 512), mem_size=32 (stand-in for 512),
    # 7x7 spatial, num_classes=61.
    T, B, Cf, M, NC = 3, 2, 32, 32, 61
    Cin = 2 * Cf

    key = jax.random.PRNGKey(0)
    ks = jax.random.split(key, 7)
    wx = 0.05 * jax.random.normal(ks[0], (4, KH, KW, Cin, M), jnp.float32)
    bx = 0.05 * jax.random.normal(ks[1], (4, 1, M), jnp.float32)
    wh = 0.05 * jax.random.normal(ks[2], (4, KH, KW, M, M), jnp.float32)
    wfc = 0.05 * jax.random.normal(ks[3], (M, NC), jnp.float32)
    bfc = 0.05 * jax.random.normal(ks[4], (1, NC), jnp.float32)
    feat1 = 0.5 * jax.random.normal(ks[5], (T, B, Cf, H, W), jnp.float32)
    feat2 = 0.5 * jax.random.normal(ks[6], (T, B, Cf, H, W), jnp.float32)
    params = (wx, bx, wh, wfc, bfc)

    logits, c_final = common_conv_lstm_forward(feat1, feat2, params)
    logits = jax.block_until_ready(logits)
    c_final = jax.block_until_ready(c_final)

    ref_logits, ref_c = reference_forward(feat1, feat2, params)
    assert logits.shape == (B, NC) and c_final.shape == (B, H, W, M)
    # bf16 matmul operands (f32 accumulation) -> slightly looser tolerances.
    assert jnp.allclose(c_final, ref_c, rtol=5e-2, atol=5e-3), "cell state mismatch"
    assert jnp.allclose(logits, ref_logits, rtol=5e-2, atol=5e-3), "logits mismatch"

    print("KERNEL_OK")
</pallas_src>

<mosaic_0001>
module attributes {stable_mosaic.version = 11 : i64} {
  func.func @convlstm_step_kernel(%arg0: i32, %arg1: memref<1x98x128xf32, #tpu.memory_space<vmem>>, %arg2: memref<288x128xbf16, #tpu.memory_space<vmem>>, %arg3: memref<32x128xf32, #tpu.memory_space<vmem>>, %arg4: memref<1x128xf32, #tpu.memory_space<vmem>>, %arg5: memref<2x128xf32, #tpu.memory_space<vmem>>, %arg6: memref<98x32xf32, #tpu.memory_space<vmem>>, %arg7: memref<2x9x9x32xf32, #tpu.memory_space<vmem>>) attributes {dimension_semantics = [#tpu.dimension_semantics<arbitrary>], iteration_bounds = array<i64: 3>, scalar_prefetch = 0 : i64, scratch_operands = 1 : i64, tpu.core_type = #tpu.core_type<tc>, window_params = [{transform_indices = @transform_0, window_bounds = array<i64: 1, 98, 128>}, {pipeline_mode = #tpu.pipeline_mode<synchronous>, transform_indices = @transform_1, window_bounds = array<i64: 288, 128>}, {pipeline_mode = #tpu.pipeline_mode<synchronous>, transform_indices = @transform_2, window_bounds = array<i64: 32, 128>}, {pipeline_mode = #tpu.pipeline_mode<synchronous>, transform_indices = @transform_3, window_bounds = array<i64: 1, 128>}, {pipeline_mode = #tpu.pipeline_mode<synchronous>, transform_indices = @transform_4, window_bounds = array<i64: 2, 128>}, {pipeline_mode = #tpu.pipeline_mode<synchronous>, transform_indices = @transform_5, window_bounds = array<i64: 98, 32>}]} {
    %c0_i32 = arith.constant 0 : i32
    %0 = arith.cmpi eq, %arg0, %c0_i32 : i32
    %1 = arith.extui %0 : i1 to i32
    %c0_i32_0 = arith.constant 0 : i32
    %2 = arith.cmpi ne, %1, %c0_i32_0 : i32
    scf.if %2 {
      %cst_51 = arith.constant 0.000000e+00 : f32
      %52 = vector.broadcast %cst_51 : f32 to vector<2x9x9x32xf32>
      %c0_52 = arith.constant 0 : index
      %c0_53 = arith.constant 0 : index
      %c0_54 = arith.constant 0 : index
      %c0_55 = arith.constant 0 : index
      %53 = vector.load %arg7[%c0_52, %c0_53, %c0_54, %c0_55] : memref<2x9x9x32xf32, #tpu.memory_space<vmem>>, vector<2x9x9x32xf32>
      tpu.vector_store %arg7[%c0_52, %c0_53, %c0_54, %c0_55], %52 {strides = array<i32>} : memref<2x9x9x32xf32, #tpu.memory_space<vmem>>, vector<2x9x9x32xf32>,
      %cst_56 = arith.constant 0.000000e+00 : f32
      %54 = vector.broadcast %cst_56 : f32 to vector<98x32xf32>
      %c0_57 = arith.constant 0 : index
      %c0_58 = arith.constant 0 : index
      %55 = vector.load %arg6[%c0_57, %c0_58] : memref<98x32xf32, #tpu.memory_space<vmem>>, vector<98x32xf32>
      tpu.vector_store %arg6[%c0_57, %c0_58], %54 {strides = array<i32>} : memref<98x32xf32, #tpu.memory_space<vmem>>, vector<98x32xf32>,
    } else {
    }
    %c0 = arith.constant 0 : index
    %c0_1 = arith.constant 0 : index
    %c0_2 = arith.constant 0 : index
    %c0_3 = arith.constant 0 : index
    %3 = vector.load %arg7[%c0, %c0_1, %c0_2, %c0_3] : memref<2x9x9x32xf32, #tpu.memory_space<vmem>>, vector<2x7x7x32xf32>
    %c0_4 = arith.constant 0 : index
    %c0_5 = arith.constant 0 : index
    %c1 = arith.constant 1 : index
    %c0_6 = arith.constant 0 : index
    %4 = vector.load %arg7[%c0_4, %c0_5, %c1, %c0_6] : memref<2x9x9x32xf32, #tpu.memory_space<vmem>>, vector<2x7x7x32xf32>
    %c0_7 = arith.constant 0 : index
    %c0_8 = arith.constant 0 : index
    %c2 = arith.constant 2 : index
    %c0_9 = arith.constant 0 : index
    %5 = vector.load %arg7[%c0_7, %c0_8, %c2, %c0_9] : memref<2x9x9x32xf32, #tpu.memory_space<vmem>>, vector<2x7x7x32xf32>
    %c0_10 = arith.constant 0 : index
    %c1_11 = arith.constant 1 : index
    %c0_12 = arith.constant 0 : index
    %c0_13 = arith.constant 0 : index
    %6 = vector.load %arg7[%c0_10, %c1_11, %c0_12, %c0_13] : memref<2x9x9x32xf32, #tpu.memory_space<vmem>>, vector<2x7x7x32xf32>
    %c0_14 = arith.constant 0 : index
    %c1_15 = arith.constant 1 : index
    %c1_16 = arith.constant 1 : index
    %c0_17 = arith.constant 0 : index
    %7 = vector.load %arg7[%c0_14, %c1_15, %c1_16, %c0_17] : memref<2x9x9x32xf32, #tpu.memory_space<vmem>>, vector<2x7x7x32xf32>
    %c0_18 = arith.constant 0 : index
    %c1_19 = arith.constant 1 : index
    %c2_20 = arith.constant 2 : index
    %c0_21 = arith.constant 0 : index
    %8 = vector.load %arg7[%c0_18, %c1_19, %c2_20, %c0_21] : memref<2x9x9x32xf32, #tpu.memory_space<vmem>>, vector<2x7x7x32xf32>
    %c0_22 = arith.constant 0 : index
    %c2_23 = arith.constant 2 : index
    %c0_24 = arith.constant 0 : index
    %c0_25 = arith.constant 0 : index
    %9 = vector.load %arg7[%c0_22, %c2_23, %c0_24, %c0_25] : memref<2x9x9x32xf32, #tpu.memory_space<vmem>>, vector<2x7x7x32xf32>
    %c0_26 = arith.constant 0 : index
    %c2_27 = arith.constant 2 : index
    %c1_28 = arith.constant 1 : index
    %c0_29 = arith.constant 0 : index
    %10 = vector.load %arg7[%c0_26, %c2_27, %c1_28, %c0_29] : memref<2x9x9x32xf32, #tpu.memory_space<vmem>>, vector<2x7x7x32xf32>
    %c0_30 = arith.constant 0 : index
    %c2_31 = arith.constant 2 : index
    %c2_32 = arith.constant 2 : index
    %c0_33 = arith.constant 0 : index
    %11 = vector.load %arg7[%c0_30, %c2_31, %c2_32, %c0_33] : memref<2x9x9x32xf32, #tpu.memory_space<vmem>>, vector<2x7x7x32xf32>
    %12 = tpu.concatenate %3, %4, %5, %6, %7, %8, %9, %10, %11 in 3 : vector<2x7x7x32xf32>, vector<2x7x7x32xf32>, vector<2x7x7x32xf32>, vector<2x7x7x32xf32>, vector<2x7x7x32xf32>, vector<2x7x7x32xf32>, vector<2x7x7x32xf32>, vector<2x7x7x32xf32>, vector<2x7x7x32xf32> -> vector<2x7x7x288xf32>
    %13 = vector.shape_cast %12 : vector<2x7x7x288xf32> to vector<98x288xf32>
    %c0_34 = arith.constant 0 : index
    %c0_35 = arith.constant 0 : index
    %c0_36 = arith.constant 0 : index
    %14 = vector.load %arg1[%c0_34, %c0_35, %c0_36] : memref<1x98x128xf32, #tpu.memory_space<vmem>>, vector<1x98x128xf32>
    %15 = vector.shape_cast %14 : vector<1x98x128xf32> to vector<98x128xf32>
    %16 = arith.truncf %13 : vector<98x288xf32> to vector<98x288xbf16>
    %c0_37 = arith.constant 0 : index
    %c0_38 = arith.constant 0 : index
    %17 = vector.load %arg2[%c0_37, %c0_38] : memref<288x128xbf16, #tpu.memory_space<vmem>>, vector<288x128xbf16>
    %cst = arith.constant dense<0.000000e+00> : vector<98x128xf32>
    %18 = tpu.matmul %16, %17, %cst {dimension_numbers = #tpu.dot_dimension_numbers<[1], [0], [0], [1], [0, 0, 1, 1], [], []>} : vector<98x288xbf16>, vector<288x128xbf16>, vector<98x128xf32> -> vector<98x128xf32>
    %19 = arith.addf %15, %18 : vector<98x128xf32>
    %20 = vector.extract_strided_slice %19 {offsets = [0, 0], sizes = [98, 32], strides = [1, 1]} : vector<98x128xf32> to vector<98x32xf32>
    %21 = arith.negf %20 : vector<98x32xf32>
    %22 = math.exp %21 : vector<98x32xf32>
    %cst_39 = arith.constant 1.000000e+00 : f32
    %23 = vector.broadcast %cst_39 : f32 to vector<98x32xf32>
    %24 = arith.addf %23, %22 : vector<98x32xf32>
    %25 = arith.divf %23, %24 : vector<98x32xf32>
    %26 = vector.extract_strided_slice %19 {offsets = [0, 32], sizes = [98, 32], strides = [1, 1]} : vector<98x128xf32> to vector<98x32xf32>
    %27 = arith.negf %26 : vector<98x32xf32>
    %28 = math.exp %27 : vector<98x32xf32>
    %cst_40 = arith.constant 1.000000e+00 : f32
    %29 = vector.broadcast %cst_40 : f32 to vector<98x32xf32>
    %30 = arith.addf %29, %28 : vector<98x32xf32>
    %31 = arith.divf %29, %30 : vector<98x32xf32>
    %32 = vector.extract_strided_slice %19 {offsets = [0, 64], sizes = [98, 32], strides = [1, 1]} : vector<98x128xf32> to vector<98x32xf32>
    %33 = math.tanh %32 : vector<98x32xf32>
    %34 = vector.extract_strided_slice %19 {offsets = [0, 96], sizes = [98, 32], strides = [1, 1]} : vector<98x128xf32> to vector<98x32xf32>
    %35 = arith.negf %34 : vector<98x32xf32>
    %36 = math.exp %35 : vector<98x32xf32>
    %cst_41 = arith.constant 1.000000e+00 : f32
    %37 = vector.broadcast %cst_41 : f32 to vector<98x32xf32>
    %38 = arith.addf %37, %36 : vector<98x32xf32>
    %39 = arith.divf %37, %38 : vector<98x32xf32>
    %c0_42 = arith.constant 0 : index
    %c0_43 = arith.constant 0 : index
    %40 = vector.load %arg6[%c0_42, %c0_43] : memref<98x32xf32, #tpu.memory_space<vmem>>, vector<98x32xf32>
    %41 = arith.mulf %31, %40 : vector<98x32xf32>
    %42 = arith.mulf %25, %33 : vector<98x32xf32>
    %43 = arith.addf %41, %42 : vector<98x32xf32>
    %44 = math.tanh %43 : vector<98x32xf32>
    %45 = arith.mulf %39, %44 : vector<98x32xf32>
    %c0_44 = arith.constant 0 : index
    %c0_45 = arith.constant 0 : index
    %46 = vector.load %arg6[%c0_44, %c0_45] : memref<98x32xf32, #tpu.memory_space<vmem>>, vector<98x32xf32>
    tpu.vector_store %arg6[%c0_44, %c0_45], %43 {strides = array<i32>} : memref<98x32xf32, #tpu.memory_space<vmem>>, vector<98x32xf32>,
    %47 = vector.shape_cast %45 : vector<98x32xf32> to vector<2x7x7x32xf32>
    %c0_46 = arith.constant 0 : index
    %c1_47 = arith.constant 1 : index
    %c1_48 = arith.constant 1 : index
    %c0_49 = arith.constant 0 : index
    %48 = vector.load %arg7[%c0_46, %c1_47, %c1_48, %c0_49] : memref<2x9x9x32xf32, #tpu.memory_space<vmem>>, vector<2x7x7x32xf32>
    tpu.vector_store %arg7[%c0_46, %c1_47, %c1_48, %c0_49], %47 {strides = array<i32>} : memref<2x9x9x32xf32, #tpu.memory_space<vmem>>, vector<2x7x7x32xf32>,
    %c2_i32 = arith.constant 2 : i32
    %49 = arith.cmpi eq, %arg0, %c2_i32 : i32
    %50 = arith.extui %49 : i1 to i32
    %c0_i32_50 = arith.constant 0 : i32
    %51 = arith.cmpi ne, %50, %c0_i32_50 : i32
    scf.if %51 {
      %52 = vector.shape_cast %43 : vector<98x32xf32> to vector<2x49x32xf32>
      %cst_51 = arith.constant dense<0.000000e+00> : vector<2x32xf32>
      %53 = vector.multi_reduction <add>, %52, %cst_51 [1] : vector<2x49x32xf32> to vector<2x32xf32>
      %cst_52 = arith.constant 4.900000e+01 : f32
      %54 = vector.broadcast %cst_52 : f32 to vector<2x32xf32>
      %55 = arith.divf %53, %54 : vector<2x32xf32>
      %c0_53 = arith.constant 0 : index
      %c0_54 = arith.constant 0 : index
      %56 = vector.load %arg3[%c0_53, %c0_54] : memref<32x128xf32, #tpu.memory_space<vmem>>, vector<32x128xf32>
      %cst_55 = arith.constant dense<0.000000e+00> : vector<2x128xf32>
      %57 = tpu.matmul %55, %56, %cst_55 {dimension_numbers = #tpu.dot_dimension_numbers<[1], [0], [0], [1], [0, 0, 1, 1], [], []>} : vector<2x32xf32>, vector<32x128xf32>, vector<2x128xf32> -> vector<2x128xf32>
      %c0_56 = arith.constant 0 : index
      %c0_57 = arith.constant 0 : index
      %58 = vector.load %arg4[%c0_56, %c0_57] : memref<1x128xf32, #tpu.memory_space<vmem>>, vector<1x128xf32>
      %59 = vector.broadcast %58 : vector<1x128xf32> to vector<2x128xf32>
      %60 = arith.addf %57, %59 : vector<2x128xf32>
      %c0_58 = arith.constant 0 : index
      %c0_59 = arith.constant 0 : index
      %61 = vector.load %arg5[%c0_58, %c0_59] : memref<2x128xf32, #tpu.memory_space<vmem>>, vector<2x128xf32>
      tpu.vector_store %arg5[%c0_58, %c0_59], %60 {strides = array<i32>} : memref<2x128xf32, #tpu.memory_space<vmem>>, vector<2x128xf32>,
    } else {
    }
    return
  }
  func.func @transform_0(%arg0: i32) -> (i32, i32, i32) {
    %c0_i32 = arith.constant 0 : i32
    %c0_i32_0 = arith.constant 0 : i32
    %c0_i32_1 = arith.constant 0 : i32
    return %arg0, %c0_i32, %c0_i32_0 : i32, i32, i32
  }
  func.func @transform_1(%arg0: i32) -> (i32, i32) {
    %c0_i32 = arith.constant 0 : i32
    %c0_i32_0 = arith.constant 0 : i32
    %c0_i32_1 = arith.constant 0 : i32
    return %c0_i32, %c0_i32_0 : i32, i32
  }
  func.func @transform_2(%arg0: i32) -> (i32, i32) {
    %c0_i32 = arith.constant 0 : i32
    %c0_i32_0 = arith.constant 0 : i32
    %c0_i32_1 = arith.constant 0 : i32
    return %c0_i32, %c0_i32_0 : i32, i32
  }
  func.func @transform_3(%arg0: i32) -> (i32, i32) {
    %c0_i32 = arith.constant 0 : i32
    %c0_i32_0 = arith.constant 0 : i32
    %c0_i32_1 = arith.constant 0 : i32
    return %c0_i32, %c0_i32_0 : i32, i32
  }
  func.func @transform_4(%arg0: i32) -> (i32, i32) {
    %c0_i32 = arith.constant 0 : i32
    %c0_i32_0 = arith.constant 0 : i32
    %c0_i32_1 = arith.constant 0 : i32
    return %c0_i32, %c0_i32_0 : i32, i32
  }
  func.func @transform_5(%arg0: i32) -> (i32, i32) {
    %c0_i32 = arith.constant 0 : i32
    %c0_i32_0 = arith.constant 0 : i32
    %c0_i32_1 = arith.constant 0 : i32
    return %c0_i32, %c0_i32_0 : i32, i32
  }
}

</mosaic_0001>

<bundles_post_ra>
// kernel: tpu_custom_call.1
= control target key start
LH: loop header
LB: loop body
LE: loop exit
PB: predicated region body
PF: predicated region fallthrough
CT: control target
= control target key end

     0   :  { %11 = vsyncpa [#allocation4], 0  ;;  %s8969_s0 = inlined_call_operand.hbm [shape: f32[3,98,128], index: 0, kind: input, shape index: {}]   ;;  %s8970_s1 = inlined_call_operand.hbm [shape: bf16[288,128], index: 1, kind: input, shape index: {}]   ;;  %s8971_s2 = inlined_call_operand.hbm [shape: f32[32,128], index: 2, kind: input, shape index: {}]   ;;  %s8972_s3 = inlined_call_operand.hbm [shape: f32[1,128], index: 3, kind: input, shape index: {}]   ;;  %s8973_s4 = inlined_call_operand.hbm [shape: f32[2,128], index: 4, kind: output, shape index: {0}]   ;;  %s8974_s5 = inlined_call_operand.hbm [shape: f32[98,32], index: 5, kind: output, shape index: {1}]  }
   0x1   :  { %13 = vsyncpa [#allocation4 + $0x1], 0 }
   0x2   :  { %14 = vsyncpa [#allocation7], 0 }
   0x3   :  { %15 = vsyncpa [#allocation10], 0 }
   0x4   :  { %16 = vsyncpa [#allocation5], 0 }
   0x5   :  { %17 = vsyncpa [#allocation13], 0  ;;  %s7103_s18 = smov 0   ;;  %s7105_s19 = smov 0  }
   0x6   :  { %s7107_s20 = smov 0   ;;  %s7109_s21 = smov 0  }
   0x7 LB: > { %s7122_s22 = sadd.s32 4294967295, %s7048_s21   ;;  %p43_p0 = scmp.ne.s32.totalorder %s7040_s19, %s7036_s18  ;;  %s7048_s21 = sphi %s7109_s21, %s9013_s21   ;;  %s7044_s20 = sphi %s7107_s20, %s9012_s20   ;;  %s7040_s19 = sphi %s7105_s19, %s9011_s19   ;;  %s7036_s18 = sphi %s7103_s18, %s9010_s18  }
   0x8   : > { %p8975_p1 = scmp.eq.s32.totalorder %s7122_s22, 0  ;;  %p6384_p2 = scmp.ge.s32.totalorder %s7048_s21, 1 }
   0x9   : > { %p159_p3 = scmp.lt.s32.totalorder %s7048_s21, 4  ;;  %s7050_s25 = smov [#allocation6]  }
   0xa   : > { %p7131_p5 = por %p8975_p1, %p43_p0  ;;  %s171_s26 = sshll.u32 %s7050_s25, 4  ;;  %s172_s26 = int_to_ptr.vmem [resolvable:$true] %s171_s26 }
   0xb   : > { %p7135_p6 = pnand %p6384_p2, %p159_p3  ;;  %s7051_s28 = smov [#allocation8]  }
   0xc   : > { %s8978_s23 = scalar_select %p7131_p5, 1, 0 }
   0xd   : > { %s8979_s24 = scalar_select %p7135_p6, 1, 0 }
   0xe   : > { %p6617_p7 = pneg %p7135_p6  ;;  %s184_s29 = sshll.u32 %s7051_s28, 4  ;;  %s7147_s29 = int_to_ptr.vmem [resolvable:$true] %s184_s29 }
   0xf   : > { %s6832_s7 = scalar_lea.hbm %s8970_s1, 2304 }
  0x10   : > { %p7143_p8 = pnand %p6617_p7, %p8975_p1  ;;  %p6833_p9 = scmp.ne.s32.totalorder %s8970_s1, %s6832_s7 }
  0x11   : > { %p6839_p13 = scmp.lt.u32.totalorder %s6832_s7, %s8970_s1 }
  0x12   : > { %p7157_p10 = pneg %p7143_p8 }
  0x14   : > { %p6835_p11 = pnand %p7157_p10, %p6833_p9 }
  0x16   : > { %p6836_p12 = pneg %p6835_p11 }
  0x18   : > { %p6841_p0 = pnand %p6839_p13, %p6836_p12 }
  0x1a   : > { %6844 = shalt.err (!%p6841_p0)
}
  0x1b   : > { %s6845_s13 = scalar_lea.vmem %s172_s26, 2304  ;;  %p6853_p4 = scmp.lt.s32.totalorder %s172_s26, %s172_s26 }
  0x1c   : > { %p6846_p2 = scmp.ne.s32.totalorder %s172_s26, %s6845_s13  ;;  %p6854_p1 = scmp.lt.s32.totalorder %s6845_s13, %s6845_s13 }
  0x1e   : > { %p6848_p3 = pnand %p6846_p2, %p7157_p10  ;;  %p6855_p5 = por %p6854_p1, %p6853_p4 }
  0x20   : > { %p6849_p7 = pneg %p6848_p3 }
  0x22   : > { %p6856_p6 = pnand %p6855_p5, %p6849_p7 }
  0x24   : > { %6859 = shalt.err (!%p6856_p6)
}
  0x25   : > { %s7052_s14 = smov 64   ;;  %s7053_s15 = smov 4  }
  0x26   : > { %6620 = dma.hbm_to_vmem [thread:$0]  (!%p7143_p8), %s8970_s1, 2304, %s172_s26, [#allocation7], %s7052_s14, %s7052_s14, %s7053_s15  }
  0x27   : > { %s6860_s28 = scalar_lea.hbm %s8971_s2, 512 }
  0x28   : > { %p6861_p9 = scmp.ne.s32.totalorder %s8971_s2, %s6860_s28  ;;  %p6867_p5 = scmp.lt.u32.totalorder %s6860_s28, %s8971_s2 }
  0x2a   : > { %p6863_p1 = pnand %p6861_p9, %p7157_p10 }
  0x2c   : > { %p6864_p4 = pneg %p6863_p1 }
  0x2e   : > { %p6869_p6 = pnand %p6867_p5, %p6864_p4 }
  0x30   : > { %6872 = shalt.err (!%p6869_p6)
}
  0x31   : > { %s6873_s26 = scalar_lea.vmem %s7147_s29, 512  ;;  %p6881_p0 = scmp.lt.s32.totalorder %s7147_s29, %s7147_s29 }
  0x32   : > { %p6874_p11 = scmp.ne.s32.totalorder %s7147_s29, %s6873_s26  ;;  %p6882_p2 = scmp.lt.s32.totalorder %s6873_s26, %s6873_s26 }
  0x34   : > { %p6876_p12 = pnand %p6874_p11, %p7157_p10  ;;  %p6883_p3 = por %p6882_p2, %p6881_p0 }
  0x36   : > { %p6877_p13 = pneg %p6876_p12 }
  0x38   : > { %p6884_p7 = pnand %p6883_p3, %p6877_p13 }
  0x3a   : > { %6887 = shalt.err (!%p6884_p7)
}
  0x3b   : > { %s7054_s9 = smov 128   ;;  %s7055_s11 = smov 8  }
  0x3c   : > { %6623 = dma.hbm_to_vmem [thread:$0]  (!%p7143_p8), %s8971_s2, 512, %s7147_s29, [#allocation7], %s7054_s9, %s7054_s9, %s7055_s11  }
  0x3d   : > { %s7056_s14 = smov [#allocation9]   ;;  %s7200_s16 = sadd.s32 1, %s7048_s21  }
  0x3e   : > { %s198_s15 = sshll.u32 %s7056_s14, 4  ;;  %s6888_s25 = scalar_lea.hbm %s8972_s3, 16  ;;  %s199_s15 = int_to_ptr.vmem [resolvable:$true] %s198_s15 }
  0x3f   : > { %p6889_p9 = scmp.ne.s32.totalorder %s8972_s3, %s6888_s25  ;;  %p6895_p5 = scmp.lt.u32.totalorder %s6888_s25, %s8972_s3 }
  0x41   : > { %p6891_p1 = pnand %p6889_p9, %p7157_p10 }
  0x43   : > { %p6892_p4 = pneg %p6891_p1 }
  0x45   : > { %p6897_p6 = pnand %p6895_p5, %p6892_p4 }
  0x47   : > { %6900 = shalt.err (!%p6897_p6)
}
  0x48   : > { %s6901_s29 = scalar_lea.vmem %s199_s15, 16  ;;  %s6908_s8 = scalar_lea.vmem %s199_s15, 32 }
  0x49   : > { %p6902_p11 = scmp.ne.s32.totalorder %s199_s15, %s6901_s29  ;;  %p6909_p0 = scmp.lt.s32.totalorder %s199_s15, %s199_s15 }
  0x4a   : > { %p6910_p2 = scmp.lt.s32.totalorder %s6908_s8, %s6901_s29 }
  0x4b   : > { %p6904_p12 = pnand %p6902_p11, %p7157_p10 }
  0x4c   : > { %p6911_p3 = por %p6910_p2, %p6909_p0 }
  0x4d   : > { %p6905_p13 = pneg %p6904_p12 }
  0x4f   : > { %p6912_p7 = pnand %p6911_p3, %p6905_p13 }
  0x51   : > { %6915 = shalt.err (!%p6912_p7)
}
  0x52   : > { %6626 = dma.hbm_to_vmem [thread:$0]  (!%p7143_p8), %s8972_s3, 16, %s199_s15, [#allocation10]  }
  0x53   : > { %s27_s10 = ssub.s32 %s7048_s21, %s7200_s16  ;;  %s30_s13 = sadd.s32 1, %s7044_s20 }
  0x54   : > { %p28_p10 = scmp.eq.s32.totalorder %s27_s10, 0  ;;  %p37_p9 = scmp.ne.s32.totalorder %s7044_s20, %s7040_s19 }
  0x55   : > { %p38_p1 = scmp.eq.s32.totalorder %s7048_s21, 0  ;;  %p6634_p4 = scmp.lt.s32.totalorder %s7048_s21, 3 }
  0x56   : > { %s7228_s27 = scalar_select %p28_p10, %s7044_s20, %s30_s13  }
  0x57   : > { %p39_p5 = por %p38_p1, %p37_p9  ;;  %s209_s14 = sand.u32 1, %s7044_s20  }
  0x58   : > { %s6592_s17 = smul.u32 104, %s209_s14  ;;  %s6921_s12 = scalar_lea.hbm %s8969_s0, 4992 }
  0x59   : > { %s6593_s18 = smul.u32 1664, %s7048_s21  ;;  %p7232_p6 = pnand %p6634_p4, %p39_p5 }
  0x5a   : > { %s213_s6 = scalar_lea.vmem [#allocation3], %s6592_s17  ;;  %s7243_s21 = scalar_lea.sflag [#allocation4], %s209_s14 }
  0x5b   : > { %s7239_s15 = scalar_lea.hbm %s8969_s0, %s6593_s18  ;;  %s220_s7 = sshll.u32 %s213_s6, 4  ;;  %s7241_s7 = int_to_ptr.vmem [resolvable:$true] %s220_s7 }
  0x5c   : > { %s6916_s29 = scalar_lea.hbm %s7239_s15, 1664  ;;  %p6918_p11 = pneg %p7232_p6 }
  0x5d   : > { %p6917_p8 = scmp.ne.s32.totalorder %s7239_s15, %s6916_s29  ;;  %p6922_p0 = scmp.lt.u32.totalorder %s7239_s15, %s8969_s0 }
  0x5e   : > { %p6923_p2 = scmp.lt.u32.totalorder %s6921_s12, %s6916_s29  ;;  %p6925_p7 = scmp.lt.u32.totalorder %s6916_s29, %s7239_s15 }
  0x5f   : > { %p6919_p12 = pnand %p6918_p11, %p6917_p8 }
  0x60   : > { %p6924_p3 = por %p6923_p2, %p6922_p0 }
  0x61   : > { %p6920_p13 = pneg %p6919_p12 }
  0x62   : > { %p6926_p10 = por %p6925_p7, %p6924_p3 }
  0x64   : > { %p6927_p9 = pnand %p6926_p10, %p6920_p13 }
  0x66   : > { %6930 = shalt.err (!%p6927_p9)
}
  0x67   : > { %s6931_s14 = scalar_lea.vmem %s7241_s7, 1664  ;;  %s7057_s17 = smov [#allocation3]  }
  0x68   : > { %p6932_p1 = scmp.ne.s32.totalorder %s7241_s7, %s6931_s14  ;;  %s6936_s18 = sshll.u32 %s7057_s17, 4  ;;  %s6937_s18 = int_to_ptr.vmem [resolvable:$false] %s6936_s18 }
  0x69   : > { %s6938_s28 = scalar_lea.vmem %s6937_s18, 3328  ;;  %p6939_p8 = scmp.lt.s32.totalorder %s7241_s7, %s6937_s18 }
  0x6a   : > { %p6934_p4 = pnand %p6932_p1, %p6918_p11  ;;  %p6940_p12 = scmp.lt.s32.totalorder %s6938_s28, %s6931_s14 }
  0x6c   : > { %p6935_p5 = pneg %p6934_p4  ;;  %p6941_p0 = por %p6940_p12, %p6939_p8 }
  0x6e   : > { %p6942_p2 = pnand %p6941_p0, %p6935_p5 }
  0x70   : > { %6945 = shalt.err (!%p6942_p2)
}
  0x71   : > { %6630 = dma.hbm_to_vmem [thread:$0]  (!%p7232_p6), %s7239_s15, 1664, %s7241_s7, %s7243_s21, %s7054_s9, %s7054_s9, %s7055_s11  }
  0x72   : > { %p8983_p11 = scmp.ne.s32.totalorder %s8979_s24, 0 }
  0x73   : > { %s234_s30 = sand.u32 (!%p8983_p11), 1, %s7040_s19   ;;  %p8984_p13 = scmp.ne.s32.totalorder (!%p8983_p11), %s8978_s23, 0 }
  0x74   : > { %232 = sbr.rel (%p8983_p11) target bundleno = 1655 (0x677), region = 36  ;;  %s235_s29 = scalar_lea.sflag (!%p8983_p11), [#allocation4], %s234_s30 }
  0x75   : > { %s6594_s6 = smul.u32 (!%p8983_p11), 104, %s234_s30 }
  0x77   : > { %s7277_s8 = scalar_lea.vmem (!%p8983_p11), [#allocation3], %s6594_s6 }
  0x7b   : > { %7015 = dma.done.wait (%p8984_p13), %s235_s29, 1664  }
  0x7c   : > { %7017 = vsyncadd (%p8984_p13), %s235_s29, 4294965632  ;;  %p8985_p3 = scmp.eq.s32.totalorder %s7122_s22, 0 }
  0x7e   : > { %7019 = dma.done.wait (%p8985_p3), [#allocation7], 2816   ;;  %p8986_p6 = pmov %p8985_p3 }
  0x7f   : > { %p8987_p7 = pmov %p8985_p3 }
  0x80   : > { %7021 = vsyncadd (%p8986_p6), [#allocation7], 4294964480 }
  0x81   : > { %7023 = dma.done.wait (%p8987_p7), [#allocation10], 16   ;;  %p8988_p10 = pmov %p8985_p3 }
  0x82   : > { %p8989_p9 = scmp.ne.s32.totalorder %s7122_s22, 0 }
  0x83   : > { %7025 = vsyncadd (%p8988_p10), [#allocation10], 4294967280  ;;  %vm277_vm0 = vcmask (!%p8989_p9), 261120   ;;  %vm279_vm1 = vcmask (!%p8989_p9), 253952   ;;  %vm327_vm2 = vcmask (!%p8989_p9), 254976   ;;  %v7058_v0 = vmov (!%p8989_p9), 0.0  }
  0x84   : > { %276 = sbr.rel (%p8989_p9) target bundleno = 157 (0x9d), region = 56  ;;  %278 = vst.msk [vmem:[#allocation2] sm:$0xff] (!%p8989_p9), %vm277_vm0, %v7058_v0  ;;  %281 = vst.msk [vmem:[#allocation2 + $0x10] sm:$0xff] (!%p8989_p9), %vm277_vm0, %v7058_v0 }
  0x85   : > { %283 = vst.msk [vmem:[#allocation2 + $0x20] sm:$0xff] (!%p8989_p9), %vm277_vm0, %v7058_v0  ;;  %285 = vst.msk [vmem:[#allocation2 + $0x30] sm:$0xff] (!%p8989_p9), %vm277_vm0, %v7058_v0 }
  0x86   : > { %287 = vst.msk [vmem:[#allocation2 + $0x40] sm:$0xff] (!%p8989_p9), %vm277_vm0, %v7058_v0  ;;  %289 = vst.msk [vmem:[#allocation2 + $0x50] sm:$0xff] (!%p8989_p9), %vm277_vm0, %v7058_v0 }
  0x87   : > { %291 = vst.msk [vmem:[#allocation2 + $0x60] sm:$0xff] (!%p8989_p9), %vm277_vm0, %v7058_v0  ;;  %293 = vst.msk [vmem:[#allocation2 + $0x70] sm:$0xff] (!%p8989_p9), %vm277_vm0, %v7058_v0 }
  0x88   : > { %295 = vst.msk [vmem:[#allocation2 + $0x80] sm:$0xff] (!%p8989_p9), %vm277_vm0, %v7058_v0  ;;  %297 = vst.msk [vmem:[#allocation2 + $0x90] sm:$0xff] (!%p8989_p9), %vm277_vm0, %v7058_v0 }
  0x89   : > { %299 = vst.msk [vmem:[#allocation2 + $0xa0] sm:$0xff] (!%p8989_p9), %vm277_vm0, %v7058_v0  ;;  %301 = vst.msk [vmem:[#allocation2 + $0xb0] sm:$0xff] (!%p8989_p9), %vm277_vm0, %v7058_v0 }
  0x8a   : > { %303 = vst.msk [vmem:[#allocation2 + $0xc0] sm:$0xff] (!%p8989_p9), %vm277_vm0, %v7058_v0  ;;  %305 = vst.msk [vmem:[#allocation2 + $0xd0] sm:$0xff] (!%p8989_p9), %vm277_vm0, %v7058_v0 }
  0x8b   : > { %307 = vst.msk [vmem:[#allocation2 + $0xe0] sm:$0xff] %vm277_vm0, %v7058_v0  ;;  %309 = vst.msk [vmem:[#allocation2 + $0xf0] sm:$0xff] %vm277_vm0, %v7058_v0 }
  0x8c   : > { %311 = vst.msk [vmem:[#allocation2 + $0x100] sm:$0xff] %vm277_vm0, %v7058_v0  ;;  %313 = vst.msk [vmem:[#allocation2 + $0x110] sm:$0xff] %vm277_vm0, %v7058_v0 }
  0x8d   : > { %315 = vst.msk [vmem:[#allocation12] sm:$0xff] %vm277_vm0, %v7058_v0  ;;  %316 = vst.msk [vmem:[#allocation12 + $0x8] sm:$0xff] %vm277_vm0, %v7058_v0 }
  0x8e   : > { %317 = vst.msk [vmem:[#allocation12 + $0x10] sm:$0xff] %vm277_vm0, %v7058_v0  ;;  %318 = vst.msk [vmem:[#allocation12 + $0x18] sm:$0xff] %vm277_vm0, %v7058_v0 }
  0x8f   : > { %319 = vst.msk [vmem:[#allocation12 + $0x20] sm:$0xff] %vm277_vm0, %v7058_v0  ;;  %320 = vst.msk [vmem:[#allocation12 + $0x28] sm:$0xff] %vm277_vm0, %v7058_v0 }
  0x90   : > { %321 = vst.msk [vmem:[#allocation12 + $0x30] sm:$0xff] %vm277_vm0, %v7058_v0  ;;  %322 = vst.msk [vmem:[#allocation12 + $0x38] sm:$0xff] %vm277_vm0, %v7058_v0 }
  0x91   : > { %323 = vst.msk [vmem:[#allocation12 + $0x40] sm:$0xff] %vm277_vm0, %v7058_v0  ;;  %324 = vst.msk [vmem:[#allocation12 + $0x48] sm:$0xff] %vm277_vm0, %v7058_v0 }
  0x92   : > { %325 = vst.msk [vmem:[#allocation12 + $0x50] sm:$0xff] %vm277_vm0, %v7058_v0  ;;  %326 = vst.msk [vmem:[#allocation12 + $0x58] sm:$0xff] %vm277_vm0, %v7058_v0 }
  0x93   : > { %280 = vst.msk [vmem:[#allocation2 + $0x8] sm:$0x1] %vm279_vm1, %v7058_v0  ;;  %282 = vst.msk [vmem:[#allocation2 + $0x18] sm:$0x1] %vm279_vm1, %v7058_v0 }
  0x94   : > { %284 = vst.msk [vmem:[#allocation2 + $0x28] sm:$0x1] %vm279_vm1, %v7058_v0  ;;  %286 = vst.msk [vmem:[#allocation2 + $0x38] sm:$0x1] %vm279_vm1, %v7058_v0 }
  0x95   : > { %288 = vst.msk [vmem:[#allocation2 + $0x48] sm:$0x1] %vm279_vm1, %v7058_v0  ;;  %290 = vst.msk [vmem:[#allocation2 + $0x58] sm:$0x1] %vm279_vm1, %v7058_v0 }
  0x96   : > { %292 = vst.msk [vmem:[#allocation2 + $0x68] sm:$0x1] %vm279_vm1, %v7058_v0  ;;  %294 = vst.msk [vmem:[#allocation2 + $0x78] sm:$0x1] %vm279_vm1, %v7058_v0 }
  0x97   : > { %296 = vst.msk [vmem:[#allocation2 + $0x88] sm:$0x1] %vm279_vm1, %v7058_v0  ;;  %298 = vst.msk [vmem:[#allocation2 + $0x98] sm:$0x1] %vm279_vm1, %v7058_v0 }
  0x98   : > { %300 = vst.msk [vmem:[#allocation2 + $0xa8] sm:$0x1] %vm279_vm1, %v7058_v0  ;;  %302 = vst.msk [vmem:[#allocation2 + $0xb8] sm:$0x1] %vm279_vm1, %v7058_v0 }
  0x99   : > { %304 = vst.msk [vmem:[#allocation2 + $0xc8] sm:$0x1] %vm279_vm1, %v7058_v0  ;;  %306 = vst.msk [vmem:[#allocation2 + $0xd8] sm:$0x1] %vm279_vm1, %v7058_v0 }
  0x9a   : > { %308 = vst.msk [vmem:[#allocation2 + $0xe8] sm:$0x1] %vm279_vm1, %v7058_v0  ;;  %310 = vst.msk [vmem:[#allocation2 + $0xf8] sm:$0x1] %vm279_vm1, %v7058_v0 }
  0x9b   : > { %312 = vst.msk [vmem:[#allocation2 + $0x108] sm:$0x1] %vm279_vm1, %v7058_v0  ;;  %314 = vst.msk [vmem:[#allocation2 + $0x118] sm:$0x1] %vm279_vm1, %v7058_v0 }
  0x9c   : > { %328 = vst.msk [vmem:[#allocation12 + $0x60] sm:$0x3] %vm327_vm2, %v7058_v0 }
  0x9d PF: > { %v400_v1 = vld [vmem:[#allocation2 + $0x12] sm:$0x7f]  ;;  %v343_v2 = vld [vmem:[#allocation2 + $0x1] sm:$0x7f]  ;;  %s7059_s23 = smov 32   ;;  %s7060_s24 = smov 64  }
  0x9e   : > { %639 = vrot.lane.b32.xlu1 %v400_v1, %s7059_s23  ;;  %471 = vrot.lane.b32.xlu0 %v343_v2, %s7059_s23  ;;  %v401_v3 = vld [vmem:[#allocation2 + $0x22] sm:$0x7f]  ;;  %v344_v4 = vld [vmem:[#allocation2 + $0x11] sm:$0x7f]  ;;  %s7061_s9 = smov 96   ;;  %v6700_v19 = vld [vmem:[#allocation6 + $0x48] sm:$0xff]  }
  0x9f   : > { %v358_v5 = vld [vmem:[#allocation2 + $0x12] sm:$0x7f]  ;;  %v357_v6 = vld [vmem:[#allocation2 + $0x2] sm:$0x7f]  ;;  %v7062_v26 = vmov 0.0   ;;  %vm7063_vm3 = vmmov 0  }
  0xa0   : > { %v416_v7 = vld [vmem:[#allocation2 + $0x30] sm:$0x7f]  ;;  %v415_v8 = vld [vmem:[#allocation2 + $0x20] sm:$0x7f]  ;;  %v6701_v22 = vld [vmem:[#allocation6 + $0x8] sm:$0xff]   ;;  %6543 = vmatprep.subr.bf16.mxu1 %v7062_v26  ;;  %6547 = vmatprep.mubr.msk.bf16.mxu1 %vm7063_vm3, %v7062_v26  ;;  %vm793_vm4 = vcmask 261120  }
  0xa1   : > { %v372_v9 = vld [vmem:[#allocation2 + $0x10] sm:$0x7f]  ;;  %v345_v10 = vld [vmem:[#allocation2 + $0x21] sm:$0x7f]  ;;  %v6705_v28 = vld [vmem:[#allocation6 + $0x58] sm:$0xff]   ;;  %vm808_vm5 = vcmask 523264  }
  0xa2   : > { %641 = vrot.lane.b32.xlu1 %v401_v3, %s7059_s23  ;;  %473 = vrot.lane.b32.xlu0 %v344_v4, %s7059_s23  ;;  %v402_v11 = vld [vmem:[#allocation2 + $0x32] sm:$0x7f]  ;;  %v373_v12 = vld [vmem:[#allocation2 + $0x20] sm:$0x7f]  ;;  %v6706_v31 = vld [vmem:[#allocation6 + $0x18] sm:$0xff]   ;;  %vm823_vm6 = vcmask 785408  }
  0xa3   : > { %v430_v13 = vld [vmem:[#allocation2 + $0x31] sm:$0x7f]  ;;  %v429_v14 = vld [vmem:[#allocation2 + $0x21] sm:$0x7f]  ;;  %v6709_v37 = vld [vmem:[#allocation6 + $0x68] sm:$0xff]   ;;  %vm3542_vm7 = vcmask 254976  }
  0xa4   : > { %v417_v15 = vld [vmem:[#allocation2 + $0x40] sm:$0x7f]  ;;  %v6696_v17 = vld [vmem:[#allocation6 + $0x40] sm:$0xff]   ;;  %v6710_v40 = vld [vmem:[#allocation6 + $0x28] sm:$0xff]   ;;  %vm4881_vm8 = vcmask 260096   ;;  %p6450_p1 = scmp.ne.s32.totalorder %s7122_s22, 2 }
  0xa5   : > { %v359_v16 = vld [vmem:[#allocation2 + $0x22] sm:$0x7f]  ;;  %v6697_v18 = vld [vmem:[#allocation6] sm:$0xff]   ;;  %6471 = vmatprep.subr.bf16.mxu0 %v6696_v17  ;;  %v6716_v44 = vld [vmem:[#allocation6 + $0x88] sm:$0xff]   ;;  %vm6140_vm9 = vcmask (!%p6450_p1), 523520   ;;  %vm6152_vm10 = vcmask (!%p6450_p1), 516352  }
  0xa6   : > { %529 = vrot.lane.b32.xlu1 %v358_v5, %s7060_s24  ;;  %527 = vrot.lane.b32.xlu0 %v357_v6, %s7060_s24  ;;  %v431_v20 = vld [vmem:[#allocation2 + $0x41] sm:$0x7f]  ;;  %v374_v21 = vld [vmem:[#allocation2 + $0x30] sm:$0x7f]  ;;  %v6715_v46 = vld [vmem:[#allocation6 + $0x78] sm:$0xff]   ;;  %vm7066_vm11 = vmmov (!%p6450_p1), 0  }
  0xa7   : > { %6472 = vmatpush3.bf16.msra.mxu0 %v6697_v18  ;;  %v6702_v23 = vld [vmem:[#allocation6 + $0x50] sm:$0xff]   ;;  %v346_v25 = vld [vmem:[#allocation2 + $0x31] sm:$0x7f]  ;;  %v6717_v49 = vld [vmem:[#allocation6 + $0x38] sm:$0xff]   ;;  %vm6196_vm12 = vcmask (!%p6450_p1), 1041409   ;;  %s7068_s11 = smov (!%p6450_p1), 96  }
  0xa8   : > { %6473 = vmatprep.subr.bf16.mxu0 %v6700_v19  ;;  %v403_v24 = vld [vmem:[#allocation2 + $0x42] sm:$0x7f]  ;;  %v418_v29 = vld [vmem:[#allocation2 + $0x50] sm:$0x7f] }
  0xa9   : > { %v6703_v27 = vld [vmem:[#allocation6 + $0x10] sm:$0xff]   ;;  %v360_v30 = vld [vmem:[#allocation2 + $0x32] sm:$0x7f] }
  0xaa   : > { %697 = vrot.lane.b32.xlu1 %v416_v7, %s7060_s24  ;;  %695 = vrot.lane.b32.xlu0 %v415_v8, %s7060_s24  ;;  %v375_v32 = vld [vmem:[#allocation2 + $0x40] sm:$0x7f]  ;;  %v6707_v33 = vld [vmem:[#allocation6 + $0x60] sm:$0xff]  }
  0xab   : > { %6474 = vmatpush3.bf16.msra.mxu0 %v6701_v22  ;;  %v347_v34 = vld [vmem:[#allocation2 + $0x41] sm:$0x7f]  ;;  %v6708_v35 = vld [vmem:[#allocation6 + $0x20] sm:$0xff]  }
  0xac   : > { %6475 = vmatprep.subr.bf16.mxu0 %v6702_v23  ;;  %v432_v36 = vld [vmem:[#allocation2 + $0x51] sm:$0x7f]  ;;  %v419_v41 = vld [vmem:[#allocation2 + $0x60] sm:$0x7f] }
  0xad   : > { %v404_v38 = vld [vmem:[#allocation2 + $0x52] sm:$0x7f]  ;;  %v6711_v42 = vld [vmem:[#allocation6 + $0x70] sm:$0xff]  }
  0xae   : > { %583 = vrot.lane.b32.xlu1 %v372_v9, %s7061_s9  ;;  %475 = vrot.lane.b32.xlu0 %v345_v10, %s7059_s23  ;;  %v6712_v39 = vld [vmem:[#allocation6 + $0x80] sm:$0xff]   ;;  %v361_v43 = vld [vmem:[#allocation2 + $0x42] sm:$0x7f] }
  0xaf   : > { %6476 = vmatpush3.bf16.msra.mxu0 %v6703_v27  ;;  %6544 = vmatpush3.bf16.msra.mxu1 %v6712_v39  ;;  %v6713_v45 = vld [vmem:[#allocation6 + $0x30] sm:$0xff]   ;;  %v376_v48 = vld [vmem:[#allocation2 + $0x50] sm:$0x7f]  ;;  %v7064_v27 = vmov 1966171168  }
  0xb0   : > { %6477 = vmatprep.subr.bf16.mxu0 %v6705_v28  ;;  %6545 = vmatprep.subr.bf16.mxu1 %v7062_v26  ;;  %v433_v47 = vld [vmem:[#allocation2 + $0x61] sm:$0x7f]  ;;  %v348_v51 = vld [vmem:[#allocation2 + $0x51] sm:$0x7f]  ;;  %v926_v28 = vunpack.c.l.s4 %v7064_v27 }
  0xb1   : > { %v405_v50 = vld [vmem:[#allocation2 + $0x62] sm:$0x7f]  ;;  %v420_v52 = vld [vmem:[#allocation2 + $0x70] sm:$0x7f] }
  0xb2   : > { %643 = vrot.lane.b32.xlu1 %v402_v11, %s7059_s23  ;;  %585 = vrot.lane.b32.xlu0 %v373_v12, %s7061_s9  ;;  %v362_v53 = vld [vmem:[#allocation2 + $0x52] sm:$0x7f]  ;;  %v377_v54 = vld [vmem:[#allocation2 + $0x60] sm:$0x7f] }
  0xb3   : > { %6478 = vmatpush3.bf16.msra.mxu0 %v6706_v31  ;;  %6546 = vmatpush3.bf16.msra.mxu1 %v6716_v44  ;;  %v349_v55 = vld [vmem:[#allocation2 + $0x61] sm:$0x7f]  ;;  %v434_v56 = vld [vmem:[#allocation2 + $0x71] sm:$0x7f] }
  0xb4   : > { %6479 = vmatprep.subr.bf16.mxu0 %v6707_v33  ;;  %v406_v57 = vld [vmem:[#allocation2 + $0x72] sm:$0x7f]  ;;  %v421_v58 = vld [vmem:[#allocation2 + $0x80] sm:$0x7f] }
  0xb5   : > { %v363_v59 = vld [vmem:[#allocation2 + $0x62] sm:$0x7f]  ;;  %v378_v61 = vld [vmem:[#allocation2 + $0x70] sm:$0x7f] }
  0xb6   : > { %753 = vrot.lane.b32.xlu1 %v430_v13, %s7061_s9  ;;  %751 = vrot.lane.b32.xlu0 %v429_v14, %s7061_s9  ;;  %v435_v60 = vld [vmem:[#allocation2 + $0x81] sm:$0x7f]  ;;  %v350_v63 = vld [vmem:[#allocation2 + $0x91] sm:$0x7f] }
  0xb7   : > { %6480 = vmatpush3.bf16.msra.mxu0 %v6708_v35  ;;  %v351_v62 = vld [vmem:[#allocation2 + $0xa1] sm:$0x7f]  ;;  %v408_v0 = vld [vmem:[#allocation2 + $0xb2] sm:$0x7f] }
  0xb8   : > { %6481 = vmatprep.subr.bf16.mxu0 %v6709_v37  ;;  %v407_v1 = vld [vmem:[#allocation2 + $0xa2] sm:$0x7f]  ;;  %v364_v3 = vld [vmem:[#allocation2 + $0x92] sm:$0x7f] }
  0xb9   : > { %v365_v2 = vld [vmem:[#allocation2 + $0xa2] sm:$0x7f]  ;;  %v422_v5 = vld [vmem:[#allocation2 + $0xb0] sm:$0x7f] }
  0xba   : > { %699 = vrot.lane.b32.xlu1 %v417_v15, %s7060_s24  ;;  %531 = vrot.lane.b32.xlu0 %v359_v16, %s7060_s24  ;;  %v423_v4 = vld [vmem:[#allocation2 + $0xc0] sm:$0x7f]  ;;  %v352_v7 = vld [vmem:[#allocation2 + $0xb1] sm:$0x7f] }
  0xbb   : > { %6482 = vmatpush3.bf16.msra.mxu0 %v6710_v40  ;;  %v379_v6 = vld [vmem:[#allocation2 + $0xa0] sm:$0x7f]  ;;  %v380_v9 = vld [vmem:[#allocation2 + $0xb0] sm:$0x7f] }
  0xbc   : > { %6483 = vmatprep.subr.bf16.mxu0 %v6711_v42  ;;  %v409_v8 = vld [vmem:[#allocation2 + $0xc2] sm:$0x7f]  ;;  %v436_v11 = vld [vmem:[#allocation2 + $0xb1] sm:$0x7f] }
  0xbd   : > { %v437_v10 = vld [vmem:[#allocation2 + $0xc1] sm:$0x7f]  ;;  %v424_v12 = vld [vmem:[#allocation2 + $0xd0] sm:$0x7f] }
  0xbe   : > { %755 = vrot.lane.b32.xlu1 %v431_v20, %s7061_s9  ;;  %587 = vrot.lane.b32.xlu0 %v374_v21, %s7061_s9  ;;  %v366_v13 = vld [vmem:[#allocation2 + $0xb2] sm:$0x7f]  ;;  %v381_v15 = vld [vmem:[#allocation2 + $0xc0] sm:$0x7f] }
  0xbf   : > { %6484 = vmatpush3.bf16.msra.mxu0 %v6713_v45  ;;  %v438_v14 = vld [vmem:[#allocation2 + $0xd1] sm:$0x7f]  ;;  %v353_v19 = vld [vmem:[#allocation2 + $0xc1] sm:$0x7f] }
  0xc0   : > { %6485 = vmatprep.subr.bf16.mxu0 %v6715_v46  ;;  %v354_v18 = vld [vmem:[#allocation2 + $0xd1] sm:$0x7f]  ;;  %v411_v22 = vld [vmem:[#allocation2 + $0xe2] sm:$0x7f] }
  0xc1   : > { %v410_v23 = vld [vmem:[#allocation2 + $0xd2] sm:$0x7f]  ;;  %v367_v31 = vld [vmem:[#allocation2 + $0xc2] sm:$0x7f] }
  0xc2   : > { %645 = vrot.lane.b32.xlu1 %v403_v24, %s7059_s23  ;;  %477 = vrot.lane.b32.xlu0 %v346_v25, %s7059_s23  ;;  %v425_v37 = vld [vmem:[#allocation2 + $0xe0] sm:$0x7f]  ;;  %v382_v45 = vld [vmem:[#allocation2 + $0xd0] sm:$0x7f] }
  0xc3   : > { %6486 = vmatpush3.bf16.msra.mxu0 %v6717_v49  ;;  %v383_v44 = vld [vmem:[#allocation2 + $0xe0] sm:$0x7f]  ;;  %v330_v49 = vld [vmem:[#allocation2 + $0x10] sm:$0x7f] }
  0xc4   : > { %v443_v46 = vld [vmem:[#allocation2 + $0x22] sm:$0x7f] }
  0xc6   : > { %701 = vrot.lane.b32.xlu1 %v418_v29, %s7060_s24  ;;  %533 = vrot.lane.b32.xlu0 %v360_v30, %s7060_s24  ;;  %v928_v29 = vlaneseq  ;;  %v368_v30 = vld [vmem:[#allocation2 + $0xd2] sm:$0x7f] }
  0xc8   : > { %v929_v35 = vshrl.u32 %v928_v29, 7 }
  0xca   : > { %589 = vrot.lane.b32.xlu1 %v375_v32, %s7061_s9  ;;  %479 = vrot.lane.b32.xlu0 %v347_v34, %s7059_s23  ;;  %v927_v34 = vunpack.c.0.s8 %v926_v28 }
  0xcc   : > { %v7414_v42 = vsub.s32 %v927_v34, %v929_v35 }
  0xce   : > { %757 = vrot.lane.b32.xlu1 %v432_v36, %s7061_s9  ;;  %647 = vrot.lane.b32.xlu0 %v404_v38, %s7059_s23  ;;  %v426_v36 = vld [vmem:[#allocation2 + $0xf0] sm:$0x7f] }
  0xcf   : > { %v444_v38 = vld [vmem:[#allocation2 + $0x32] sm:$0x7f] }
  0xd2   : > { %703 = vrot.lane.b32.xlu1 %v419_v41, %s7060_s24  ;;  %535 = vrot.lane.b32.xlu0 %v361_v43, %s7060_s24  ;;  %v386_v41 = vld [vmem:[#allocation2 + $0x11] sm:$0x7f]  ;;  %v990_v43 = vcombine.high %v444_v38, %v444_v38 }
  0xd6   : > { %759 = vrot.lane.b32.xlu1 %v433_v47, %s7061_s9  ;;  %591 = vrot.lane.b32.xlu0 %v376_v48, %s7061_s9  ;;  %v329_v47 = vld [vmem:[#allocation2] sm:$0x7f] }
  0xd7   : > { %v387_v48 = vld [vmem:[#allocation2 + $0x21] sm:$0x7f] }
  0xda   : > { %649 = vrot.lane.b32.xlu1 %v405_v50, %s7059_s23  ;;  %481 = vrot.lane.b32.xlu0 %v348_v51, %s7059_s23 }
  0xde   : > { %705 = vrot.lane.b32.xlu1 %v420_v52, %s7060_s24  ;;  %537 = vrot.lane.b32.xlu0 %v362_v53, %s7060_s24  ;;  %v1011_v52 = vrot.slane %v444_v38, %v7414_v42  ;;  %v7420_v53 = vrot.slane %v990_v43, %v7414_v42 }
  0xe2   : > { %593 = vrot.lane.b32.xlu1 %v377_v54, %s7061_s9  ;;  %483 = vrot.lane.b32.xlu0 %v349_v55, %s7059_s23  ;;  %v924_v54 = vcombine.high %v443_v46, %v443_v46 }
  0xe6   : > { %761 = vrot.lane.b32.xlu1 %v434_v56, %s7061_s9  ;;  %651 = vrot.lane.b32.xlu0 %v406_v57, %s7059_s23 }
  0xea   : > { %707 = vrot.lane.b32.xlu1 %v421_v58, %s7060_s24  ;;  %539 = vrot.lane.b32.xlu0 %v363_v59, %s7060_s24  ;;  %v440_v59 = vld [vmem:[#allocation2 + $0xf1] sm:$0x7f] }
  0xee   : > { %763 = vrot.lane.b32.xlu1 %v435_v60, %s7061_s9  ;;  %595 = vrot.lane.b32.xlu0 %v378_v61, %s7061_s9 }
  0xf2   : > { %487 = vrot.lane.b32.xlu1 %v351_v62, %s7059_s23  ;;  %485 = vrot.lane.b32.xlu0 %v350_v63, %s7059_s23 }
  0xf6   : > { %655 = vrot.lane.b32.xlu1 %v408_v0, %s7059_s23  ;;  %653 = vrot.lane.b32.xlu0 %v407_v1, %s7059_s23 }
  0xfa   : > { %543 = vrot.lane.b32.xlu1 %v365_v2, %s7060_s24  ;;  %541 = vrot.lane.b32.xlu0 %v364_v3, %s7060_s24  ;;  %v439_v2 = vld [vmem:[#allocation2 + $0xe1] sm:$0x7f] }
  0xfe   : > { %711 = vrot.lane.b32.xlu1 %v423_v4, %s7060_s24  ;;  %709 = vrot.lane.b32.xlu0 %v422_v5, %s7060_s24 }
 0x102   : > { %597 = vrot.lane.b32.xlu1 %v379_v6, %s7061_s9  ;;  %489 = vrot.lane.b32.xlu0 %v352_v7, %s7059_s23  ;;  %v331_v7 = vld [vmem:[#allocation2 + $0x20] sm:$0x7f] }
 0x106   : > { %657 = vrot.lane.b32.xlu1 %v409_v8, %s7059_s23  ;;  %599 = vrot.lane.b32.xlu0 %v380_v9, %s7061_s9 }
 0x10a   : > { %767 = vrot.lane.b32.xlu1 %v437_v10, %s7061_s9  ;;  %765 = vrot.lane.b32.xlu0 %v436_v11, %s7061_s9 }
 0x10e   : > { %713 = vrot.lane.b32.xlu1 %v424_v12, %s7060_s24  ;;  %545 = vrot.lane.b32.xlu0 %v366_v13, %s7060_s24  ;;  %v445_v12 = vld [vmem:[#allocation2 + $0x42] sm:$0x7f]  ;;  %v388_v13 = vld [vmem:[#allocation2 + $0x31] sm:$0x7f] }
 0x10f   : > { %v7446_v27 = vrot.slane %v445_v12, %v7414_v42 }
 0x110   : > { %v640_v16 = vpop.permute.xlu1 %639  ;;  %v472_v17 = vpop.permute.xlu0 %471 }
 0x111   : > { %v838_v55 = vsel %vm793_vm4, %v386_v41, %v640_v16  ;;  %v794_v56 = vsel %vm793_vm4, %v329_v47, %v472_v17  ;;  %v356_v16 = vld [vmem:[#allocation2 + $0xf1] sm:$0x7f] }
 0x112   : > { %769 = vrot.lane.b32.xlu1 %v438_v14, %s7061_s9  ;;  %601 = vrot.lane.b32.xlu0 %v381_v15, %s7061_s9  ;;  %v945_v14 = vrot.slane %v443_v46, %v7414_v42  ;;  %v952_v15 = vrot.slane %v924_v54, %v7414_v42 }
 0x114   : > { %v642_v20 = vpop.permute.xlu1 %641  ;;  %v474_v21 = vpop.permute.xlu0 %473 }
 0x115   : > { %v839_v57 = vsel %vm793_vm4, %v387_v48, %v642_v20  ;;  %v795_v58 = vsel %vm793_vm4, %v330_v49, %v474_v21 }
 0x116   : > { %493 = vrot.lane.b32.xlu1 %v354_v18, %s7059_s23  ;;  %491 = vrot.lane.b32.xlu0 %v353_v19, %s7059_s23 }
 0x118   : > { %v530_v24 = vpop.permute.xlu1 %529  ;;  %v528_v25 = vpop.permute.xlu0 %527 }
 0x119   : > { %v810_v60 = vsel %vm808_vm5, %v795_v58, %v530_v24  ;;  %v809_v61 = vsel %vm808_vm5, %v794_v56, %v528_v25  ;;  %v1056_v25 = vcombine.high %v445_v12, %v445_v12  ;;  %v370_v56 = vld [vmem:[#allocation2 + $0xf2] sm:$0x7f] }
 0x11a   : > { %661 = vrot.lane.b32.xlu1 %v411_v22, %s7059_s23  ;;  %659 = vrot.lane.b32.xlu0 %v410_v23, %s7059_s23  ;;  %v355_v23 = vld [vmem:[#allocation2 + $0xe1] sm:$0x7f] }
 0x11c   : > { %v698_v32 = vpop.permute.xlu1 %697  ;;  %v696_v33 = vpop.permute.xlu0 %695 }
 0x11d   : > { %v853_v62 = vsel %vm808_vm5, %v839_v57, %v698_v32  ;;  %v852_v63 = vsel %vm808_vm5, %v838_v55, %v696_v33 }
 0x11e   : > { %549 = vrot.lane.b32.xlu1 %v368_v30, %s7060_s24  ;;  %547 = vrot.lane.b32.xlu0 %v367_v31, %s7060_s24 }
 0x120   : > { %v584_v39 = vpop.permute.xlu1 %583  ;;  %v476_v40 = vpop.permute.xlu0 %475 }
 0x121   : > { %v824_v3 = vsel %vm823_vm6, %v809_v61, %v584_v39  ;;  %v796_v24 = vsel %vm793_vm4, %v331_v7, %v476_v40  ;;  %v446_v7 = vld [vmem:[#allocation2 + $0x52] sm:$0x7f] }
 0x122   : > { %717 = vrot.lane.b32.xlu1 %v426_v36, %s7060_s24  ;;  %715 = vrot.lane.b32.xlu0 %v425_v37, %s7060_s24  ;;  %v413_v36 = vld [vmem:[#allocation2 + $0x102] sm:$0x7f] }
 0x124   : > { %v644_v50 = vpop.permute.xlu1 %643  ;;  %v586_v51 = vpop.permute.xlu0 %585 }
 0x125   : > { %v825_v4 = vsel %vm823_vm6, %v810_v60, %v586_v51  ;;  %v840_v28 = vsel %vm793_vm4, %v388_v13, %v644_v50  ;;  %v1084_v60 = vrot.slane %v1056_v25, %v7414_v42 }
 0x126   : > { %605 = vrot.lane.b32.xlu1 %v383_v44, %s7061_s9  ;;  %603 = vrot.lane.b32.xlu0 %v382_v45, %s7061_s9  ;;  %v412_v44 = vld [vmem:[#allocation2 + $0xf2] sm:$0x7f] }
 0x128   : > { %v754_v0 = vpop.permute.xlu1 %753  ;;  %v752_v1 = vpop.permute.xlu0 %751 }
 0x129   : > { %v867_v5 = vsel %vm823_vm6, %v853_v62, %v754_v0  ;;  %v866_v6 = vsel %vm823_vm6, %v852_v63, %v752_v1  ;;  %v369_v1 = vld [vmem:[#allocation2 + $0xe2] sm:$0x7f] }
 0x12a   : > { %v988_v8 = vcombine.low %v825_v4, %v867_v5  ;;  %v989_v9 = vcombine.high %v825_v4, %v867_v5  ;;  %v922_v10 = vcombine.low %v824_v3, %v866_v6  ;;  %v923_v11 = vcombine.high %v824_v3, %v866_v6  ;;  %773 = vrot.lane.b32.xlu1 %v440_v59, %s7061_s9 }
 0x12b   : > { %771 = vrot.lane.b32.xlu0 %v439_v2, %s7061_s9 }
 0x12c   : > { %v997_v17 = vrot.slane %v988_v8, %v7414_v42  ;;  %v7440_v18 = vrot.slane %v989_v9, %v7414_v42  ;;  %v931_v19 = vrot.slane %v922_v10, %v7414_v42  ;;  %v938_v20 = vrot.slane %v923_v11, %v7414_v42  ;;  %v700_v21 = vpop.permute.xlu1 %699  ;;  %v532_v22 = vpop.permute.xlu0 %531 }
 0x12d   : > { %v854_v39 = vsel %vm808_vm5, %v840_v28, %v700_v21  ;;  %v811_v40 = vsel %vm808_vm5, %v796_v24, %v532_v22  ;;  %v332_v21 = vld [vmem:[#allocation2 + $0x30] sm:$0x7f]  ;;  %v1122_v22 = vcombine.high %v446_v7, %v446_v7 }
 0x12e   : > { %v1019_v29 = vcombine.low %v997_v17, %v1011_v52  ;;  %v1020_v30 = vcombine.high %v997_v17, %v1011_v52  ;;  %v1021_v31 = vcombine.low %v7440_v18, %v7420_v53  ;;  %497 = vrot.lane.b32.xlu1 %v356_v16, %s7059_s23  ;;  %v953_v32 = vcombine.low %v931_v19, %v945_v14 }
 0x12f   : > { %v954_v33 = vcombine.high %v931_v19, %v945_v14  ;;  %v955_v34 = vcombine.low %v938_v20, %v952_v15  ;;  %v956_v35 = vcombine.high %v938_v20, %v952_v15  ;;  %495 = vrot.lane.b32.xlu0 %v355_v23, %s7059_s23  ;;  %v1022_v59 = vcombine.high %v7440_v18, %v7420_v53  ;;  %v428_v53 = vld [vmem:[#allocation2 + $0x110] sm:$0x7f]  ;;  %v427_v19 = vld [vmem:[#allocation2 + $0x100] sm:$0x7f] }
 0x130   : > { %v1029_v37 = vrot.slane %v1019_v29, %v7414_v42  ;;  %v1043_v38 = vrot.slane %v1020_v30, %v7414_v42  ;;  %v756_v41 = vpop.permute.xlu1 %755  ;;  %v588_v43 = vpop.permute.xlu0 %587  ;;  %v963_v45 = vrot.slane %v953_v32, %v7414_v42  ;;  %v1036_v49 = vrot.slane %v1021_v31, %v7414_v42  ;;  %v389_v20 = vld [vmem:[#allocation2 + $0x41] sm:$0x7f] }
 0x131   : > { %v970_v46 = vrot.slane %v955_v34, %v7414_v42  ;;  %v977_v47 = vrot.slane %v954_v33, %v7414_v42  ;;  %v984_v48 = vrot.slane %v956_v35, %v7414_v42  ;;  %v868_v52 = vsel %vm823_vm6, %v854_v39, %v756_v41  ;;  %v385_v31 = vld [vmem:[#allocation2 + $0x100] sm:$0x7f] }
 0x132   : > { %v1051_v50 = vcombine.high %v1029_v37, %v1029_v37  ;;  %v1053_v51 = vcombine.high %v1043_v38, %v1043_v38  ;;  %665 = vrot.lane.b32.xlu1 %v413_v36, %s7059_s23  ;;  %v826_v55 = vsel %vm823_vm6, %v811_v40, %v588_v43  ;;  %v1052_v4 = vcombine.high %v1036_v49, %v1036_v49  ;;  %v384_v40 = vld [vmem:[#allocation2 + $0xf0] sm:$0x7f] }
 0x133   : > { %v986_v54 = vcombine.high %v970_v46, %v970_v46  ;;  %663 = vrot.lane.b32.xlu0 %v412_v44, %s7059_s23  ;;  %v1859_v57 = vcombine.low %v963_v45, %v977_v47  ;;  %v6395_v58 = vcombine.high %v963_v45, %v977_v47  ;;  %v1054_v61 = vcombine.low %v826_v55, %v868_v52 }
 0x134   : > { %v1055_v62 = vcombine.high %v826_v55, %v868_v52  ;;  %v646_v63 = vpop.permute.xlu1 %645  ;;  %v478_v0 = vpop.permute.xlu0 %477  ;;  %v1861_v2 = vcombine.low %v970_v46, %v984_v48  ;;  %v1926_v8 = vcombine.low %v1043_v38, %v1051_v50  ;;  %v1927_v12 = vcombine.low %v1053_v51, %v1036_v49  ;;  %v442_v52 = vld [vmem:[#allocation2 + $0x111] sm:$0x7f] }
 0x135   : > { %v1862_v3 = vcombine.low %v986_v54, %v1029_v37  ;;  %v1063_v5 = vrot.slane %v1054_v61, %v7414_v42  ;;  %v7474_v9 = vrot.slane %v1859_v57, %v7414_v42  ;;  %v7477_v10 = vrot.slane %v6395_v58, %v7414_v42 }
 0x136   : > { %v1070_v6 = vrot.slane %v1055_v62, %v7414_v42  ;;  %553 = vrot.lane.b32.xlu1 %v370_v56, %s7060_s24  ;;  %v1050_v13 = vrot.slane %v1022_v59, %v7414_v42  ;;  %v7484_v23 = vrot.slane %v446_v7, %v7414_v42  ;;  %v1883_v24 = vrot.slane %v1861_v2, %v7414_v42  ;;  %v333_v59 = vld [vmem:[#allocation2 + $0x40] sm:$0x7f]  ;;  %v390_v7 = vld [vmem:[#allocation2 + $0x51] sm:$0x7f] }
 0x137   : > { %551 = vrot.lane.b32.xlu0 %v369_v1, %s7060_s24  ;;  %v1890_v11 = vrot.slane %v1862_v3, %v7414_v42  ;;  %v1085_v14 = vcombine.low %v1063_v5, %v7446_v27  ;;  %v1086_v15 = vcombine.high %v1063_v5, %v7446_v27  ;;  %v1936_v29 = vrot.slane %v1926_v8, %v7414_v42  ;;  %v441_v62 = vld [vmem:[#allocation2 + $0x101] sm:$0x7f] }
 0x138   : > { %v1087_v16 = vcombine.low %v1070_v6, %v1084_v60  ;;  %v702_v17 = vpop.permute.xlu1 %701  ;;  %v534_v18 = vpop.permute.xlu0 %533  ;;  %v1928_v27 = vcombine.low %v1050_v13, %v1052_v4  ;;  %v1088_v30 = vcombine.high %v1070_v6, %v1084_v60  ;;  %v1892_v32 = vcombine.high %v7474_v9, %v7477_v10 }
 0x139   : > { %v7488_v25 = vrot.slane %v1085_v14, %v7414_v42  ;;  %v7491_v28 = vrot.slane %v1086_v15, %v7414_v42  ;;  %v1894_v33 = vcombine.high %v1883_v24, %v1890_v11  ;;  %v1943_v34 = vrot.slane %v1927_v12, %v7414_v42 }
 0x13a   : > { %721 = vrot.lane.b32.xlu1 %v428_v53, %s7060_s24  ;;  %v7500_v35 = vrot.slane %v1087_v16, %v7414_v42  ;;  %v841_v36 = vsel %vm793_vm4, %v389_v20, %v646_v63  ;;  %v797_v37 = vsel %vm793_vm4, %v332_v21, %v478_v0  ;;  %v7509_v45 = vrot.slane %v1122_v22, %v7414_v42 }
 0x13b   : > { %719 = vrot.lane.b32.xlu0 %v427_v19, %s7060_s24  ;;  %v1929_v41 = vcombine.low %v7488_v25, %v7491_v28  ;;  %v855_v43 = vsel %vm808_vm5, %v841_v36, %v702_v17  ;;  %v812_v44 = vsel %vm808_vm5, %v797_v37, %v534_v18  ;;  %v1893_v46 = vcombine.low %v1883_v24, %v1890_v11 }
 0x13c   : > { %v590_v38 = vpop.permute.xlu1 %589  ;;  %v480_v39 = vpop.permute.xlu0 %479  ;;  %v1950_v47 = vrot.slane %v1928_v27, %v7414_v42  ;;  %v1958_v49 = vcombine.low %v1936_v29, %v1943_v34  ;;  %v1959_v50 = vcombine.high %v1936_v29, %v1943_v34  ;;  %v7515_v51 = vrot.slane %v1088_v30, %v7414_v42 }
 0x13d   : > { %v1957_v48 = vrot.slane %v1929_v41, %v7414_v42  ;;  %v1891_v54 = vcombine.low %v7474_v9, %v7477_v10  ;;  %v1908_v55 = vrot.slane %v1892_v32, %v7414_v42  ;;  %v1922_v56 = vrot.slane %v1894_v33, %v7414_v42 }
 0x13e   : > { %609 = vrot.lane.b32.xlu1 %v385_v31, %s7061_s9  ;;  %v1118_v57 = vcombine.high %v7500_v35, %v7500_v35  ;;  %v827_v58 = vsel %vm823_vm6, %v812_v44, %v590_v38  ;;  %v1975_v2 = vrot.slane %v1959_v50, %v7414_v42  ;;  %v1915_v3 = vrot.slane %v1893_v46, %v7414_v42 }
 0x13f   : > { %607 = vrot.lane.b32.xlu0 %v384_v40, %s7061_s9  ;;  %v1960_v63 = vcombine.low %v1950_v47, %v1957_v48  ;;  %v1961_v0 = vcombine.high %v1950_v47, %v1957_v48  ;;  %v1968_v4 = vrot.slane %v1958_v49, %v7414_v42  ;;  %v6396_v9 = vcombine.high %v7488_v25, %v7491_v28  ;;  %v447_v47 = vld [vmem:[#allocation2 + $0x62] sm:$0x7f] }
 0x140   : > { %v758_v60 = vpop.permute.xlu1 %757  ;;  %v648_v61 = vpop.permute.xlu0 %647  ;;  %v798_v10 = vsel %vm793_vm4, %v333_v59, %v480_v39  ;;  %v1925_v11 = vcombine.low %v1908_v55, %v1922_v56  ;;  %v1901_v12 = vrot.slane %v1891_v54, %v7414_v42  ;;  %v1209_v48 = vrot.slane %v447_v47, %v7414_v42 }
 0x141   : > { %v869_v1 = vsel %vm823_vm6, %v855_v43, %v758_v60  ;;  %v1989_v8 = vrot.slane %v1961_v0, %v7414_v42  ;;  %v1982_v53 = vrot.slane %v1960_v63, %v7414_v42  ;;  %v842_v19 = vsel %vm793_vm4, %v390_v7, %v648_v61  ;;  %v448_v7 = vld [vmem:[#allocation2 + $0x72] sm:$0x7f] }
 0x142   : > { %v1120_v5 = vcombine.low %v827_v58, %v869_v1  ;;  %v1121_v6 = vcombine.high %v827_v58, %v869_v1  ;;  %777 = vrot.lane.b32.xlu1 %v442_v52, %s7061_s9  ;;  %v1924_v20 = vcombine.high %v1901_v12, %v1915_v3  ;;  %v1923_v21 = vcombine.low %v1901_v12, %v1915_v3 }
 0x143   : > { %775 = vrot.lane.b32.xlu0 %v441_v62, %s7061_s9  ;;  %v1992_v17 = vcombine.low %v1975_v2, %v1989_v8  ;;  %v1991_v18 = vcombine.high %v1968_v4, %v1982_v53  ;;  %v1990_v22 = vcombine.low %v1968_v4, %v1982_v53  ;;  %v2003_v58 = vrot.slane %v6396_v9, %v7414_v42 }
 0x144   : > { %v1129_v13 = vrot.slane %v1120_v5, %v7414_v42  ;;  %v1136_v14 = vrot.slane %v1121_v6, %v7414_v42  ;;  %v704_v15 = vpop.permute.xlu1 %703  ;;  %v536_v16 = vpop.permute.xlu0 %535  ;;  %v1188_v60 = vcombine.high %v447_v47, %v447_v47  ;;  %v449_v47 = vld [vmem:[#allocation2 + $0x82] sm:$0x7f] }
 0x145   : > { %v856_v29 = vsel %vm808_vm5, %v842_v19, %v704_v15  ;;  %v2727_v30 = vpack.c.bf16 %v1992_v17, %v1925_v11  ;;  %v2728_v31 = vpack.c.bf16 %v1991_v18, %v1924_v20  ;;  %v2726_v32 = vpack.c.bf16 %v1990_v22, %v1923_v21  ;;  %v334_v15 = vld [vmem:[#allocation2 + $0x50] sm:$0x7f] }
 0x146   : > { %v1151_v24 = vcombine.low %v1129_v13, %v7484_v23  ;;  %v1152_v25 = vcombine.high %v1129_v13, %v7484_v23  ;;  %v1153_v28 = vcombine.low %v1136_v14, %v7509_v45  ;;  %v1154_v27 = vcombine.high %v1136_v14, %v7509_v45  ;;  %v391_v14 = vld [vmem:[#allocation2 + $0x61] sm:$0x7f] }
 0x147   : > { %v813_v37 = vsel %vm808_vm5, %v798_v10, %v536_v16  ;;  %v1994_v23 = vcombine.low %v7500_v35, %v7515_v51  ;;  %2944 = vmatprep.mubr.bf16.mxu0 %v2727_v30  ;;  %6548 = vmatmul.mubr.msk.bf16.vlgmr.msra.gmra.mrb[0].mxu1 %vm793_vm4, %v2728_v31  ;;  %v7568_v53 = vrot.slane %v1188_v60, %v7414_v42 }
 0x148   : > { %v1161_v33 = vrot.slane %v1151_v24, %v7414_v42  ;;  %v1168_v34 = vrot.slane %v1153_v28, %v7414_v42  ;;  %v1175_v36 = vrot.slane %v1152_v25, %v7414_v42  ;;  %v760_v38 = vpop.permute.xlu1 %759  ;;  %v592_v39 = vpop.permute.xlu0 %591  ;;  %v1182_v43 = vrot.slane %v1154_v27, %v7414_v42  ;;  %2945 = vmatmul.mubr.bf16.vlgmr.msra.gmra.mrb[0].mxu0 %v2726_v32 }
 0x149   : > { %v870_v40 = vsel %vm823_vm6, %v856_v29, %v760_v38  ;;  %v828_v41 = vsel %vm823_vm6, %v813_v37, %v592_v39  ;;  %6551 = vmatprep.mubr.msk.bf16.mxu1 %vm7063_vm3, %v7062_v26  ;;  %v2010_v59 = vrot.slane %v1994_v23, %v7414_v42  ;;  %v1254_v19 = vcombine.high %v448_v7, %v448_v7 }
 0x14a   : > { %v1183_v44 = vcombine.high %v1161_v33, %v1161_v33  ;;  %v1184_v45 = vcombine.high %v1168_v34, %v1168_v34  ;;  %v1185_v46 = vcombine.high %v1175_v36, %v1175_v36  ;;  %v1186_v49 = vcombine.low %v828_v41, %v870_v40 }
 0x14b   : > { %v1995_v35 = vcombine.low %v1118_v57, %v1161_v33  ;;  %v1187_v62 = vcombine.high %v828_v41, %v870_v40  ;;  %v2026_v8 = vcombine.high %v2003_v58, %v2010_v59  ;;  %v2025_v10 = vcombine.low %v2003_v58, %v2010_v59  ;;  %v335_v59 = vld [vmem:[#allocation2 + $0x60] sm:$0x7f] }
 0x14c   : > { %v1996_v50 = vcombine.low %v1175_v36, %v1183_v44  ;;  %v2060_v51 = vcombine.low %v1185_v46, %v1168_v34  ;;  %v2061_v52 = vcombine.low %v1182_v43, %v1184_v45  ;;  %v650_v54 = vpop.permute.xlu1 %649  ;;  %v482_v55 = vpop.permute.xlu0 %481  ;;  %v1195_v56 = vrot.slane %v1186_v49, %v7414_v42 }
 0x14d   : > { %v2017_v57 = vrot.slane %v1995_v35, %v7414_v42  ;;  %v7571_v11 = vrot.slane %v1187_v62, %v7414_v42  ;;  %v1275_v22 = vrot.slane %v448_v7, %v7414_v42  ;;  %v2042_v24 = vrot.slane %v2026_v8, %v7414_v42 }
 0x14e   : > { %v2024_v61 = vrot.slane %v1996_v50, %v7414_v42  ;;  %v1217_v63 = vcombine.low %v1195_v56, %v1209_v48  ;;  %v1218_v0 = vcombine.high %v1195_v56, %v1209_v48  ;;  %v2070_v3 = vrot.slane %v2060_v51, %v7414_v42  ;;  %v392_v51 = vld [vmem:[#allocation2 + $0x71] sm:$0x7f] }
 0x14f   : > { %v2077_v4 = vrot.slane %v2061_v52, %v7414_v42  ;;  %v843_v27 = vsel %vm793_vm4, %v391_v14, %v650_v54  ;;  %v799_v29 = vsel %vm793_vm4, %v334_v15, %v482_v55  ;;  %v2035_v31 = vrot.slane %v2025_v10, %v7414_v42 }
 0x150   : > { %v706_v1 = vpop.permute.xlu1 %705  ;;  %v538_v2 = vpop.permute.xlu0 %537  ;;  %v1227_v5 = vrot.slane %v1217_v63, %v7414_v42  ;;  %v1241_v6 = vrot.slane %v1218_v0, %v7414_v42  ;;  %v2028_v9 = vcombine.high %v2017_v57, %v2024_v61  ;;  %v2027_v16 = vcombine.low %v2017_v57, %v2024_v61 }
 0x151   : > { %v2093_v20 = vcombine.high %v2070_v3, %v2077_v4  ;;  %v2092_v21 = vcombine.low %v2070_v3, %v2077_v4  ;;  %v1219_v32 = vcombine.low %v7571_v11, %v7568_v53  ;;  %v857_v37 = vsel %vm808_vm5, %v843_v27, %v706_v1 }
 0x152   : > { %v2062_v12 = vcombine.low %v1227_v5, %v1241_v6  ;;  %v6397_v13 = vcombine.high %v1227_v5, %v1241_v6  ;;  %v2056_v30 = vrot.slane %v2028_v9, %v7414_v42  ;;  %v2049_v34 = vrot.slane %v2027_v16, %v7414_v42 }
 0x153   : > { %v814_v38 = vsel %vm808_vm5, %v799_v29, %v538_v2  ;;  %v2109_v40 = vrot.slane %v2093_v20, %v7414_v42  ;;  %v2102_v41 = vrot.slane %v2092_v21, %v7414_v42  ;;  %v1282_v48 = vrot.slane %v1254_v19, %v7414_v42 }
 0x154   : > { %v594_v17 = vpop.permute.xlu1 %593  ;;  %v484_v18 = vpop.permute.xlu0 %483  ;;  %v2084_v25 = vrot.slane %v2062_v12, %v7414_v42  ;;  %v2091_v28 = vrot.slane %v6397_v13, %v7414_v42  ;;  %v2059_v50 = vcombine.low %v2042_v24, %v2056_v30  ;;  %v2058_v54 = vcombine.high %v2035_v31, %v2049_v34 }
 0x155   : > { %v829_v43 = vsel %vm823_vm6, %v814_v38, %v594_v17  ;;  %v1220_v58 = vcombine.high %v7571_v11, %v7568_v53  ;;  %v1320_v0 = vcombine.high %v449_v47, %v449_v47  ;;  %v1234_v1 = vrot.slane %v1219_v32, %v7414_v42 }
 0x156   : > { %v2095_v33 = vcombine.high %v2084_v25, %v2091_v28  ;;  %v2094_v36 = vcombine.low %v2084_v25, %v2091_v28  ;;  %v2057_v3 = vcombine.low %v2035_v31, %v2049_v34  ;;  %v800_v8 = vsel %vm793_vm4, %v335_v59, %v484_v18 }
 0x157   : > { %v1248_v16 = vrot.slane %v1220_v58, %v7414_v42  ;;  %v1250_v19 = vcombine.high %v1234_v1, %v1234_v1  ;;  %v1341_v24 = vrot.slane %v449_v47, %v7414_v42  ;;  %v1348_v25 = vrot.slane %v1320_v0, %v7414_v42 }
 0x158   : > { %v762_v39 = vpop.permute.xlu1 %761  ;;  %v652_v23 = vpop.permute.xlu0 %651  ;;  %v2123_v45 = vrot.slane %v2095_v33, %v7414_v42  ;;  %v2116_v46 = vrot.slane %v2094_v36, %v7414_v42 }
 0x159   : > { %v871_v44 = vsel %vm823_vm6, %v857_v37, %v762_v39  ;;  %v844_v7 = vsel %vm793_vm4, %v392_v51, %v652_v23  ;;  %v2127_v38 = vcombine.low %v1234_v1, %v1248_v16 }
 0x15a   : > { %v1252_v49 = vcombine.low %v829_v43, %v871_v44  ;;  %v1253_v35 = vcombine.high %v829_v43, %v871_v44  ;;  %v2126_v52 = vcombine.low %v2109_v40, %v2123_v45  ;;  %v2125_v55 = vcombine.high %v2102_v41, %v2116_v46 }
 0x15b   : > { %v2124_v56 = vcombine.low %v2102_v41, %v2116_v46 }
 0x15c   : > { %v1261_v60 = vrot.slane %v1252_v49, %v7414_v42  ;;  %v1268_v61 = vrot.slane %v1253_v35, %v7414_v42  ;;  %v708_v62 = vpop.permute.xlu1 %707  ;;  %v540_v63 = vpop.permute.xlu0 %539  ;;  %v2730_v2 = vpack.c.bf16 %v2126_v52, %v2059_v50  ;;  %v2731_v57 = vpack.c.bf16 %v2125_v55, %v2058_v54 }
 0x15d   : > { %v858_v53 = vsel %vm808_vm5, %v844_v7, %v708_v62  ;;  %v2729_v9 = vpack.c.bf16 %v2124_v56, %v2057_v3  ;;  %v815_v13 = vsel %vm808_vm5, %v800_v8, %v540_v63  ;;  %v2137_v54 = vrot.slane %v2127_v38, %v7414_v42  ;;  %v393_v38 = vld [vmem:[#allocation2 + $0xa1] sm:$0x7f] }
 0x15e   : > { %v1283_v4 = vcombine.low %v1261_v60, %v1275_v22  ;;  %v1284_v5 = vcombine.high %v1261_v60, %v1275_v22  ;;  %v1285_v6 = vcombine.low %v1268_v61, %v1282_v48  ;;  %2952 = vmatprep.mubr.bf16.mxu0 %v2730_v2  ;;  %6552 = vmatmul.mubr.msk.bf16.gmra.mrb[4].mxu1 %vm793_vm4, %v2731_v57 }
 0x15f   : > { %6555 = vmatprep.mubr.msk.bf16.mxu1 %vm7063_vm3, %v7062_v26  ;;  %2953 = vmatmul.mubr.bf16.gmra.mrb[4].mxu0 %v2729_v9  ;;  %v1286_v20 = vcombine.high %v1268_v61, %v1282_v48 }
 0x160   : > { %v1293_v10 = vrot.slane %v1283_v4, %v7414_v42  ;;  %v1300_v11 = vrot.slane %v1285_v6, %v7414_v42  ;;  %v1307_v12 = vrot.slane %v1284_v5, %v7414_v42  ;;  %v764_v14 = vpop.permute.xlu1 %763  ;;  %v596_v15 = vpop.permute.xlu0 %595 }
 0x161   : > { %v872_v17 = vsel %vm823_vm6, %v858_v53, %v764_v14  ;;  %v830_v18 = vsel %vm823_vm6, %v815_v13, %v596_v15  ;;  %v1314_v39 = vrot.slane %v1286_v20, %v7414_v42 }
 0x162   : > { %v1315_v21 = vcombine.high %v1293_v10, %v1293_v10  ;;  %v1317_v22 = vcombine.high %v1307_v12, %v1307_v12  ;;  %v1318_v28 = vcombine.low %v830_v18, %v872_v17  ;;  %v1319_v27 = vcombine.high %v830_v18, %v872_v17 }
 0x163   : > { %v1316_v29 = vcombine.high %v1300_v11, %v1300_v11  ;;  %v2128_v30 = vcombine.low %v1250_v19, %v1293_v10 }
 0x164   : > { %v2129_v31 = vcombine.low %v1307_v12, %v1315_v21  ;;  %v2130_v32 = vcombine.low %v1317_v22, %v1300_v11  ;;  %v7613_v33 = vpop.permute.xlu1 %487  ;;  %v7615_v34 = vpop.permute.xlu0 %485  ;;  %v1327_v36 = vrot.slane %v1318_v28, %v7414_v42  ;;  %v1334_v37 = vrot.slane %v1319_v27, %v7414_v42 }
 0x165   : > { %v2194_v46 = vcombine.low %v1314_v39, %v1316_v29  ;;  %v2144_v49 = vrot.slane %v2128_v30, %v7414_v42  ;;  %v337_v30 = vld [vmem:[#allocation2 + $0xa0] sm:$0x7f] }
 0x166   : > { %v2151_v23 = vrot.slane %v2129_v31, %v7414_v42  ;;  %v2158_v40 = vrot.slane %v2130_v32, %v7414_v42  ;;  %v1349_v41 = vcombine.low %v1327_v36, %v1341_v24  ;;  %v1350_v43 = vcombine.high %v1327_v36, %v1341_v24  ;;  %v451_v31 = vld [vmem:[#allocation2 + $0xc2] sm:$0x7f]  ;;  %v450_v32 = vld [vmem:[#allocation2 + $0xb2] sm:$0x7f] }
 0x167   : > { %v1351_v44 = vcombine.low %v1334_v37, %v1348_v25  ;;  %v1352_v45 = vcombine.high %v1334_v37, %v1348_v25  ;;  %v2160_v63 = vcombine.high %v2137_v54, %v2144_v49  ;;  %v2204_v0 = vrot.slane %v2194_v46, %v7414_v42  ;;  %v336_v36 = vld [vmem:[#allocation2 + $0x90] sm:$0x7f] }
 0x168   : > { %v7622_v47 = vpop.permute.xlu1 %655  ;;  %v7624_v48 = vpop.permute.xlu0 %653  ;;  %v1359_v35 = vrot.slane %v1349_v41, %v7414_v42  ;;  %v1373_v51 = vrot.slane %v1350_v43, %v7414_v42  ;;  %v2162_v55 = vcombine.high %v2151_v23, %v2158_v40  ;;  %v2161_v60 = vcombine.low %v2151_v23, %v2158_v40  ;;  %v394_v37 = vld [vmem:[#allocation2 + $0xb1] sm:$0x7f] }
 0x169   : > { %v7629_v50 = vrot.slane %v1351_v44, %v7414_v42  ;;  %v1380_v52 = vrot.slane %v1352_v45, %v7414_v42  ;;  %v2159_v57 = vcombine.low %v2137_v54, %v2144_v49  ;;  %v2176_v11 = vrot.slane %v2160_v63, %v7414_v42  ;;  %v395_v63 = vld [vmem:[#allocation2 + $0xc1] sm:$0x7f] }
 0x16a   : > { %v2195_v56 = vcombine.low %v1359_v35, %v1373_v51  ;;  %v6398_v58 = vcombine.high %v1359_v35, %v1373_v51  ;;  %v2190_v4 = vrot.slane %v2162_v55, %v7414_v42  ;;  %v2183_v6 = vrot.slane %v2161_v60, %v7414_v42 }
 0x16b   : > { %v2197_v59 = vcombine.low %v7629_v50, %v1380_v52  ;;  %v2169_v13 = vrot.slane %v2159_v57, %v7414_v42  ;;  %v1452_v40 = vcombine.high %v451_v31, %v451_v31  ;;  %v1473_v41 = vrot.slane %v451_v31, %v7414_v42 }
 0x16c   : > { %v544_v61 = vpop.permute.xlu1 %543  ;;  %v542_v62 = vpop.permute.xlu0 %541  ;;  %v2211_v1 = vrot.slane %v2195_v56, %v7414_v42  ;;  %v2218_v2 = vrot.slane %v6398_v58, %v7414_v42  ;;  %v2193_v17 = vcombine.low %v2176_v11, %v2190_v4  ;;  %v1386_v43 = vcombine.high %v450_v32, %v450_v32 }
 0x16d   : > { %v2225_v3 = vrot.slane %v2197_v59, %v7414_v42  ;;  %v2192_v18 = vcombine.high %v2169_v13, %v2183_v6  ;;  %v2191_v24 = vcombine.low %v2169_v13, %v2183_v6  ;;  %v802_v44 = vsel %vm793_vm4, %v337_v30, %v7613_v33 }
 0x16e   : > { %v2227_v5 = vcombine.high %v2204_v0, %v2211_v1  ;;  %v2226_v7 = vcombine.low %v2204_v0, %v2211_v1  ;;  %v801_v45 = vsel %vm793_vm4, %v336_v36, %v7615_v34  ;;  %v846_v46 = vsel %vm793_vm4, %v394_v37, %v7622_v47 }
 0x16f   : > { %v2229_v9 = vcombine.high %v2218_v2, %v2225_v3  ;;  %v2228_v10 = vcombine.low %v2218_v2, %v2225_v3  ;;  %v845_v49 = vsel %vm793_vm4, %v393_v38, %v7624_v48  ;;  %v817_v35 = vsel %vm808_vm5, %v802_v44, %v544_v61 }
 0x170   : > { %v712_v8 = vpop.permute.xlu1 %711  ;;  %v710_v53 = vpop.permute.xlu0 %709  ;;  %v2243_v12 = vrot.slane %v2227_v5, %v7414_v42  ;;  %v2236_v14 = vrot.slane %v2226_v7, %v7414_v42  ;;  %v816_v51 = vsel %vm808_vm5, %v801_v45, %v542_v62  ;;  %v1407_v62 = vrot.slane %v450_v32, %v7414_v42  ;;  %v338_v5 = vld [vmem:[#allocation2 + $0xb0] sm:$0x7f] }
 0x171   : > { %v2257_v15 = vrot.slane %v2229_v9, %v7414_v42  ;;  %v2250_v16 = vrot.slane %v2228_v10, %v7414_v42  ;;  %v860_v52 = vsel %vm808_vm5, %v846_v46, %v712_v8  ;;  %v859_v54 = vsel %vm808_vm5, %v845_v49, %v710_v53  ;;  %v452_v32 = vld [vmem:[#allocation2 + $0xd2] sm:$0x7f] }
 0x172   : > { %v1414_v0 = vrot.slane %v1386_v43, %v7414_v42  ;;  %v1480_v6 = vrot.slane %v1452_v40, %v7414_v42  ;;  %v1382_v36 = vcombine.high %v7629_v50, %v7629_v50  ;;  %v1539_v38 = vrot.slane %v452_v32, %v7414_v42 }
 0x173   : > { %v2260_v21 = vcombine.low %v2243_v12, %v2257_v15  ;;  %v2259_v22 = vcombine.high %v2236_v14, %v2250_v16  ;;  %v2258_v25 = vcombine.low %v2236_v14, %v2250_v16 }
 0x174   : > { %v598_v19 = vpop.permute.xlu1 %597  ;;  %v490_v20 = vpop.permute.xlu0 %489 }
 0x175   : > { %v2733_v28 = vpack.c.bf16 %v2260_v21, %v2193_v17  ;;  %v2734_v27 = vpack.c.bf16 %v2259_v22, %v2192_v18  ;;  %v2732_v29 = vpack.c.bf16 %v2258_v25, %v2191_v24  ;;  %v831_v33 = vsel %vm823_vm6, %v816_v51, %v598_v19 }
 0x176   : > { %v803_v14 = vsel %vm793_vm4, %v338_v5, %v490_v20 }
 0x177   : > { %2960 = vmatprep.mubr.bf16.mxu0 %v2733_v28  ;;  %6556 = vmatmul.mubr.msk.bf16.gmra.mrb[8].mxu1 %vm793_vm4, %v2734_v27 }
 0x178   : > { %v658_v39 = vpop.permute.xlu1 %657  ;;  %v600_v23 = vpop.permute.xlu0 %599  ;;  %2961 = vmatmul.mubr.bf16.gmra.mrb[8].mxu0 %v2732_v29  ;;  %6559 = vmatprep.mubr.msk.bf16.mxu1 %vm7063_vm3, %v7062_v26 }
 0x179   : > { %v832_v34 = vsel %vm823_vm6, %v817_v35, %v600_v23  ;;  %v847_v7 = vsel %vm793_vm4, %v395_v63, %v658_v39 }
 0x17c   : > { %v768_v55 = vpop.permute.xlu1 %767  ;;  %v766_v56 = vpop.permute.xlu0 %765 }
 0x17d   : > { %v874_v58 = vsel %vm823_vm6, %v860_v52, %v768_v55  ;;  %v873_v47 = vsel %vm823_vm6, %v859_v54, %v766_v56 }
 0x17e   : > { %v1450_v59 = vcombine.low %v832_v34, %v874_v58  ;;  %v1451_v48 = vcombine.high %v832_v34, %v874_v58  ;;  %v1384_v60 = vcombine.low %v831_v33, %v873_v47  ;;  %v1385_v61 = vcombine.high %v831_v33, %v873_v47 }
 0x180   : > { %v1459_v1 = vrot.slane %v1450_v59, %v7414_v42  ;;  %v1393_v2 = vrot.slane %v1384_v60, %v7414_v42  ;;  %v1400_v57 = vrot.slane %v1385_v61, %v7414_v42  ;;  %v714_v3 = vpop.permute.xlu1 %713  ;;  %v546_v4 = vpop.permute.xlu0 %545  ;;  %v1466_v8 = vrot.slane %v1451_v48, %v7414_v42 }
 0x181   : > { %v861_v15 = vsel %vm808_vm5, %v847_v7, %v714_v3  ;;  %v818_v22 = vsel %vm808_vm5, %v803_v14, %v546_v4  ;;  %v1518_v59 = vcombine.high %v452_v32, %v452_v32  ;;  %v340_v14 = vld [vmem:[#allocation2 + $0xd0] sm:$0x7f] }
 0x182   : > { %v1481_v53 = vcombine.low %v1459_v1, %v1473_v41  ;;  %v1482_v9 = vcombine.high %v1459_v1, %v1473_v41  ;;  %v1415_v10 = vcombine.low %v1393_v2, %v1407_v62  ;;  %v1416_v11 = vcombine.high %v1393_v2, %v1407_v62 }
 0x183   : > { %v1417_v12 = vcombine.low %v1400_v57, %v1414_v0  ;;  %v1418_v13 = vcombine.high %v1400_v57, %v1414_v0  ;;  %v1483_v24 = vcombine.low %v1466_v8, %v1480_v6  ;;  %v1484_v25 = vcombine.high %v1466_v8, %v1480_v6 }
 0x184   : > { %v770_v16 = vpop.permute.xlu1 %769  ;;  %v602_v17 = vpop.permute.xlu0 %601  ;;  %v1425_v18 = vrot.slane %v1415_v10, %v7414_v42  ;;  %v1439_v21 = vrot.slane %v1416_v11, %v7414_v42  ;;  %v1491_v28 = vrot.slane %v1481_v53, %v7414_v42  ;;  %v1505_v27 = vrot.slane %v1482_v9, %v7414_v42 }
 0x185   : > { %v1432_v19 = vrot.slane %v1417_v12, %v7414_v42  ;;  %v1446_v20 = vrot.slane %v1418_v13, %v7414_v42  ;;  %v875_v37 = vsel %vm823_vm6, %v861_v15, %v770_v16  ;;  %v833_v39 = vsel %vm823_vm6, %v818_v22, %v602_v17  ;;  %v453_v13 = vld [vmem:[#allocation2 + $0xe2] sm:$0x7f]  ;;  %v396_v22 = vld [vmem:[#allocation2 + $0xd1] sm:$0x7f] }
 0x186   : > { %v1447_v29 = vcombine.high %v1425_v18, %v1425_v18  ;;  %v1449_v31 = vcombine.high %v1439_v21, %v1439_v21  ;;  %v1516_v45 = vcombine.low %v833_v39, %v875_v37  ;;  %v1498_v46 = vrot.slane %v1483_v24, %v7414_v42  ;;  %v339_v15 = vld [vmem:[#allocation2 + $0xc0] sm:$0x7f] }
 0x187   : > { %v1448_v30 = vcombine.high %v1432_v19, %v1432_v19  ;;  %v2261_v49 = vcombine.low %v1382_v36, %v1425_v18  ;;  %v1512_v35 = vrot.slane %v1484_v25, %v7414_v42  ;;  %v2328_v50 = vcombine.low %v1491_v28, %v1505_v27 }
 0x188   : > { %v7689_v23 = vpop.permute.xlu1 %493  ;;  %v7691_v40 = vpop.permute.xlu0 %491  ;;  %v2262_v41 = vcombine.low %v1439_v21, %v1447_v29  ;;  %v2263_v43 = vcombine.low %v1449_v31, %v1432_v19  ;;  %v6399_v51 = vcombine.high %v1491_v28, %v1505_v27  ;;  %v1525_v52 = vrot.slane %v1516_v45, %v7414_v42  ;;  %v397_v21 = vld [vmem:[#allocation2 + $0xe1] sm:$0x7f] }
 0x189   : > { %v2264_v44 = vcombine.low %v1446_v20, %v1448_v30  ;;  %v1514_v47 = vcombine.high %v1498_v46, %v1498_v46  ;;  %v1517_v48 = vcombine.high %v833_v39, %v875_v37  ;;  %v2271_v60 = vrot.slane %v2261_v49, %v7414_v42  ;;  %v7718_v20 = vld [vmem:[#allocation2 + $0xf2] sm:$0x7f] }
 0x18a   : > { %v2278_v56 = vrot.slane %v2262_v41, %v7414_v42  ;;  %v2285_v33 = vrot.slane %v2263_v43, %v7414_v42  ;;  %v1547_v58 = vcombine.low %v1525_v52, %v1539_v38  ;;  %v2330_v61 = vcombine.low %v1498_v46, %v1512_v35 }
 0x18b   : > { %v2292_v34 = vrot.slane %v2264_v44, %v7414_v42  ;;  %v2338_v62 = vrot.slane %v2328_v50, %v7414_v42  ;;  %v2345_v0 = vrot.slane %v6399_v51, %v7414_v42  ;;  %v7707_v6 = vrot.slane %v1518_v59, %v7414_v42 }
 0x18c   : > { %v662_v54 = vpop.permute.xlu1 %661  ;;  %v660_v55 = vpop.permute.xlu0 %659  ;;  %v7701_v63 = vrot.slane %v1547_v58, %v7414_v42  ;;  %v2294_v57 = vcombine.high %v2271_v60, %v2278_v56  ;;  %v2293_v5 = vcombine.low %v2271_v60, %v2278_v56  ;;  %v7710_v7 = vrot.slane %v1517_v48, %v7414_v42 }
 0x18d   : > { %v2296_v3 = vcombine.high %v2285_v33, %v2292_v34  ;;  %v1548_v8 = vcombine.high %v1525_v52, %v1539_v38  ;;  %v2295_v53 = vcombine.low %v2285_v33, %v2292_v34  ;;  %v2352_v9 = vrot.slane %v2330_v61, %v7414_v42 }
 0x18e   : > { %v2331_v4 = vcombine.low %v1514_v47, %v7701_v63  ;;  %v2361_v11 = vcombine.high %v2338_v62, %v2345_v0  ;;  %v2360_v12 = vcombine.low %v2338_v62, %v2345_v0  ;;  %v2310_v18 = vrot.slane %v2294_v57, %v7414_v42 }
 0x18f   : > { %v2324_v19 = vrot.slane %v2296_v3, %v7414_v42  ;;  %v2303_v25 = vrot.slane %v2293_v5, %v7414_v42  ;;  %v2317_v28 = vrot.slane %v2295_v53, %v7414_v42  ;;  %v1549_v29 = vcombine.low %v7710_v7, %v7707_v6 }
 0x190   : > { %v550_v1 = vpop.permute.xlu1 %549  ;;  %v548_v2 = vpop.permute.xlu0 %547  ;;  %v2359_v10 = vrot.slane %v2331_v4, %v7414_v42  ;;  %v1571_v30 = vrot.slane %v1548_v8, %v7414_v42  ;;  %v7725_v31 = vrot.slane %v7718_v20, %v7414_v42  ;;  %v1584_v32 = vcombine.high %v453_v13, %v453_v13 }
 0x191   : > { %v2377_v36 = vrot.slane %v2361_v11, %v7414_v42  ;;  %v2370_v38 = vrot.slane %v2360_v12, %v7414_v42  ;;  %v805_v41 = vsel %vm793_vm4, %v340_v14, %v7689_v23  ;;  %v804_v43 = vsel %vm793_vm4, %v339_v15, %v7691_v40 }
 0x192   : > { %v2363_v24 = vcombine.high %v2352_v9, %v2359_v10  ;;  %v2362_v27 = vcombine.low %v2352_v9, %v2359_v10  ;;  %v849_v44 = vsel %vm793_vm4, %v397_v21, %v662_v54  ;;  %v848_v45 = vsel %vm793_vm4, %v396_v22, %v660_v55 }
 0x193   : > { %v2327_v35 = vcombine.low %v2310_v18, %v2324_v19  ;;  %v2326_v51 = vcombine.high %v2303_v25, %v2317_v28  ;;  %v1550_v56 = vcombine.high %v7710_v7, %v7707_v6  ;;  %v1564_v33 = vrot.slane %v1549_v29, %v7414_v42 }
 0x194   : > { %v718_v16 = vpop.permute.xlu1 %717  ;;  %v716_v17 = vpop.permute.xlu0 %715  ;;  %v2391_v37 = vrot.slane %v2363_v24, %v7414_v42  ;;  %v2384_v39 = vrot.slane %v2362_v27, %v7414_v42  ;;  %v2325_v34 = vcombine.low %v2303_v25, %v2317_v28  ;;  %v1579_v40 = vcombine.high %v7701_v63, %v7701_v63 }
 0x195   : > { %v1581_v58 = vcombine.high %v1571_v30, %v1571_v30  ;;  %v820_v55 = vsel %vm808_vm5, %v805_v41, %v550_v1  ;;  %v819_v59 = vsel %vm808_vm5, %v804_v43, %v548_v2  ;;  %v863_v48 = vsel %vm808_vm5, %v849_v44, %v718_v16 }
 0x196   : > { %v2394_v50 = vcombine.low %v2377_v36, %v2391_v37  ;;  %v2393_v52 = vcombine.high %v2370_v38, %v2384_v39  ;;  %v2392_v23 = vcombine.low %v2370_v38, %v2384_v39  ;;  %v862_v62 = vsel %vm808_vm5, %v848_v45, %v716_v17  ;;  %v456_v39 = vld [vmem:[#allocation2 + $0x112] sm:$0x7f] }
 0x197   : > { %v1605_v4 = vrot.slane %v453_v13, %v7414_v42  ;;  %v1612_v5 = vrot.slane %v1584_v32, %v7414_v42  ;;  %v1580_v8 = vcombine.high %v1564_v33, %v1564_v33  ;;  %v1650_v53 = vcombine.high %v7718_v20, %v7718_v20 }
 0x198   : > { %v606_v46 = vpop.permute.xlu1 %605  ;;  %v604_v49 = vpop.permute.xlu0 %603  ;;  %v2736_v54 = vpack.c.bf16 %v2394_v50, %v2327_v35  ;;  %v2737_v47 = vpack.c.bf16 %v2393_v52, %v2326_v51  ;;  %v2735_v60 = vpack.c.bf16 %v2392_v23, %v2325_v34  ;;  %v1578_v12 = vrot.slane %v1550_v56, %v7414_v42 }
 0x199   : > { %v835_v0 = vsel %vm823_vm6, %v820_v55, %v606_v46  ;;  %v834_v3 = vsel %vm823_vm6, %v819_v59, %v604_v49  ;;  %v2395_v16 = vcombine.low %v1571_v30, %v1579_v40  ;;  %v2396_v17 = vcombine.low %v1581_v58, %v1564_v33 }
 0x19a   : > { %2968 = vmatprep.mubr.bf16.mxu0 %v2736_v54  ;;  %6560 = vmatmul.mubr.msk.bf16.gmra.mrb[12].mxu1 %vm793_vm4, %v2737_v47  ;;  %v2397_v28 = vcombine.low %v1578_v12, %v1580_v8  ;;  %v1678_v27 = vrot.slane %v1650_v53, %v7414_v42  ;;  %v1782_v33 = vcombine.high %v456_v39, %v456_v39 }
 0x19b   : > { %2969 = vmatmul.mubr.bf16.gmra.mrb[12].mxu0 %v2735_v60  ;;  %6563 = vmatprep.mubr.msk.bf16.mxu1 %vm7063_vm3, %v7062_v26  ;;  %v2405_v44 = vrot.slane %v2395_v16, %v7414_v42  ;;  %v2412_v45 = vrot.slane %v2396_v17, %v7414_v42  ;;  %v7782_v40 = vrot.slane %v456_v39, %v7414_v42  ;;  %v7789_v60 = vld [vmem:[#allocation2 + $0x102] sm:$0x7f] }
 0x19c   : > { %v774_v61 = vpop.permute.xlu1 %773  ;;  %v2419_v58 = vrot.slane %v2397_v28, %v7414_v42  ;;  %v7794_v8 = vrot.slane %v1782_v33, %v7414_v42  ;;  %v1716_v12 = vcombine.high %v7789_v60, %v7789_v60  ;;  %v398_v28 = vld [vmem:[#allocation2 + $0xf1] sm:$0x7f] }
 0x19d   : > { %v877_v63 = vsel %vm823_vm6, %v863_v48, %v774_v61  ;;  %v772_v57 = vpop.permute.xlu0 %771  ;;  %v2428_v47 = vcombine.high %v2405_v44, %v2412_v45 }
 0x19e   : > { %v1648_v1 = vcombine.low %v835_v0, %v877_v63  ;;  %v876_v2 = vsel %vm823_vm6, %v862_v62, %v772_v57  ;;  %v1649_v9 = vcombine.high %v835_v0, %v877_v63  ;;  %v2427_v0 = vcombine.low %v2405_v44, %v2412_v45 }
 0x19f   : > { %v1582_v6 = vcombine.low %v834_v3, %v876_v2  ;;  %v1583_v7 = vcombine.high %v834_v3, %v876_v2 }
 0x1a0   : > { %v1657_v10 = vrot.slane %v1648_v1, %v7414_v42  ;;  %v7758_v11 = vpop.permute.xlu1 %497  ;;  %v1664_v20 = vrot.slane %v1649_v9, %v7414_v42  ;;  %v342_v1 = vld [vmem:[#allocation2 + $0xf0] sm:$0x7f] }
 0x1a1   : > { %v1591_v14 = vrot.slane %v1582_v6, %v7414_v42  ;;  %v1598_v15 = vrot.slane %v1583_v7, %v7414_v42  ;;  %v7763_v13 = vpop.permute.xlu0 %495  ;;  %v807_v17 = vsel %vm793_vm4, %v342_v1, %v7758_v11 }
 0x1a2   : > { %v1679_v18 = vcombine.low %v1657_v10, %v7725_v31  ;;  %v1680_v19 = vcombine.high %v1657_v10, %v7725_v31  ;;  %v1681_v51 = vcombine.low %v1664_v20, %v1678_v27  ;;  %v1682_v57 = vcombine.high %v1664_v20, %v1678_v27  ;;  %v341_v10 = vld [vmem:[#allocation2 + $0xe0] sm:$0x7f] }
 0x1a3   : > { %v1613_v21 = vcombine.low %v1591_v14, %v1605_v4  ;;  %v1614_v22 = vcombine.high %v1591_v14, %v1605_v4  ;;  %v1615_v24 = vcombine.low %v1598_v15, %v1612_v5  ;;  %v1616_v25 = vcombine.high %v1598_v15, %v1612_v5 }
 0x1a4   : > { %v1689_v29 = vrot.slane %v1679_v18, %v7414_v42  ;;  %v7770_v32 = vpop.permute.xlu1 %665  ;;  %v1703_v41 = vrot.slane %v1680_v19, %v7414_v42  ;;  %v1696_v3 = vrot.slane %v1681_v51, %v7414_v42  ;;  %v2444_v14 = vrot.slane %v2428_v47, %v7414_v42 }
 0x1a5   : > { %v1623_v30 = vrot.slane %v1613_v21, %v7414_v42  ;;  %v1630_v36 = vrot.slane %v1615_v24, %v7414_v42  ;;  %v1637_v37 = vrot.slane %v1614_v22, %v7414_v42  ;;  %v1644_v31 = vrot.slane %v1616_v25, %v7414_v42  ;;  %v7776_v38 = vpop.permute.xlu0 %663  ;;  %v399_v25 = vld [vmem:[#allocation2 + $0x101] sm:$0x7f] }
 0x1a6   : > { %v1711_v43 = vcombine.high %v1689_v29, %v1689_v29  ;;  %v1713_v6 = vcombine.high %v1703_v41, %v1703_v41  ;;  %v2437_v21 = vrot.slane %v2427_v0, %v7414_v42  ;;  %v1710_v22 = vrot.slane %v1682_v57, %v7414_v42 }
 0x1a7   : > { %v1646_v46 = vcombine.high %v1630_v36, %v1630_v36  ;;  %v2398_v49 = vcombine.low %v1623_v30, %v1637_v37  ;;  %v6400_v35 = vcombine.high %v1623_v30, %v1637_v37  ;;  %v2463_v50 = vcombine.low %v1630_v36, %v1644_v31 }
 0x1a8   : > { %v2465_v52 = vcombine.low %v1703_v41, %v1711_v43  ;;  %v554_v56 = vpop.permute.xlu1 %553  ;;  %v1712_v24 = vcombine.high %v1696_v3, %v1696_v3  ;;  %v2529_v30 = vcombine.low %v1713_v6, %v1696_v3  ;;  %v806_v11 = vsel %vm793_vm4, %v341_v10, %v7763_v13 }
 0x1a9   : > { %v2464_v34 = vcombine.low %v1646_v46, %v1689_v29  ;;  %v552_v23 = vpop.permute.xlu0 %551  ;;  %v2426_v54 = vrot.slane %v2398_v49, %v7414_v42  ;;  %v2472_v55 = vrot.slane %v6400_v35, %v7414_v42  ;;  %v2479_v59 = vrot.slane %v2463_v50, %v7414_v42 }
 0x1aa   : > { %v2493_v48 = vrot.slane %v2465_v52, %v7414_v42  ;;  %v851_v45 = vsel %vm793_vm4, %v399_v25, %v7770_v32  ;;  %v850_v46 = vsel %vm793_vm4, %v398_v28, %v7776_v38  ;;  %v822_v49 = vsel %vm808_vm5, %v807_v17, %v554_v56 }
 0x1ab   : > { %v2430_v61 = vcombine.high %v2419_v58, %v2426_v54  ;;  %v2486_v62 = vrot.slane %v2464_v34, %v7414_v42  ;;  %v2429_v63 = vcombine.low %v2419_v58, %v2426_v54  ;;  %v2495_v4 = vcombine.high %v2472_v55, %v2479_v59 }
 0x1ac   : > { %v722_v2 = vpop.permute.xlu1 %721  ;;  %v2494_v5 = vcombine.low %v2472_v55, %v2479_v59  ;;  %v821_v50 = vsel %vm808_vm5, %v806_v11, %v552_v23  ;;  %v1737_v23 = vrot.slane %v7789_v60, %v7414_v42  ;;  %v1744_v59 = vrot.slane %v1716_v12, %v7414_v42 }
 0x1ad   : > { %v720_v7 = vpop.permute.xlu0 %719  ;;  %v2458_v53 = vrot.slane %v2430_v61, %v7414_v42  ;;  %v2497_v9 = vcombine.high %v2486_v62, %v2493_v48  ;;  %v2451_v15 = vrot.slane %v2429_v63, %v7414_v42  ;;  %v2496_v16 = vcombine.low %v2486_v62, %v2493_v48 }
 0x1ae   : > { %v2511_v18 = vrot.slane %v2495_v4, %v7414_v42  ;;  %v2504_v20 = vrot.slane %v2494_v5, %v7414_v42  ;;  %v865_v13 = vsel %vm808_vm5, %v851_v45, %v722_v2  ;;  %v864_v34 = vsel %vm808_vm5, %v850_v46, %v720_v7 }
 0x1af   : > { %v2525_v19 = vrot.slane %v2497_v9, %v7414_v42  ;;  %v2518_v29 = vrot.slane %v2496_v16, %v7414_v42  ;;  %v2461_v37 = vcombine.low %v2444_v14, %v2458_v53  ;;  %v2460_v39 = vcombine.high %v2437_v21, %v2451_v15 }
 0x1b0   : > { %v610_v27 = vpop.permute.xlu1 %609  ;;  %v2459_v43 = vcombine.low %v2437_v21, %v2451_v15  ;;  %v2530_v62 = vcombine.low %v1710_v22, %v1712_v24  ;;  %v2539_v1 = vrot.slane %v2529_v30, %v7414_v42 }
 0x1b1   : > { %v608_v36 = vpop.permute.xlu0 %607  ;;  %v2528_v31 = vcombine.low %v2511_v18, %v2525_v19  ;;  %v2527_v41 = vcombine.high %v2504_v20, %v2518_v29  ;;  %v2526_v44 = vcombine.low %v2504_v20, %v2518_v29  ;;  %v837_v58 = vsel %vm823_vm6, %v822_v49, %v610_v27 }
 0x1b2   : > { %v836_v54 = vsel %vm823_vm6, %v821_v50, %v608_v36  ;;  %v2546_v15 = vrot.slane %v2530_v62, %v7414_v42 }
 0x1b3   : > { %v2739_v35 = vpack.c.bf16 %v2528_v31, %v2461_v37  ;;  %v2740_v52 = vpack.c.bf16 %v2527_v41, %v2460_v39  ;;  %v2738_v33 = vpack.c.bf16 %v2526_v44, %v2459_v43 }
 0x1b4   : > { %v778_v51 = vpop.permute.xlu1 %777  ;;  %v2562_v31 = vcombine.high %v2539_v1, %v2546_v15  ;;  %v2561_v43 = vcombine.low %v2539_v1, %v2546_v15 }
 0x1b5   : > { %v879_v32 = vsel %vm823_vm6, %v865_v13, %v778_v51  ;;  %v776_v47 = vpop.permute.xlu0 %775  ;;  %2976 = vmatprep.mubr.bf16.mxu0 %v2739_v35  ;;  %6564 = vmatmul.mubr.msk.bf16.gmra.mrb[16].mxu1 %vm793_vm4, %v2740_v52 }
 0x1b6   : > { %v1780_v38 = vcombine.low %v837_v58, %v879_v32  ;;  %v1781_v56 = vcombine.high %v837_v58, %v879_v32  ;;  %v878_v55 = vsel %vm823_vm6, %v864_v34, %v776_v47  ;;  %2977 = vmatmul.mubr.bf16.gmra.mrb[16].mxu0 %v2738_v33  ;;  %6567 = vmatprep.mubr.msk.bf16.mxu1 %vm7063_vm3, %v7062_v26 }
 0x1b7   : > { %v1714_v48 = vcombine.low %v836_v54, %v878_v55  ;;  %v1715_v61 = vcombine.high %v836_v54, %v878_v55  ;;  %v2578_v54 = vrot.slane %v2562_v31, %v7414_v42  ;;  %v2571_v47 = vrot.slane %v2561_v43, %v7414_v42  ;;  %v1848_v31 = vld [vmem:[%s7277_s8 + $0x10] sm:$0xff] }
 0x1b8   : > { %v1789_v0 = vrot.slane %v1780_v38, %v7414_v42  ;;  %v1796_v63 = vrot.slane %v1781_v56, %v7414_v42 }
 0x1b9   : > { %v1723_v57 = vrot.slane %v1714_v48, %v7414_v42  ;;  %v1730_v3 = vrot.slane %v1715_v61, %v7414_v42 }
 0x1ba   : > { %v1811_v60 = vcombine.low %v1789_v0, %v7782_v40  ;;  %v1812_v2 = vcombine.high %v1789_v0, %v7782_v40  ;;  %v1813_v4 = vcombine.low %v1796_v63, %v7794_v8  ;;  %v1814_v5 = vcombine.high %v1796_v63, %v7794_v8 }
 0x1bb   : > { %v1745_v6 = vcombine.low %v1723_v57, %v1737_v23  ;;  %v1746_v7 = vcombine.high %v1723_v57, %v1737_v23  ;;  %v1747_v53 = vcombine.low %v1730_v3, %v1744_v59  ;;  %v1748_v9 = vcombine.high %v1730_v3, %v1744_v59 }
 0x1bc   : > { %v1821_v10 = vrot.slane %v1811_v60, %v7414_v42  ;;  %v1828_v12 = vrot.slane %v1813_v4, %v7414_v42  ;;  %v1835_v14 = vrot.slane %v1812_v2, %v7414_v42  ;;  %v1842_v18 = vrot.slane %v1814_v5, %v7414_v42 }
 0x1bd   : > { %v1755_v16 = vrot.slane %v1745_v6, %v7414_v42  ;;  %v1762_v40 = vrot.slane %v1747_v53, %v7414_v42  ;;  %v1769_v17 = vrot.slane %v1746_v7, %v7414_v42  ;;  %v1776_v8 = vrot.slane %v1748_v9, %v7414_v42 }
 0x1be   : > { %v1843_v19 = vcombine.high %v1821_v10, %v1821_v10  ;;  %v1844_v21 = vcombine.high %v1828_v12, %v1828_v12  ;;  %v1845_v22 = vcombine.high %v1835_v14, %v1835_v14 }
 0x1bf   : > { %v1778_v24 = vcombine.high %v1762_v40, %v1762_v40  ;;  %v2531_v25 = vcombine.low %v1755_v16, %v1769_v17  ;;  %v6401_v28 = vcombine.high %v1755_v16, %v1769_v17  ;;  %v2596_v27 = vcombine.low %v1762_v40, %v1776_v8  ;;  %v1846_v40 = vld [vmem:[%s7277_s8] sm:$0xff] }
 0x1c0   : > { %v2598_v20 = vcombine.low %v1835_v14, %v1843_v19  ;;  %v2599_v29 = vcombine.low %v1845_v22, %v1828_v12  ;;  %v2663_v30 = vcombine.low %v1842_v18, %v1844_v21  ;;  %v1847_v18 = vld [vmem:[%s7277_s8 + $0x8] sm:$0xff] }
 0x1c1   : > { %v2597_v11 = vcombine.low %v1778_v24, %v1821_v10  ;;  %v2553_v36 = vrot.slane %v2531_v25, %v7414_v42  ;;  %v2560_v37 = vrot.slane %v6401_v28, %v7414_v42  ;;  %v2606_v46 = vrot.slane %v2596_v27, %v7414_v42 }
 0x1c2   : > { %v2620_v39 = vrot.slane %v2598_v20, %v7414_v42  ;;  %v2627_v41 = vrot.slane %v2599_v29, %v7414_v42  ;;  %v2670_v44 = vrot.slane %v2663_v30, %v7414_v42 }
 0x1c3   : > { %v2564_v45 = vcombine.high %v2553_v36, %v2560_v37  ;;  %v2613_v49 = vrot.slane %v2597_v11, %v7414_v42  ;;  %v2563_v35 = vcombine.low %v2553_v36, %v2560_v37 }
 0x1c4   : > { %v2631_v50 = vcombine.high %v2620_v39, %v2627_v41  ;;  %v2630_v13 = vcombine.low %v2620_v39, %v2627_v41  ;;  %v2671_v51 = vcombine.high %v2670_v44, %v2670_v44  ;;  %v2678_v60 = vrot.slane %v2670_v44, %v7414_v42  ;;  %v1849_v44 = vld [vmem:[%s7277_s8 + $0x18] sm:$0xff] }
 0x1c5   : > { %v2592_v52 = vrot.slane %v2564_v45, %v7414_v42  ;;  %v2629_v33 = vcombine.high %v2606_v46, %v2613_v49  ;;  %v2585_v34 = vrot.slane %v2563_v35, %v7414_v42  ;;  %v2628_v58 = vcombine.low %v2606_v46, %v2613_v49 }
 0x1c6   : > { %v2659_v32 = vrot.slane %v2631_v50, %v7414_v42  ;;  %v2652_v38 = vrot.slane %v2630_v13, %v7414_v42  ;;  %v2685_v48 = vrot.slane %v2671_v51, %v7414_v42  ;;  %v2686_v4 = vcombine.high %v2678_v60, %v2678_v60 }
 0x1c7   : > { %v2645_v56 = vrot.slane %v2629_v33, %v7414_v42  ;;  %v2638_v55 = vrot.slane %v2628_v58, %v7414_v42  ;;  %v2595_v23 = vcombine.low %v2578_v54, %v2592_v52  ;;  %v2594_v59 = vcombine.high %v2571_v47, %v2585_v34 }
 0x1c8   : > { %v2593_v0 = vcombine.low %v2571_v47, %v2585_v34  ;;  %v2745_v2 = vpack.c.bf16 %v2685_v48, %v2685_v48  ;;  %v2746_v5 = vpack.c.bf16 %v2686_v4, %v2686_v4  ;;  %v2744_v6 = vpack.c.bf16 %v2678_v60, %v2678_v60  ;;  %v1850_v47 = vld [vmem:[%s7277_s8 + $0x20] sm:$0xff] }
 0x1c9   : > { %v2662_v61 = vcombine.low %v2645_v56, %v2659_v32  ;;  %v2661_v62 = vcombine.high %v2638_v55, %v2652_v38  ;;  %v2660_v63 = vcombine.low %v2638_v55, %v2652_v38 }
 0x1cb   : > { %v2742_v57 = vpack.c.bf16 %v2662_v61, %v2595_v23  ;;  %v2743_v3 = vpack.c.bf16 %v2661_v62, %v2594_v59  ;;  %v2741_v1 = vpack.c.bf16 %v2660_v63, %v2593_v0  ;;  %v1851_v23 = vld [vmem:[%s7277_s8 + $0x28] sm:$0xff] }
 0x1cd   : > { %2984 = vmatprep.mubr.bf16.mxu0 %v2742_v57  ;;  %6568 = vmatmul.mubr.msk.bf16.gmra.mrb[20].mxu1 %vm793_vm4, %v2743_v3 }
 0x1ce   : > { %2985 = vmatmul.mubr.bf16.gmra.mrb[20].mxu0 %v2741_v1  ;;  %6571 = vmatprep.mubr.msk.bf16.mxu1 %vm7063_vm3, %v7062_v26 }
 0x1cf   : > { %2992 = vmatprep.mubr.bf16.mxu0 %v2745_v2 }
 0x1d5   : > { %6572 = vmatmul.mubr.msk.bf16.gmra.mrb[24].mxu1 %vm793_vm4, %v2746_v5 }
 0x1d6   : > { %2993 = vmatmul.mubr.bf16.gmra.mrb[24].mxu0 %v2744_v6  ;;  %v1852_v6 = vld [vmem:[%s7277_s8 + $0x30] sm:$0xff] }
 0x21a   : > { %v3034_v7 = vpop.f32.mrb[0].mxu1 }
 0x21b   : > { %v6487_v53 = vpop.f32.mrb[0].mxu0  ;;  %v6549_v9 = vpop.f32.mrb[1].mxu1 }
 0x21c   : > { %v6488_v10 = vpop.f32.mrb[1].mxu0  ;;  %v3037_v12 = vpop.f32.mrb[2].mxu1 }
 0x21d   : > { %v6489_v14 = vadd.f32 %v6488_v10, %v6487_v53  ;;  %v6490_v15 = vpop.f32.mrb[2].mxu0  ;;  %v6550_v16 = vpop.f32.mrb[3].mxu1  ;;  %v1853_v10 = vld [vmem:[%s7277_s8 + $0x38] sm:$0xff] }
 0x21e   : > { %v6491_v17 = vpop.f32.mrb[3].mxu0 }
 0x21f   : > { %v3035_v8 = vadd.f32 %v6489_v14, %v3034_v7  ;;  %v6492_v26 = vadd.f32 %v6491_v17, %v6490_v15 }
 0x221   : > { %v7870_v19 = vadd.f32 %v3035_v8, %v1846_v40  ;;  %v3038_v21 = vadd.f32 %v6492_v26, %v3037_v12 }
 0x223   : > { %6728 = vtanh.f32 %v7870_v19  ;;  %v7873_v22 = vadd.f32 %v3038_v21, %v1847_v18 }
 0x225   : > { %6730 = vtanh.f32 %v7873_v22 }
 0x22d   : > { %v6729_v24 = vpop.eup %6728 }
 0x22e   : > { %3283 = vrot.lane.b32.xlu0 %v6729_v24, %s7060_s24 }
 0x22f   : > { %v6731_v28 = vpop.eup %6730 }
 0x231   : > { %v3042_v25 = vpop.f32.mrb[4].mxu1 }
 0x232   : > { %v6553_v27 = vpop.f32.mrb[5].mxu1  ;;  %3285 = vrot.lane.b32.xlu0 %v6731_v28, %s7060_s24  ;;  %v6493_v20 = vpop.f32.mrb[4].mxu0 }
 0x233   : > { %v3045_v29 = vpop.f32.mrb[6].mxu1  ;;  %v6494_v30 = vpop.f32.mrb[5].mxu0 }
 0x234   : > { %v6554_v11 = vpop.f32.mrb[7].mxu1  ;;  %v6495_v36 = vadd.f32 %v6494_v30, %v6493_v20  ;;  %v6496_v37 = vpop.f32.mrb[6].mxu0  ;;  %v1855_v30 = vld [vmem:[%s7277_s8 + $0x48] sm:$0xff] }
 0x235   : > { %v6497_v39 = vpop.f32.mrb[7].mxu0 }
 0x236   : > { %v3043_v41 = vadd.f32 %v6495_v36, %v3042_v25  ;;  %v6498_v43 = vadd.f32 %v6497_v39, %v6496_v37  ;;  %v1854_v36 = vld [vmem:[%s7277_s8 + $0x40] sm:$0xff] }
 0x238   : > { %v7880_v45 = vadd.f32 %v3043_v41, %v1848_v31  ;;  %v3046_v46 = vadd.f32 %v6498_v43, %v3045_v29 }
 0x23a   : > { %6732 = vtanh.f32 %v7880_v45  ;;  %v7883_v49 = vadd.f32 %v3046_v46, %v1849_v44 }
 0x23c   : > { %6734 = vtanh.f32 %v7883_v49 }
 0x244   : > { %v6733_v35 = vpop.eup %6732 }
 0x245   : > { %3287 = vrot.lane.b32.xlu1 %v6733_v35, %s7060_s24 }
 0x246   : > { %v6735_v50 = vpop.eup %6734 }
 0x249   : > { %3289 = vrot.lane.b32.xlu1 %v6735_v50, %s7060_s24 }
 0x24a   : > { %v3050_v13 = vpop.f32.mrb[8].mxu1 }
 0x24b   : > { %v6499_v51 = vpop.f32.mrb[8].mxu0  ;;  %v6557_v52 = vpop.f32.mrb[9].mxu1 }
 0x24c   : > { %v6500_v33 = vpop.f32.mrb[9].mxu0  ;;  %v3053_v34 = vpop.f32.mrb[10].mxu1 }
 0x24d   : > { %v6501_v58 = vadd.f32 %v6500_v33, %v6499_v51  ;;  %v6502_v54 = vpop.f32.mrb[10].mxu0  ;;  %v6558_v32 = vpop.f32.mrb[11].mxu1 }
 0x24e   : > { %v6503_v38 = vpop.f32.mrb[11].mxu0 }
 0x24f   : > { %v3051_v56 = vadd.f32 %v6501_v58, %v3050_v13  ;;  %v6504_v55 = vadd.f32 %v6503_v38, %v6502_v54  ;;  %v1857_v54 = vld [vmem:[%s7277_s8 + $0x58] sm:$0xff]  ;;  %v1856_v38 = vld [vmem:[%s7277_s8 + $0x50] sm:$0xff] }
 0x251   : > { %v7890_v59 = vadd.f32 %v3051_v56, %v1850_v47  ;;  %v3054_v48 = vadd.f32 %v6504_v55, %v3053_v34 }
 0x253   : > { %6736 = vtanh.f32 %v7890_v59  ;;  %v7893_v61 = vadd.f32 %v3054_v48, %v1851_v23 }
 0x255   : > { %6738 = vtanh.f32 %v7893_v61 }
 0x25d   : > { %v6737_v62 = vpop.eup %6736 }
 0x25e   : > { %3291 = vrot.lane.b32.xlu0 %v6737_v62, %s7060_s24 }
 0x25f   : > { %v6739_v0 = vpop.eup %6738 }
 0x262   : > { %3293 = vrot.lane.b32.xlu0 %v6739_v0, %s7060_s24 }
 0x26d   : > { %v3058_v63 = vpop.f32.mrb[12].mxu1 }
 0x26e   : > { %v6505_v57 = vpop.f32.mrb[12].mxu0  ;;  %v6561_v3 = vpop.f32.mrb[13].mxu1 }
 0x26f   : > { %v6506_v1 = vpop.f32.mrb[13].mxu0  ;;  %v3061_v60 = vpop.f32.mrb[14].mxu1 }
 0x270   : > { %v6507_v2 = vadd.f32 %v6506_v1, %v6505_v57  ;;  %v6508_v4 = vpop.f32.mrb[14].mxu0  ;;  %v6562_v5 = vpop.f32.mrb[15].mxu1  ;;  %v1858_v1 = vld [vmem:[%s7277_s8 + $0x60] sm:$0x3] }
 0x271   : > { %v6509_v7 = vpop.f32.mrb[15].mxu0  ;;  %v6427_v5 = vmul.f32 -1.442695, %v7870_v19  ;;  %v6431_v19 = vmul.f32 -1.442695, %v7890_v59  ;;  %v3203_v59 = vld [vmem:[#allocation12 + $0x58] sm:$0xff] }
 0x272   : > { %v3059_v53 = vadd.f32 %v6507_v2, %v3058_v63  ;;  %v6510_v9 = vadd.f32 %v6509_v7, %v6508_v4  ;;  %v6429_v7 = vmul.f32 -1.442695, %v7880_v45  ;;  %v6432_v45 = vmul.f32 -1.442695, %v7893_v61  ;;  %v3195_v61 = vld [vmem:[#allocation12 + $0x18] sm:$0xff] }
 0x274   : > { %v7900_v12 = vadd.f32 %v3059_v53, %v1852_v6  ;;  %v3062_v14 = vadd.f32 %v6510_v9, %v3061_v60  ;;  %v6428_v53 = vmul.f32 -1.442695, %v7873_v22  ;;  %v3196_v22 = vld [vmem:[#allocation12 + $0x20] sm:$0xff] }
 0x276   : > { %6740 = vtanh.f32 %v7900_v12  ;;  %v7903_v15 = vadd.f32 %v3062_v14, %v1853_v10  ;;  %v6430_v10 = vmul.f32 -1.442695, %v7883_v49  ;;  %v3199_v49 = vld [vmem:[#allocation12 + $0x38] sm:$0xff] }
 0x278   : > { %6742 = vtanh.f32 %v7903_v15 }
 0x280   : > { %v6741_v16 = vpop.eup %6740 }
 0x281   : > { %3295 = vrot.lane.b32.xlu1 %v6741_v16, %s7060_s24  ;;  %v3192_v16 = vld [vmem:[#allocation12] sm:$0xff] }
 0x282   : > { %v6743_v40 = vpop.eup %6742 }
 0x285   : > { %3297 = vrot.lane.b32.xlu1 %v6743_v40, %s7060_s24  ;;  %v3194_v40 = vld [vmem:[#allocation12 + $0x10] sm:$0xff] }
 0x288   : > { %v3066_v17 = vpop.f32.mrb[16].mxu1 }
 0x289   : > { %v6511_v8 = vpop.f32.mrb[16].mxu0  ;;  %v6565_v26 = vpop.f32.mrb[17].mxu1 }
 0x28a   : > { %v6512_v18 = vpop.f32.mrb[17].mxu0  ;;  %v3069_v24 = vpop.f32.mrb[18].mxu1  ;;  %v3201_v26 = vld [vmem:[#allocation12 + $0x48] sm:$0xff] }
 0x28b   : > { %v6513_v21 = vadd.f32 %v6512_v18, %v6511_v8  ;;  %v6514_v25 = vpop.f32.mrb[18].mxu0  ;;  %v6566_v28 = vpop.f32.mrb[19].mxu1 }
 0x28c   : > { %v6515_v27 = vpop.f32.mrb[19].mxu0  ;;  %v3193_v28 = vld [vmem:[#allocation12 + $0x8] sm:$0xff] }
 0x28d   : > { %v3067_v20 = vadd.f32 %v6513_v21, %v3066_v17  ;;  %v6516_v29 = vadd.f32 %v6515_v27, %v6514_v25 }
 0x28f   : > { %v3070_v11 = vadd.f32 %v6516_v29, %v3069_v24  ;;  %v7912_v31 = vadd.f32 %v3067_v20, %v1854_v36 }
 0x291   : > { %v7910_v37 = vadd.f32 %v3070_v11, %v1855_v30  ;;  %v3197_v30 = vld [vmem:[#allocation12 + $0x28] sm:$0xff]  ;;  %v3198_v11 = vld [vmem:[#allocation12 + $0x30] sm:$0xff] }
 0x293   : > { %6744 = vtanh.f32 %v7910_v37 }
 0x294   : > { %6746 = vtanh.f32 %v7912_v31 }
 0x29d   : > { %v6745_v39 = vpop.eup %6744 }
 0x29e   : > { %3301 = vrot.lane.b32.xlu0 %v6745_v39, %s7060_s24  ;;  %v6747_v46 = vpop.eup %6746 }
 0x2a0   : > { %v3074_v41 = vpop.f32.mrb[20].mxu1  ;;  %v3284_v39 = vpop.permute.xlu0 %3283 }
 0x2a1   : > { %v6517_v43 = vpop.f32.mrb[20].mxu0  ;;  %v6569_v44 = vpop.f32.mrb[21].mxu1 }
 0x2a2   : > { %v6518_v35 = vpop.f32.mrb[21].mxu0  ;;  %v3077_v13 = vpop.f32.mrb[22].mxu1  ;;  %3299 = vrot.lane.b32.xlu0 %v6747_v46, %s7060_s24  ;;  %v3202_v46 = vld [vmem:[#allocation12 + $0x50] sm:$0xff] }
 0x2a3   : > { %v6519_v50 = vadd.f32 %v6518_v35, %v6517_v43  ;;  %v6520_v51 = vpop.f32.mrb[22].mxu0  ;;  %v6570_v52 = vpop.f32.mrb[23].mxu1  ;;  %v3200_v43 = vld [vmem:[#allocation12 + $0x40] sm:$0xff] }
 0x2a4   : > { %v6521_v33 = vpop.f32.mrb[23].mxu0 }
 0x2a5   : > { %v3075_v34 = vadd.f32 %v6519_v50, %v3074_v41  ;;  %v6522_v58 = vadd.f32 %v6521_v33, %v6520_v51 }
 0x2a7   : > { %v3078_v32 = vadd.f32 %v6522_v58, %v3077_v13  ;;  %v7922_v3 = vadd.f32 %v3075_v34, %v1856_v38  ;;  %v3286_v13 = vpop.permute.xlu0 %3285  ;;  %v6433_v34 = vmul.f32 -1.442695, %v7900_v12 }
 0x2a8   : > { %v3082_v47 = vpop.f32.mrb[24].mxu1 }
 0x2a9   : > { %v7920_v56 = vadd.f32 %v3078_v32, %v1857_v54  ;;  %v6523_v55 = vpop.f32.mrb[24].mxu0  ;;  %v6573_v23 = vpop.f32.mrb[25].mxu1 }
 0x2aa   : > { %v6524_v48 = vpop.f32.mrb[25].mxu0  ;;  %v3085_v62 = vpop.f32.mrb[26].mxu1  ;;  %v6434_v23 = vmul.f32 -1.442695, %v7903_v15 }
 0x2ab   : > { %v6525_v0 = vadd.f32 %v6524_v48, %v6523_v55  ;;  %v6526_v63 = vpop.f32.mrb[26].mxu0  ;;  %v6574_v57 = vpop.f32.mrb[27].mxu1  ;;  %6748 = vtanh.f32 %v7920_v56 }
 0x2ac   : > { %v6527_v60 = vpop.f32.mrb[27].mxu0  ;;  %6750 = vtanh.f32 %v7922_v3 }
 0x2ad   : > { %v3083_v2 = vadd.f32 %v6525_v0, %v3082_v47 }
 0x2af   : > { %v7926_v4 = vadd.f32 %v3083_v2, %v1858_v1 }
 0x2b1   : > { %6752 = vtanh.f32 %v7926_v4 }
 0x2b2   : > { %6754 = vpow2.f32 %v6427_v5  ;;  %v6435_v5 = vmul.f32 -1.442695, %v7912_v31  ;;  %v6438_v31 = vmul.f32 -1.442695, %v7920_v56 }
 0x2b3   : > { %6756 = vpow2.f32 %v6429_v7 }
 0x2b4   : > { %6758 = vpow2.f32 %v6428_v53 }
 0x2b5   : > { %v6749_v6 = vpop.eup %6748  ;;  %6760 = vpow2.f32 %v6430_v10 }
 0x2b6   : > { %3305 = vrot.lane.b32.xlu1 %v6749_v6, %s7060_s24  ;;  %v6751_v9 = vpop.eup %6750  ;;  %6762 = vpow2.f32 %v6431_v19 }
 0x2b7   : > { %6764 = vpow2.f32 %v6432_v45  ;;  %v3288_v44 = vpop.permute.xlu1 %3287  ;;  %v6437_v45 = vmul.f32 -1.442695, %v7922_v3 }
 0x2ba   : > { %3303 = vrot.lane.b32.xlu1 %v6751_v9, %s7060_s24  ;;  %v6436_v9 = vmul.f32 -1.442695, %v7910_v37  ;;  %v6439_v37 = vmul.f32 -1.442695, %v7926_v4 }
 0x2bb   : > { %v6753_v14 = vpop.eup %6752  ;;  %v3290_v58 = vpop.permute.xlu1 %3289 }
 0x2bc   : > { %3307 = vrot.lane.b32.xlu0 %v6753_v14, %s7060_s24  ;;  %v6755_v17 = vpop.eup %6754 }
 0x2bd   : > { %v6757_v8 = vpop.eup %6756  ;;  %v3140_v18 = vadd.f32 1.0, %v6755_v17 }
 0x2be   : > { %3218 = vrot.lane.b32.xlu1 %v3192_v16, %s7059_s23  ;;  %v6759_v21 = vpop.eup %6758  ;;  %v3142_v24 = vadd.f32 1.0, %v6757_v8 }
 0x2bf   : > { %v6761_v25 = vpop.eup %6760  ;;  %6766 = vrcp.f32 %v3140_v18  ;;  %v3141_v27 = vadd.f32 1.0, %v6759_v21 }
 0x2c0   : > { %3222 = vrot.lane.b32.xlu0 %v3194_v40, %s7059_s23  ;;  %v6763_v20 = vpop.eup %6762  ;;  %6768 = vrcp.f32 %v3142_v24  ;;  %v3143_v29 = vadd.f32 1.0, %v6761_v25  ;;  %v3204_v24 = vld [vmem:[#allocation12 + $0x60] sm:$0x3] }
 0x2c1   : > { %6770 = vrcp.f32 %v3141_v27  ;;  %v3144_v36 = vadd.f32 1.0, %v6763_v20  ;;  %v6765_v41 = vpop.eup %6764 }
 0x2c2   : > { %3226 = vrot.lane.b32.xlu1 %v3196_v22, %s7059_s23  ;;  %6772 = vrcp.f32 %v3143_v29  ;;  %v3145_v35 = vadd.f32 1.0, %v6765_v41 }
 0x2c3   : > { %6774 = vrcp.f32 %v3144_v36 }
 0x2c4   : > { %3232 = vrot.lane.b32.xlu0 %v3199_v49, %s7059_s23  ;;  %6776 = vrcp.f32 %v3145_v35 }
 0x2c5   : > { %6778 = vpow2.f32 %v6433_v34 }
 0x2c6   : > { %3236 = vrot.lane.b32.xlu1 %v3201_v26, %s7059_s23  ;;  %6780 = vpow2.f32 %v6434_v23 }
 0x2c8   : > { %3240 = vrot.lane.b32.xlu0 %v3203_v59, %s7059_s23 }
 0x2c9   : > { %v7950_v50 = vpop.eup %6766 }
 0x2ca   : > { %3220 = vrot.lane.b32.xlu1 %v3193_v28, %s7059_s23  ;;  %v7953_v51 = vpop.eup %6768  ;;  %v3322_v52 = vmul.f32 %v7950_v50, %v3284_v39 }
 0x2cb   : > { %v3324_v33 = vmul.f32 %v7953_v51, %v3288_v44  ;;  %v7959_v54 = vpop.eup %6770 }
 0x2cc   : > { %3224 = vrot.lane.b32.xlu0 %v3195_v61, %s7059_s23  ;;  %v7962_v47 = vpop.eup %6772  ;;  %v3323_v38 = vmul.f32 %v7959_v54, %v3286_v13 }
 0x2cd   : > { %v3325_v55 = vmul.f32 %v7962_v47, %v3290_v58  ;;  %v7968_v12 = vpop.eup %6774 }
 0x2ce   : > { %3228 = vrot.lane.b32.xlu1 %v3197_v30, %s7059_s23  ;;  %v7973_v0 = vpop.eup %6776 }
 0x2cf   : > { %v6779_v57 = vpop.eup %6778 }
 0x2d0   : > { %3230 = vrot.lane.b32.xlu0 %v3198_v11, %s7059_s23  ;;  %v3292_v32 = vpop.permute.xlu0 %3291  ;;  %v3146_v15 = vadd.f32 1.0, %v6779_v57  ;;  %v6781_v1 = vpop.eup %6780 }
 0x2d1   : > { %v3326_v48 = vmul.f32 %v7968_v12, %v3292_v32  ;;  %v3147_v60 = vadd.f32 1.0, %v6781_v1 }
 0x2d2   : > { %3234 = vrot.lane.b32.xlu1 %v3200_v43, %s7059_s23  ;;  %6782 = vrcp.f32 %v3146_v15 }
 0x2d3   : > { %6784 = vrcp.f32 %v3147_v60 }
 0x2d4   : > { %3238 = vrot.lane.b32.xlu0 %v3202_v46, %s7059_s23  ;;  %v3294_v62 = vpop.permute.xlu0 %3293  ;;  %6786 = vpow2.f32 %v6435_v5 }
 0x2d5   : > { %v3327_v63 = vmul.f32 %v7973_v0, %v3294_v62  ;;  %6788 = vpow2.f32 %v6436_v9 }
 0x2d6   : > { %3348 = vrot.lane.b32.xlu1 %v3322_v52, %s7059_s23 }
 0x2d8   : > { %3352 = vrot.lane.b32.xlu0 %v3324_v33, %s7059_s23 }
 0x2da   : > { %3350 = vrot.lane.b32.xlu1 %v3323_v38, %s7059_s23 }
 0x2dc   : > { %3354 = vrot.lane.b32.xlu0 %v3325_v55, %s7059_s23  ;;  %v7977_v2 = vpop.eup %6782 }
 0x2dd   : > { %v7982_v53 = vpop.eup %6784 }
 0x2de   : > { %3356 = vrot.lane.b32.xlu1 %v3326_v48, %s7059_s23  ;;  %v6787_v16 = vpop.eup %6786 }
 0x2df   : > { %v3148_v19 = vadd.f32 1.0, %v6787_v16  ;;  %v6789_v40 = vpop.eup %6788 }
 0x2e0   : > { %v3149_v22 = vadd.f32 1.0, %v6789_v40 }
 0x2e1   : > { %6790 = vrcp.f32 %v3148_v19 }
 0x2e2   : > { %3358 = vrot.lane.b32.xlu1 %v3327_v63, %s7059_s23  ;;  %6792 = vpow2.f32 %v6438_v31 }
 0x2e3   : > { %6794 = vrcp.f32 %v3149_v22 }
 0x2e4   : > { %6796 = vpow2.f32 %v6437_v45 }
 0x2e5   : > { %6798 = vpow2.f32 %v6439_v37 }
 0x2eb   : > { %v7990_v17 = vpop.eup %6790 }
 0x2ec   : > { %v6793_v59 = vpop.eup %6792 }
 0x2ed   : > { %v7994_v56 = vpop.eup %6794  ;;  %v3151_v3 = vadd.f32 1.0, %v6793_v59 }
 0x2ee   : > { %v6797_v21 = vpop.eup %6796 }
 0x2ef   : > { %v3150_v25 = vadd.f32 1.0, %v6797_v21  ;;  %6800 = vrcp.f32 %v3151_v3  ;;  %v6799_v4 = vpop.eup %6798 }
 0x2f0   : > { %v3152_v28 = vadd.f32 1.0, %v6799_v4 }
 0x2f1   : > { %6802 = vrcp.f32 %v3150_v25 }
 0x2f2   : > { %6804 = vrcp.f32 %v3152_v28 }
 0x2f3   : > { %v3296_v6 = vpop.permute.xlu1 %3295 }
 0x2f4   : > { %v3328_v7 = vmul.f32 %v7977_v2, %v3296_v6 }
 0x2f6   : > { %3360 = vrot.lane.b32.xlu0 %v3328_v7, %s7059_s23 }
 0x2f7   : > { %v3298_v10 = vpop.permute.xlu1 %3297 }
 0x2f8   : > { %v3329_v14 = vmul.f32 %v7982_v53, %v3298_v10 }
 0x2f9   : > { %v7999_v61 = vpop.eup %6800 }
 0x2fa   : > { %3362 = vrot.lane.b32.xlu0 %v3329_v14, %s7059_s23 }
 0x2fb   : > { %v8003_v29 = vpop.eup %6802 }
 0x2fc   : > { %v8007_v39 = vpop.eup %6804 }
 0x310   : > { %v3302_v49 = vpop.permute.xlu0 %3301 }
 0x311   : > { %v3331_v18 = vmul.f32 %v7994_v56, %v3302_v49 }
 0x314   : > { %v3300_v8 = vpop.permute.xlu0 %3299 }
 0x315   : > { %v3330_v26 = vmul.f32 %v7990_v17, %v3300_v8 }
 0x317   : > { %3364 = vrot.lane.b32.xlu1 %v3330_v26, %s7059_s23 }
 0x31b   : > { %3366 = vrot.lane.b32.xlu1 %v3331_v18, %s7059_s23 }
 0x31f   : > { %3242 = vrot.lane.b32.xlu1 %v3204_v24, %s7059_s23 }
 0x328   : > { %v3306_v27 = vpop.permute.xlu1 %3305 }
 0x329   : > { %v3333_v20 = vmul.f32 %v7999_v61, %v3306_v27 }
 0x32b   : > { %3370 = vrot.lane.b32.xlu0 %v3333_v20, %s7059_s23 }
 0x32c   : > { %v3304_v30 = vpop.permute.xlu1 %3303 }
 0x32d   : > { %v3332_v11 = vmul.f32 %v8003_v29, %v3304_v30 }
 0x32e   : > { %v3308_v36 = vpop.permute.xlu0 %3307 }
 0x32f   : > { %3368 = vrot.lane.b32.xlu0 %v3332_v11, %s7059_s23  ;;  %v3334_v43 = vmul.f32 %v8007_v39, %v3308_v36 }
 0x330   : > { %v3219_v41 = vpop.permute.xlu1 %3218 }
 0x331   : > { %v3257_v23 = vmul.f32 %v7950_v50, %v3219_v41 }
 0x332   : > { %v3223_v44 = vpop.permute.xlu0 %3222 }
 0x333   : > { %3372 = vrot.lane.b32.xlu0 %v3334_v43, %s7059_s23  ;;  %v3259_v48 = vmul.f32 %v7953_v51, %v3223_v44 }
 0x334   : > { %v3227_v46 = vpop.permute.xlu1 %3226 }
 0x335   : > { %v3261_v10 = vmul.f32 %v7968_v12, %v3227_v46 }
 0x336   : > { %v3233_v35 = vpop.permute.xlu0 %3232 }
 0x337   : > { %v3264_v21 = vmul.f32 %v7982_v53, %v3233_v35 }
 0x338   : > { %v3237_v13 = vpop.permute.xlu1 %3236 }
 0x339   : > { %v3266_v20 = vmul.f32 %v7994_v56, %v3237_v13 }
 0x33a   : > { %v8011_v52 = vpop.permute.xlu0 %3240 }
 0x33b   : > { %v3268_v44 = vmul.f32 %v7999_v61, %v8011_v52 }
 0x33c   : > { %v3221_v33 = vpop.permute.xlu1 %3220 }
 0x33d   : > { %v3258_v1 = vmul.f32 %v7959_v54, %v3221_v33 }
 0x33e   : > { %v3225_v34 = vpop.permute.xlu0 %3224 }
 0x33f   : > { %v3260_v60 = vmul.f32 %v7962_v47, %v3225_v34 }
 0x340   : > { %v3229_v58 = vpop.permute.xlu1 %3228 }
 0x341   : > { %v3262_v19 = vmul.f32 %v7973_v0, %v3229_v58 }
 0x342   : > { %v3231_v32 = vpop.permute.xlu0 %3230 }
 0x343   : > { %v3263_v59 = vmul.f32 %v7977_v2, %v3231_v32 }
 0x344   : > { %v3235_v38 = vpop.permute.xlu1 %3234 }
 0x345   : > { %v3265_v11 = vmul.f32 %v7990_v17, %v3235_v38 }
 0x346   : > { %v8013_v55 = vpop.permute.xlu0 %3238 }
 0x347   : > { %v3267_v33 = vmul.f32 %v8003_v29, %v8013_v55 }
 0x348   : > { %v3349_v62 = vpop.permute.xlu1 %3348 }
 0x349   : > { %v8017_v63 = vadd.f32 %v3349_v62, %v3257_v23 }
 0x34a   : > { %v3353_v57 = vpop.permute.xlu0 %3352 }
 0x34b   : > { %v8019_v15 = vadd.f32 %v3353_v57, %v3259_v48  ;;  %6806 = vtanh.f32 %v8017_v63 }
 0x34c   : > { %v3351_v5 = vpop.permute.xlu1 %3350 }
 0x34d   : > { %6808 = vtanh.f32 %v8019_v15  ;;  %v8025_v6 = vadd.f32 %v3351_v5, %v3258_v1 }
 0x34e   : > { %v3355_v7 = vpop.permute.xlu0 %3354 }
 0x34f   : > { %v8027_v9 = vadd.f32 %v3355_v7, %v3260_v60  ;;  %6810 = vtanh.f32 %v8025_v6 }
 0x350   : > { %v3357_v14 = vpop.permute.xlu1 %3356 }
 0x351   : > { %6812 = vtanh.f32 %v8027_v9  ;;  %v8032_v16 = vadd.f32 %v3357_v14, %v3261_v10 }
 0x353   : > { %6814 = vtanh.f32 %v8032_v16 }
 0x354   : > { %v3359_v40 = vpop.permute.xlu1 %3358 }
 0x355   : > { %v6807_v31 = vpop.eup %6806  ;;  %v8036_v22 = vadd.f32 %v3359_v40, %v3262_v19 }
 0x356   : > { %3426 = vrot.lane.b32.xlu1 %v6807_v31, %s7060_s24 }
 0x357   : > { %v6809_v45 = vpop.eup %6808  ;;  %6816 = vtanh.f32 %v8036_v22 }
 0x358   : > { %3430 = vrot.lane.b32.xlu0 %v6809_v45, %s7060_s24 }
 0x359   : > { %v6811_v49 = vpop.eup %6810 }
 0x35a   : > { %3428 = vrot.lane.b32.xlu1 %v6811_v49, %s7060_s24 }
 0x35b   : > { %v6813_v37 = vpop.eup %6812 }
 0x35c   : > { %3432 = vrot.lane.b32.xlu0 %v6813_v37, %s7060_s24 }
 0x35d   : > { %v6815_v8 = vpop.eup %6814 }
 0x35e   : > { %3434 = vrot.lane.b32.xlu1 %v6815_v8, %s7060_s24 }
 0x361   : > { %v6817_v26 = vpop.eup %6816 }
 0x362   : > { %3436 = vrot.lane.b32.xlu1 %v6817_v26, %s7060_s24 }
 0x368   : > { %v3361_v18 = vpop.permute.xlu0 %3360 }
 0x369   : > { %v8046_v3 = vadd.f32 %v3361_v18, %v3263_v59 }
 0x36b   : > { %6818 = vtanh.f32 %v8046_v3 }
 0x36c   : > { %v3363_v24 = vpop.permute.xlu0 %3362 }
 0x36d   : > { %v8050_v25 = vadd.f32 %v3363_v24, %v3264_v21 }
 0x36f   : > { %6820 = vtanh.f32 %v8050_v25 }
 0x375   : > { %v6819_v4 = vpop.eup %6818 }
 0x376   : > { %3438 = vrot.lane.b32.xlu0 %v6819_v4, %s7060_s24 }
 0x379   : > { %v6821_v28 = vpop.eup %6820 }
 0x37a   : > { %3440 = vrot.lane.b32.xlu0 %v6821_v28, %s7060_s24 }
 0x389   : > { %v3365_v27 = vpop.permute.xlu1 %3364 }
 0x38a   : > { %v8059_v41 = vadd.f32 %v3365_v27, %v3265_v11 }
 0x38d   : > { %v3367_v30 = vpop.permute.xlu1 %3366 }
 0x38e   : > { %v8057_v36 = vadd.f32 %v3367_v30, %v3266_v20 }
 0x390   : > { %6822 = vtanh.f32 %v8057_v36 }
 0x391   : > { %6824 = vtanh.f32 %v8059_v41  ;;  %v3243_v34 = vpop.permute.xlu1 %3242 }
 0x392   : > { %v3269_v38 = vmul.f32 %v8007_v39, %v3243_v34 }
 0x39a   : > { %v6823_v43 = vpop.eup %6822 }
 0x39b   : > { %3444 = vrot.lane.b32.xlu1 %v6823_v43, %s7060_s24  ;;  %v6825_v35 = vpop.eup %6824 }
 0x39d   : > { %v3371_v46 = vpop.permute.xlu0 %3370 }
 0x39e   : > { %v8066_v13 = vadd.f32 %v3371_v46, %v3268_v44 }
 0x39f   : > { %3442 = vrot.lane.b32.xlu1 %v6825_v35, %s7060_s24 }
 0x3a0   : > { %6826 = vtanh.f32 %v8066_v13 }
 0x3a1   : > { %v3369_v58 = vpop.permute.xlu0 %3368 }
 0x3a2   : > { %v8072_v32 = vadd.f32 %v3369_v58, %v3267_v33 }
 0x3a4   : > { %6828 = vtanh.f32 %v8072_v32 }
 0x3a5   : > { %v3373_v52 = vpop.permute.xlu0 %3372 }
 0x3a6   : > { %v8076_v23 = vadd.f32 %v3373_v52, %v3269_v38 }
 0x3a8   : > { %6830 = vtanh.f32 %v8076_v23 }
 0x3aa   : > { %v6827_v48 = vpop.eup %6826 }
 0x3ab   : > { %3448 = vrot.lane.b32.xlu0 %v6827_v48, %s7060_s24 }
 0x3ae   : > { %v6829_v62 = vpop.eup %6828 }
 0x3af   : > { %3446 = vrot.lane.b32.xlu0 %v6829_v62, %s7060_s24 }
 0x3b2   : > { %v6831_v55 = vpop.eup %6830 }
 0x3b3   : > { %3491 = vrot.lane.b32.xlu0 %v8017_v63, %s7061_s9  ;;  %3450 = vrot.lane.b32.xlu1 %v6831_v55, %s7060_s24 }
 0x3b7   : > { %3495 = vrot.lane.b32.xlu0 %v8019_v15, %s7061_s9  ;;  %3493 = vrot.lane.b32.xlu1 %v8025_v6, %s7061_s9 }
 0x3bb   : > { %3499 = vrot.lane.b32.xlu0 %v8032_v16, %s7061_s9  ;;  %3497 = vrot.lane.b32.xlu1 %v8027_v9, %s7061_s9 }
 0x3bf   : > { %3503 = vrot.lane.b32.xlu0 %v8046_v3, %s7061_s9  ;;  %3501 = vrot.lane.b32.xlu1 %v8036_v22, %s7061_s9 }
 0x3c3   : > { %3507 = vrot.lane.b32.xlu0 %v8059_v41, %s7061_s9  ;;  %3505 = vrot.lane.b32.xlu1 %v8050_v25, %s7061_s9 }
 0x3c7   : > { %3511 = vrot.lane.b32.xlu0 %v8072_v32, %s7061_s9  ;;  %3509 = vrot.lane.b32.xlu1 %v8057_v36, %s7061_s9 }
 0x3c8   : > { %v3427_v57 = vpop.permute.xlu1 %3426 }
 0x3c9   : > { %v3465_v1 = vmul.f32 %v7950_v50, %v3427_v57 }
 0x3ca   : > { %v3431_v60 = vpop.permute.xlu0 %3430 }
 0x3cb   : > { %v3467_v5 = vmul.f32 %v7953_v51, %v3431_v60  ;;  %v3557_v7 = vcombine.high %v3465_v1, %v3465_v1  ;;  %v3564_v10 = vrot.slane %v3465_v1, %v7414_v42  ;;  %3515 = vrot.lane.b32.xlu0 %v8076_v23, %s7061_s9  ;;  %3513 = vrot.lane.b32.xlu1 %v8066_v13, %s7061_s9 }
 0x3cc   : > { %v3429_v40 = vpop.permute.xlu1 %3428 }
 0x3cd   : > { %v3655_v14 = vcombine.high %v3467_v5, %v3467_v5  ;;  %v3662_v19 = vrot.slane %v3467_v5, %v7414_v42  ;;  %v3571_v31 = vrot.slane %v3557_v7, %v7414_v42  ;;  %v3572_v45 = vcombine.high %v3564_v10, %v3564_v10 }
 0x3ce   : > { %v3466_v50 = vmul.f32 %v7959_v54, %v3429_v40  ;;  %v3580_v51 = vrot.slane %v3564_v10, %v7414_v42  ;;  %v3433_v27 = vpop.permute.xlu0 %3432 }
 0x3cf   : > { %v3669_v49 = vrot.slane %v3655_v14, %v7414_v42  ;;  %v3670_v37 = vcombine.high %v3662_v19, %v3662_v19  ;;  %v3678_v8 = vrot.slane %v3662_v19, %v7414_v42  ;;  %v3573_v26 = vcombine.high %v3571_v31, %v3571_v31 }
 0x3d0   : > { %v3587_v59 = vrot.slane %v3571_v31, %v7414_v42  ;;  %v3594_v18 = vrot.slane %v3572_v45, %v7414_v42  ;;  %v3606_v21 = vcombine.high %v3466_v50, %v3466_v50  ;;  %v3613_v54 = vrot.slane %v3466_v50, %v7414_v42  ;;  %v3435_v34 = vpop.permute.xlu1 %3434 }
 0x3d1   : > { %v3671_v24 = vcombine.high %v3669_v49, %v3669_v49  ;;  %v3685_v4 = vrot.slane %v3669_v49, %v7414_v42  ;;  %v3692_v28 = vrot.slane %v3670_v37, %v7414_v42  ;;  %v3601_v20 = vrot.slane %v3573_v26, %v7414_v42 }
 0x3d2   : > { %v3603_v30 = vcombine.high %v3587_v59, %v3587_v59  ;;  %v4167_v11 = vcombine.low %v3580_v51, %v3594_v18  ;;  %v6440_v43 = vcombine.high %v3580_v51, %v3594_v18  ;;  %v3468_v48 = vmul.f32 %v7962_v47, %v3433_v27 }
 0x3d3   : > { %v3699_v44 = vrot.slane %v3671_v24, %v7414_v42  ;;  %v3701_v46 = vcombine.high %v3685_v4, %v3685_v4  ;;  %v4264_v35 = vcombine.low %v3678_v8, %v3692_v28  ;;  %v6442_v33 = vcombine.high %v3678_v8, %v3692_v28 }
 0x3d4   : > { %v4169_v58 = vcombine.low %v3587_v59, %v3601_v20  ;;  %v8125_v38 = vrot.slane %v4167_v11, %v7414_v42  ;;  %v8128_v52 = vrot.slane %v6440_v43, %v7414_v42  ;;  %v8132_v62 = vrot.slane %v3603_v30, %v7414_v42  ;;  %v3437_v26 = vpop.permute.xlu1 %3436 }
 0x3d5   : > { %v8135_v55 = vrot.slane %v4264_v35, %v7414_v42  ;;  %v4286_v57 = vrot.slane %v6442_v33, %v7414_v42  ;;  %v4293_v1 = vrot.slane %v3685_v4, %v7414_v42  ;;  %v4311_v60 = vcombine.low %v3699_v44, %v3701_v46 }
 0x3d6   : > { %v3605_v5 = vcombine.high %v3601_v20, %v3601_v20  ;;  %v3620_v7 = vrot.slane %v3606_v21, %v7414_v42  ;;  %v8141_v10 = vrot.slane %v4169_v58, %v7414_v42  ;;  %v4198_v47 = vcombine.low %v8125_v38, %v8128_v52 }
 0x3d7   : > { %v3621_v14 = vcombine.high %v3613_v54, %v3613_v54  ;;  %v3629_v19 = vrot.slane %v3613_v54, %v7414_v42  ;;  %v8146_v40 = vcombine.low %v4286_v57, %v4293_v1  ;;  %v3703_v45 = vcombine.high %v3699_v44, %v3699_v44 }
 0x3d8   : > { %v3622_v31 = vcombine.high %v3620_v7, %v3620_v7  ;;  %v3704_v50 = vcombine.high %v3468_v48, %v3468_v48  ;;  %v3711_v8 = vrot.slane %v3468_v48, %v7414_v42  ;;  %v3636_v59 = vrot.slane %v3620_v7, %v7414_v42 }
 0x3d9   : > { %v3643_v51 = vrot.slane %v3621_v14, %v7414_v42  ;;  %v3651_v49 = vcombine.high %v3629_v19, %v3629_v19  ;;  %v4215_v37 = vcombine.low %v3605_v5, %v3629_v19  ;;  %v4320_v21 = vrot.slane %v4311_v60, %v7414_v42 }
 0x3da   : > { %v8152_v18 = vrot.slane %v3622_v31, %v7414_v42  ;;  %v3718_v24 = vrot.slane %v3704_v50, %v7414_v42  ;;  %v3719_v54 = vcombine.high %v3711_v8, %v3711_v8  ;;  %v3469_v27 = vmul.f32 %v7968_v12, %v3435_v34 }
 0x3db   : > { %v3653_v4 = vcombine.high %v3643_v51, %v3643_v51  ;;  %v4216_v28 = vcombine.low %v3643_v51, %v3651_v49  ;;  %v3727_v11 = vrot.slane %v3711_v8, %v7414_v42  ;;  %v3470_v43 = vmul.f32 %v7973_v0, %v3437_v26 }
 0x3dc   : > { %v6441_v20 = vcombine.high %v3636_v59, %v8152_v18  ;;  %v3720_v30 = vcombine.high %v3718_v24, %v3718_v24  ;;  %v4224_v46 = vrot.slane %v4215_v37, %v7414_v42  ;;  %v3741_v33 = vrot.slane %v3719_v54, %v7414_v42 }
 0x3dd   : > { %v8160_v44 = vcombine.low %v3653_v4, %v3636_v59  ;;  %v4231_v35 = vrot.slane %v4216_v28, %v7414_v42  ;;  %v3734_v58 = vrot.slane %v3718_v24, %v7414_v42  ;;  %v3749_v12 = vcombine.high %v3727_v11, %v3727_v11 }
 0x3de   : > { %v3748_v48 = vrot.slane %v3720_v30, %v7414_v42  ;;  %v4312_v34 = vcombine.low %v3703_v45, %v3727_v11  ;;  %v4245_v57 = vrot.slane %v8152_v18, %v7414_v42  ;;  %v4272_v1 = vrot.slane %v6441_v20, %v7414_v42 }
 0x3df   : > { %v3751_v0 = vcombine.high %v3741_v33, %v3741_v33  ;;  %v3753_v60 = vcombine.high %v3469_v27, %v3469_v27  ;;  %v4238_v5 = vrot.slane %v8160_v44, %v7414_v42  ;;  %v4313_v7 = vcombine.low %v3741_v33, %v3749_v12 }
 0x3e0   : > { %v4327_v14 = vrot.slane %v4312_v34, %v7414_v42  ;;  %v4359_v19 = vcombine.low %v3734_v58, %v3748_v48  ;;  %v8173_v31 = vcombine.low %v4224_v46, %v4231_v35  ;;  %v3760_v50 = vrot.slane %v3469_v27, %v7414_v42 }
 0x3e1   : > { %v3767_v45 = vrot.slane %v3753_v60, %v7414_v42  ;;  %v3802_v51 = vcombine.high %v3470_v43, %v3470_v43  ;;  %v4334_v49 = vrot.slane %v4313_v7, %v7414_v42  ;;  %v4341_v37 = vrot.slane %v3751_v0, %v7414_v42 }
 0x3e2   : > { %v8179_v8 = vcombine.low %v4320_v21, %v4327_v14  ;;  %v6443_v26 = vcombine.high %v3734_v58, %v3748_v48  ;;  %v3768_v59 = vcombine.high %v3760_v50, %v3760_v50  ;;  %v3776_v24 = vrot.slane %v3760_v50, %v7414_v42 }
 0x3e3   : > { %v3769_v18 = vcombine.high %v3767_v45, %v3767_v45  ;;  %v3783_v4 = vrot.slane %v3767_v45, %v7414_v42  ;;  %v4368_v28 = vrot.slane %v4359_v19, %v7414_v42  ;;  %v3809_v54 = vrot.slane %v3470_v43, %v7414_v42 }
 0x3e4   : > { %v3816_v27 = vrot.slane %v3802_v51, %v7414_v42  ;;  %v4199_v20 = vcombine.low %v8141_v10, %v8132_v62  ;;  %v3790_v30 = vrot.slane %v3768_v59, %v7414_v42  ;;  %v3798_v11 = vcombine.high %v3776_v24, %v3776_v24 }
 0x3e5   : > { %v3797_v21 = vrot.slane %v3769_v18, %v7414_v42  ;;  %v3799_v44 = vcombine.high %v3783_v4, %v3783_v4  ;;  %v3817_v46 = vcombine.high %v3809_v54, %v3809_v54  ;;  %v3825_v33 = vrot.slane %v3809_v54, %v7414_v42 }
 0x3e6   : > { %v3818_v35 = vcombine.high %v3816_v27, %v3816_v27  ;;  %v4206_v43 = vrot.slane %v4198_v47, %v7414_v42  ;;  %v3800_v58 = vcombine.high %v3790_v30, %v3790_v30  ;;  %v4361_v48 = vcombine.low %v3776_v24, %v3790_v30 }
 0x3e7   : > { %v4408_v12 = vcombine.low %v3797_v21, %v3799_v44  ;;  %v3832_v62 = vrot.slane %v3816_v27, %v7414_v42  ;;  %v3801_v10 = vcombine.high %v3797_v21, %v3797_v21  ;;  %v3839_v34 = vrot.slane %v3817_v46, %v7414_v42 }
 0x3e8   : > { %v3846_v0 = vrot.slane %v3818_v35, %v7414_v42  ;;  %v4213_v60 = vrot.slane %v4199_v20, %v7414_v42  ;;  %v4382_v7 = vrot.slane %v4361_v48, %v7414_v42  ;;  %v4389_v14 = vrot.slane %v3798_v11, %v7414_v42  ;;  %v3439_v54 = vpop.permute.xlu0 %3438 }
 0x3e9   : > { %v4407_v19 = vcombine.low %v3800_v58, %v3783_v4  ;;  %v4294_v38 = vcombine.low %v4272_v1, %v8135_v55  ;;  %v4375_v52 = vrot.slane %v6443_v26, %v7414_v42  ;;  %v4409_v47 = vcombine.low %v3801_v10, %v3825_v33 }
 0x3ea   : > { %v6444_v50 = vcombine.high %v3825_v33, %v3839_v34  ;;  %v4456_v45 = vcombine.low %v3832_v62, %v3846_v0  ;;  %v4391_v51 = vcombine.low %v4382_v7, %v4389_v14  ;;  %v4423_v59 = vrot.slane %v4408_v12, %v7414_v42 }
 0x3eb   : > { %v4437_v18 = vrot.slane %v3839_v34, %v7414_v42  ;;  %v4214_v24 = vcombine.low %v4206_v43, %v4213_v60  ;;  %v4416_v27 = vrot.slane %v4407_v19, %v7414_v42  ;;  %v4430_v20 = vrot.slane %v4409_v47, %v7414_v42 }
 0x3ec   : > { %v6445_v30 = vcombine.high %v3832_v62, %v3846_v0  ;;  %v4302_v4 = vrot.slane %v4294_v38, %v7414_v42  ;;  %v4464_v55 = vrot.slane %v6444_v50, %v7414_v42  ;;  %v4309_v1 = vrot.slane %v8146_v40, %v7414_v42  ;;  %v3441_v12 = vpop.permute.xlu0 %3440 }
 0x3ed   : > { %4839 = vrot.lane.b32.xlu1 %v4214_v24, %s7059_s23  ;;  %v4247_v26 = vcombine.low %v4238_v5, %v4245_v57  ;;  %v4343_v21 = vcombine.low %v4334_v49, %v4341_v37  ;;  %v4439_v11 = vcombine.low %v4430_v20, %v4437_v18  ;;  %v4471_v44 = vrot.slane %v4456_v45, %v7414_v42 }
 0x3ee   : > { %v4254_v46 = vrot.slane %v8173_v31, %v7414_v42  ;;  %v4390_v35 = vcombine.low %v4368_v28, %v4375_v52  ;;  %v4310_v33 = vcombine.low %v4302_v4, %v4309_v1  ;;  %v4350_v58 = vrot.slane %v8179_v8, %v7414_v42 }
 0x3ef   : > { %v4261_v43 = vrot.slane %v4247_v26, %v7414_v42  ;;  %v4405_v48 = vrot.slane %v4391_v51, %v7414_v42  ;;  %v4357_v40 = vrot.slane %v4343_v21, %v7414_v42  ;;  %v3471_v5 = vmul.f32 %v7977_v2, %v3439_v54 }
 0x3f0   : > { %v4398_v57 = vrot.slane %v4390_v35, %v7414_v42  ;;  %v4438_v49 = vcombine.low %v4416_v27, %v4423_v59  ;;  %v4453_v37 = vrot.slane %v4439_v11, %v7414_v42  ;;  %v3472_v28 = vmul.f32 %v7982_v53, %v3441_v12 }
 0x3f1   : > { %4843 = vrot.lane.b32.xlu1 %v4310_v33, %s7059_s23  ;;  %v4262_v31 = vcombine.low %v4254_v46, %v4261_v43  ;;  %v4486_v62 = vcombine.low %v4464_v55, %v4471_v44  ;;  %v3851_v10 = vcombine.high %v3471_v5, %v3471_v5  ;;  %v3858_v8 = vrot.slane %v3471_v5, %v7414_v42 }
 0x3f2   : > { %v4478_v34 = vrot.slane %v6445_v30, %v7414_v42  ;;  %v4406_v0 = vcombine.low %v4398_v57, %v4405_v48  ;;  %v4446_v60 = vrot.slane %v4438_v49, %v7414_v42  ;;  %v3900_v2 = vcombine.high %v3472_v28, %v3472_v28 }
 0x3f3   : > { %4841 = vrot.lane.b32.xlu0 %v4262_v31, %s7059_s23  ;;  %v3907_v7 = vrot.slane %v3472_v28, %v7414_v42  ;;  %v4358_v14 = vcombine.low %v4350_v58, %v4357_v40  ;;  %v3865_v19 = vrot.slane %v3851_v10, %v7414_v42  ;;  %v3866_v38 = vcombine.high %v3858_v8, %v3858_v8 }
 0x3f4   : > { %v3874_v53 = vrot.slane %v3858_v8, %v7414_v42  ;;  %v4454_v52 = vcombine.low %v4446_v60, %v4453_v37  ;;  %v3914_v47 = vrot.slane %v3900_v2, %v7414_v42  ;;  %v4494_v58 = vrot.slane %v4486_v62, %v7414_v42 }
 0x3f5   : > { %4847 = vrot.lane.b32.xlu1 %v4406_v0, %s7059_s23  ;;  %v3915_v50 = vcombine.high %v3907_v7, %v3907_v7  ;;  %v3923_v45 = vrot.slane %v3907_v7, %v7414_v42  ;;  %v3867_v51 = vcombine.high %v3865_v19, %v3865_v19  ;;  %v3881_v59 = vrot.slane %v3865_v19, %v7414_v42 }
 0x3f6   : > { %v3888_v18 = vrot.slane %v3866_v38, %v7414_v42  ;;  %v3896_v24 = vcombine.high %v3874_v53, %v3874_v53  ;;  %v4485_v54 = vrot.slane %v3874_v53, %v7414_v42  ;;  %v3916_v27 = vcombine.high %v3914_v47, %v3914_v47 }
 0x3f7   : > { %4845 = vrot.lane.b32.xlu0 %v4358_v14, %s7059_s23  ;;  %v3930_v20 = vrot.slane %v3914_v47, %v7414_v42  ;;  %v3937_v30 = vrot.slane %v3915_v50, %v7414_v42  ;;  %v3895_v4 = vrot.slane %v3867_v51, %v7414_v42  ;;  %v3897_v55 = vcombine.high %v3881_v59, %v3881_v59 }
 0x3f8   : > { %v3898_v1 = vcombine.high %v3888_v18, %v3888_v18  ;;  %v4503_v26 = vcombine.low %v3888_v18, %v3896_v24  ;;  %v4487_v21 = vcombine.low %v4478_v34, %v4485_v54  ;;  %v3944_v11 = vrot.slane %v3916_v27, %v7414_v42 }
 0x3f9   : > { %v3946_v44 = vcombine.high %v3930_v20, %v3930_v20  ;;  %v4551_v46 = vcombine.low %v3923_v45, %v3937_v30  ;;  %v3899_v35 = vcombine.high %v3895_v4, %v3895_v4  ;;  %v4505_v43 = vcombine.low %v3895_v4, %v3897_v55 }
 0x3fa   : > { %v4504_v33 = vcombine.low %v3898_v1, %v3881_v59  ;;  %v4512_v48 = vrot.slane %v4503_v26, %v7414_v42  ;;  %v6446_v12 = vcombine.high %v3923_v45, %v3937_v30  ;;  %v4553_v40 = vcombine.low %v3930_v20, %v3944_v11 }
 0x3fb   : > { %4849 = vrot.lane.b32.xlu0 %v4454_v52, %s7059_s23  ;;  %v4560_v57 = vrot.slane %v4551_v46, %v7414_v42  ;;  %v4526_v49 = vrot.slane %v4505_v43, %v7414_v42  ;;  %v4533_v31 = vrot.slane %v3899_v35, %v7414_v42  ;;  %v4501_v37 = vrot.slane %v4487_v21, %v7414_v42 }
 0x3fc   : > { %v4519_v5 = vrot.slane %v4504_v33, %v7414_v42  ;;  %v4567_v28 = vrot.slane %v6446_v12, %v7414_v42  ;;  %v4574_v62 = vrot.slane %v4553_v40, %v7414_v42  ;;  %v4581_v10 = vrot.slane %v3946_v44, %v7414_v42 }
 0x3fd   : > { %v4502_v8 = vcombine.low %v4494_v58, %v4501_v37  ;;  %v4535_v0 = vcombine.low %v4526_v49, %v4533_v31  ;;  %v3948_v44 = vcombine.high %v3944_v11, %v3944_v11 }
 0x3fe   : > { %v4534_v34 = vcombine.low %v4512_v48, %v4519_v5  ;;  %v4582_v60 = vcombine.low %v4560_v57, %v4567_v28  ;;  %v4583_v2 = vcombine.low %v4574_v62, %v4581_v10 }
 0x3ff   : > { %4851 = vrot.lane.b32.xlu1 %v4502_v8, %s7059_s23  ;;  %v4549_v14 = vrot.slane %v4535_v0, %v7414_v42 }
 0x400   : > { %v4542_v7 = vrot.slane %v4534_v34, %v7414_v42  ;;  %v4590_v19 = vrot.slane %v4582_v60, %v7414_v42  ;;  %v4597_v38 = vrot.slane %v4583_v2, %v7414_v42 }
 0x402   : > { %v4550_v53 = vcombine.low %v4542_v7, %v4549_v14  ;;  %v4598_v52 = vcombine.low %v4590_v19, %v4597_v38 }
 0x404   : > { %4853 = vrot.lane.b32.xlu0 %v4550_v53, %s7059_s23  ;;  %4855 = vrot.lane.b32.xlu1 %v4598_v52, %s7059_s23 }
 0x40d   : > { %v3445_v47 = vpop.permute.xlu1 %3444 }
 0x40e   : > { %v3474_v50 = vmul.f32 %v7994_v56, %v3445_v47 }
 0x410   : > { %v3998_v45 = vcombine.high %v3474_v50, %v3474_v50  ;;  %v4005_v51 = vrot.slane %v3474_v50, %v7414_v42 }
 0x411   : > { %v3443_v59 = vpop.permute.xlu1 %3442 }
 0x412   : > { %v4013_v18 = vcombine.high %v4005_v51, %v4005_v51  ;;  %v3473_v24 = vmul.f32 %v7990_v17, %v3443_v59  ;;  %v4012_v54 = vrot.slane %v3998_v45, %v7414_v42  ;;  %v4021_v27 = vrot.slane %v4005_v51, %v7414_v42 }
 0x414   : > { %v4035_v20 = vrot.slane %v4013_v18, %v7414_v42  ;;  %v3949_v30 = vcombine.high %v3473_v24, %v3473_v24  ;;  %v3956_v4 = vrot.slane %v3473_v24, %v7414_v42  ;;  %v4028_v21 = vrot.slane %v4012_v54, %v7414_v42 }
 0x415   : > { %v4014_v5 = vcombine.high %v4012_v54, %v4012_v54 }
 0x416   : > { %v6448_v55 = vcombine.high %v4021_v27, %v4035_v20  ;;  %v3963_v1 = vrot.slane %v3949_v30, %v7414_v42  ;;  %v3964_v56 = vcombine.high %v3956_v4, %v3956_v4  ;;  %v3972_v26 = vrot.slane %v3956_v4, %v7414_v42 }
 0x417   : > { %v4648_v33 = vcombine.low %v4021_v27, %v4035_v20  ;;  %v4677_v49 = vrot.slane %v4028_v21, %v7414_v42  ;;  %v4042_v38 = vrot.slane %v4014_v5, %v7414_v42  ;;  %v4044_v50 = vcombine.high %v4028_v21, %v4028_v21 }
 0x418   : > { %v3965_v46 = vcombine.high %v3963_v1, %v3963_v1  ;;  %v3986_v17 = vrot.slane %v3964_v56, %v7414_v42  ;;  %v3994_v35 = vcombine.high %v3972_v26, %v3972_v26  ;;  %v4670_v43 = vrot.slane %v6448_v55, %v7414_v42 }
 0x419   : > { %v4599_v58 = vcombine.low %v3948_v44, %v3972_v26  ;;  %v3979_v48 = vrot.slane %v3963_v1, %v7414_v42  ;;  %v4663_v10 = vrot.slane %v4648_v33, %v7414_v42  ;;  %v4695_v44 = vcombine.low %v4042_v38, %v4044_v50 }
 0x41a   : > { %v3993_v12 = vrot.slane %v3965_v46, %v7414_v42  ;;  %v3996_v40 = vcombine.high %v3986_v17, %v3986_v17  ;;  %v4600_v57 = vcombine.low %v3986_v17, %v3994_v35  ;;  %v4679_v8 = vcombine.low %v4670_v43, %v4677_v49 }
 0x41b   : > { %v4608_v11 = vrot.slane %v4599_v58, %v7414_v42  ;;  %v4046_v17 = vcombine.high %v4042_v38, %v4042_v38 }
 0x41c   : > { %v4601_v31 = vcombine.low %v3996_v40, %v3979_v48  ;;  %v4615_v37 = vrot.slane %v4600_v57, %v7414_v42  ;;  %v6447_v28 = vcombine.high %v3979_v48, %v3993_v12  ;;  %v4629_v60 = vrot.slane %v3993_v12, %v7414_v42 }
 0x41d   : > { %v3449_v62 = vpop.permute.xlu0 %3448  ;;  %v4693_v18 = vrot.slane %v4679_v8, %v7414_v42 }
 0x41e   : > { %v3476_v34 = vmul.f32 %v7999_v61, %v3449_v62  ;;  %v4622_v0 = vrot.slane %v4601_v31, %v7414_v42  ;;  %v4630_v2 = vcombine.low %v4608_v11, %v4615_v37  ;;  %v4656_v7 = vrot.slane %v6447_v28, %v7414_v42 }
 0x420   : > { %v4096_v14 = vcombine.high %v3476_v34, %v3476_v34  ;;  %v4103_v19 = vrot.slane %v3476_v34, %v7414_v42  ;;  %v4678_v52 = vcombine.low %v4656_v7, %v4663_v10  ;;  %v4631_v47 = vcombine.low %v4622_v0, %v4629_v60 }
 0x421   : > { %v3447_v53 = vpop.permute.xlu0 %3446  ;;  %v4638_v24 = vrot.slane %v4630_v2, %v7414_v42  ;;  %v4704_v10 = vrot.slane %v4695_v44, %v7414_v42 }
 0x422   : > { %v4110_v45 = vrot.slane %v4096_v14, %v7414_v42  ;;  %v4111_v51 = vcombine.high %v4103_v19, %v4103_v19  ;;  %v3475_v61 = vmul.f32 %v8003_v29, %v3447_v53  ;;  %v4686_v59 = vrot.slane %v4678_v52, %v7414_v42 }
 0x423   : > { %v4645_v54 = vrot.slane %v4631_v47, %v7414_v42  ;;  %v4119_v20 = vrot.slane %v4103_v19, %v7414_v42 }
 0x424   : > { %v4112_v27 = vcombine.high %v4110_v45, %v4110_v45  ;;  %v4126_v30 = vrot.slane %v4110_v45, %v7414_v42  ;;  %v4133_v4 = vrot.slane %v4111_v51, %v7414_v42  ;;  %v4047_v55 = vcombine.high %v3475_v61, %v3475_v61 }
 0x425   : > { %v4054_v1 = vrot.slane %v3475_v61, %v7414_v42  ;;  %v3492_v56 = vpop.permute.xlu0 %3491  ;;  %v3451_v29 = vpop.permute.xlu1 %3450  ;;  %v4694_v26 = vcombine.low %v4686_v59, %v4693_v18  ;;  %v4646_v21 = vcombine.low %v4638_v24, %v4645_v54  ;;  %v4141_v48 = vcombine.high %v4119_v20, %v4119_v20 }
 0x426   : > { %v4745_v46 = vcombine.low %v4119_v20, %v4133_v4  ;;  %3530 = vst.msk [vmem:[#allocation12] sm:$0xff] %vm793_vm4, %v3492_v56  ;;  %v4061_v35 = vrot.slane %v4047_v55, %v7414_v42  ;;  %v4140_v58 = vrot.slane %v4112_v27, %v7414_v42  ;;  %v4142_v12 = vcombine.high %v4126_v30, %v4126_v30 }
 0x427   : > { %v4062_v33 = vcombine.high %v4054_v1, %v4054_v1  ;;  %v4070_v43 = vrot.slane %v4054_v1, %v7414_v42  ;;  %4859 = vrot.lane.b32.xlu1 %v4694_v26, %s7059_s23  ;;  %v4143_v40 = vcombine.high %v4133_v4, %v4133_v4  ;;  %4857 = vrot.lane.b32.xlu0 %v4646_v21, %s7059_s23 }
 0x428   : > { %v4063_v57 = vcombine.high %v4061_v35, %v4061_v35  ;;  %v4766_v37 = vrot.slane %v4745_v46, %v7414_v42  ;;  %v4077_v28 = vrot.slane %v4061_v35, %v7414_v42  ;;  %v3477_v60 = vmul.f32 %v8007_v39, %v3451_v29 }
 0x429   : > { %v4084_v5 = vrot.slane %v4062_v33, %v7414_v42  ;;  %v4092_v49 = vcombine.high %v4070_v43, %v4070_v43  ;;  %v3496_v31 = vpop.permute.xlu0 %3495  ;;  %v3494_v11 = vpop.permute.xlu1 %3493  ;;  %v4696_v62 = vcombine.low %v4046_v17, %v4070_v43  ;;  %v4773_v2 = vrot.slane %v4141_v48, %v7414_v42 }
 0x42a   : > { %3532 = vst.msk [vmem:[#allocation12 + $0x10] sm:$0xff] %vm793_vm4, %v3496_v31  ;;  %3531 = vst.msk [vmem:[#allocation12 + $0x8] sm:$0xff] %vm793_vm4, %v3494_v11  ;;  %v4091_v8 = vrot.slane %v4063_v57, %v7414_v42  ;;  %v4791_v7 = vcombine.low %v4143_v40, %v4126_v30  ;;  %v4792_v14 = vcombine.low %v4140_v58, %v4142_v12 }
 0x42b   : > { %v4094_v34 = vcombine.high %v4084_v5, %v4084_v5  ;;  %v4697_v0 = vcombine.low %v4084_v5, %v4092_v49  ;;  %v4711_v19 = vrot.slane %v4696_v62, %v7414_v42  ;;  %v4144_v61 = vcombine.high %v4140_v58, %v4140_v58 }
 0x42c   : > { %v4743_v52 = vcombine.low %v4077_v28, %v4091_v8  ;;  %v6449_v47 = vcombine.high %v4077_v28, %v4091_v8  ;;  %v4151_v59 = vrot.slane %v3477_v60, %v7414_v42  ;;  %v4775_v39 = vcombine.low %v4766_v37, %v4773_v2 }
 0x42d   : > { %v4718_v38 = vrot.slane %v4697_v0, %v7414_v42  ;;  %v4725_v53 = vrot.slane %v4094_v34, %v7414_v42  ;;  %v3500_v50 = vpop.permute.xlu0 %3499  ;;  %v3498_v45 = vpop.permute.xlu1 %3497  ;;  %v4726_v51 = vcombine.low %v4704_v10, %v4711_v19  ;;  %v4800_v27 = vrot.slane %v4791_v7, %v7414_v42 }
 0x42e   : > { %3534 = vst.msk [vmem:[#allocation12 + $0x20] sm:$0xff] %vm793_vm4, %v3500_v50  ;;  %3533 = vst.msk [vmem:[#allocation12 + $0x18] sm:$0xff] %vm793_vm4, %v3498_v45  ;;  %v4752_v18 = vrot.slane %v4743_v52, %v7414_v42  ;;  %v4759_v24 = vrot.slane %v6449_v47, %v7414_v42  ;;  %v4807_v20 = vrot.slane %v4792_v14, %v7414_v42 }
 0x42f   : > { %v4727_v54 = vcombine.low %v4718_v38, %v4725_v53  ;;  %v4152_v30 = vcombine.high %v4151_v59, %v4151_v59  ;;  %v4159_v4 = vrot.slane %v4151_v59, %v7414_v42  ;;  %v4734_v56 = vrot.slane %v4726_v51, %v7414_v42 }
 0x430   : > { %v4774_v26 = vcombine.low %v4752_v18, %v4759_v24  ;;  %v4789_v35 = vrot.slane %v4775_v39, %v7414_v42  ;;  %v4822_v58 = vcombine.low %v4800_v27, %v4807_v20  ;;  %v4900_v45 = vcombine.high (!%p6450_p1), %v8017_v63, %v8017_v63 }
 0x431   : > { %v3504_v55 = vpop.permute.xlu0 %3503  ;;  %v3502_v1 = vpop.permute.xlu1 %3501  ;;  %v4741_v29 = vrot.slane %v4727_v54, %v7414_v42  ;;  %v4166_v21 = vrot.slane %v4152_v30, %v7414_v42  ;;  %v4793_v44 = vcombine.low %v4144_v61, %v4159_v4  ;;  %v4907_v51 = vrot.slane (!%p6450_p1), %v8017_v63, %v7414_v42 }
 0x432   : > { %3536 = vst.msk [vmem:[#allocation12 + $0x30] sm:$0xff] %vm793_vm4, %v3504_v55  ;;  %3535 = vst.msk [vmem:[#allocation12 + $0x28] sm:$0xff] %vm793_vm4, %v3502_v1  ;;  %v4782_v17 = vrot.slane %v4774_v26, %v7414_v42  ;;  %v4830_v5 = vrot.slane %v4822_v58, %v7414_v42  ;;  %v4949_v61 = vcombine.high (!%p6450_p1), %v8025_v6, %v8025_v6 }
 0x433   : > { %v4742_v46 = vcombine.low %v4734_v56, %v4741_v29  ;;  %v4814_v33 = vrot.slane %v4793_v44, %v7414_v42  ;;  %v4821_v43 = vrot.slane %v4166_v21, %v7414_v42  ;;  %v4956_v59 = vrot.slane (!%p6450_p1), %v8025_v6, %v7414_v42 }
 0x434   : > { %v4790_v40 = vcombine.low %v4782_v17, %v4789_v35  ;;  %v4998_v39 = vcombine.high (!%p6450_p1), %v8019_v15, %v8019_v15  ;;  %v5005_v18 = vrot.slane (!%p6450_p1), %v8019_v15, %v7414_v42  ;;  %v4914_v24 = vrot.slane (!%p6450_p1), %v4900_v45, %v7414_v42 }
 0x435   : > { %4861 = vrot.lane.b32.xlu0 %v4742_v46, %s7059_s23  ;;  %v3508_v48 = vpop.permute.xlu0 %3507  ;;  %v3506_v12 = vpop.permute.xlu1 %3505  ;;  %v4823_v57 = vcombine.low %v4814_v33, %v4821_v43  ;;  %v4915_v54 = vcombine.high (!%p6450_p1), %v4907_v51, %v4907_v51  ;;  %v4963_v27 = vrot.slane (!%p6450_p1), %v4949_v61, %v7414_v42  ;;  %v4964_v20 = vcombine.high (!%p6450_p1), %v4956_v59, %v4956_v59 }
 0x436   : > { %3538 = vst.msk [vmem:[#allocation12 + $0x40] sm:$0xff] %vm793_vm4, %v3508_v48  ;;  %3537 = vst.msk [vmem:[#allocation12 + $0x38] sm:$0xff] %vm793_vm4, %v3506_v12  ;;  %4863 = vrot.lane.b32.xlu1 %v4790_v40, %s7059_s23  ;;  %v5012_v63 = vrot.slane (!%p6450_p1), %v4998_v39, %v7414_v42  ;;  %v5047_v30 = vcombine.high (!%p6450_p1), %v8027_v9, %v8027_v9  ;;  %v5054_v6 = vrot.slane (!%p6450_p1), %v8027_v9, %v7414_v42 }
 0x437   : > { %v4837_v49 = vrot.slane %v4823_v57, %v7414_v42  ;;  %v4916_v4 = vcombine.high (!%p6450_p1), %v4914_v24, %v4914_v24  ;;  %v8375_v55 = vrot.slane (!%p6450_p1), %v4907_v51, %v7414_v42  ;;  %v8378_v15 = vrot.slane (!%p6450_p1), %v4914_v24, %v7414_v42 }
 0x438   : > { %v4965_v1 = vcombine.high (!%p6450_p1), %v4963_v27, %v4963_v27  ;;  %v8381_v56 = vrot.slane (!%p6450_p1), %v4956_v59, %v7414_v42  ;;  %v5013_v29 = vcombine.high (!%p6450_p1), %v5005_v18, %v5005_v18  ;;  %v8384_v26 = vrot.slane (!%p6450_p1), %v4915_v54, %v7414_v42 }
 0x439   : > { %v3512_v31 = vpop.permute.xlu0 %3511  ;;  %v3510_v11 = vpop.permute.xlu1 %3509  ;;  %v4838_v37 = vcombine.low %v4830_v5, %v4837_v49  ;;  %v8387_v21 = vrot.slane (!%p6450_p1), %v4963_v27, %v7414_v42  ;;  %v8390_v9 = vrot.slane (!%p6450_p1), %v4964_v20, %v7414_v42  ;;  %v5014_v44 = vcombine.high (!%p6450_p1), %v5012_v63, %v5012_v63 }
 0x43a   : > { %3540 = vst.msk [vmem:[#allocation12 + $0x50] sm:$0xff] %vm793_vm4, %v3512_v31  ;;  %3539 = vst.msk [vmem:[#allocation12 + $0x48] sm:$0xff] %vm793_vm4, %v3510_v11  ;;  %v8393_v46 = vrot.slane (!%p6450_p1), %v4916_v4, %v7414_v42  ;;  %v8396_v17 = vrot.slane (!%p6450_p1), %v5005_v18, %v7414_v42  ;;  %v5061_v35 = vrot.slane (!%p6450_p1), %v5047_v30, %v7414_v42 }
 0x43b   : > { %4865 = vrot.lane.b32.xlu0 %v4838_v37, %s7059_s23  ;;  %v5062_v33 = vcombine.high (!%p6450_p1), %v5054_v6, %v5054_v6  ;;  %v5096_v43 = vcombine.high (!%p6450_p1), %v8032_v16, %v8032_v16  ;;  %v5103_v58 = vrot.slane (!%p6450_p1), %v8032_v16, %v7414_v42  ;;  %v5145_v48 = vcombine.high (!%p6450_p1), %v8036_v22, %v8036_v22 }
 0x43c   : > { %v5152_v12 = vrot.slane (!%p6450_p1), %v8036_v22, %v7414_v42  ;;  %v8408_v40 = vrot.slane (!%p6450_p1), %v4965_v1, %v7414_v42  ;;  %v8411_v57 = vrot.slane (!%p6450_p1), %v5012_v63, %v7414_v42  ;;  %v5063_v5 = vcombine.high (!%p6450_p1), %v5061_v35, %v5061_v35 }
 0x43d   : > { %v3516_v28 = vpop.permute.xlu0 %3515  ;;  %v3514_v62 = vpop.permute.xlu1 %3513  ;;  %v5194_v49 = vcombine.high (!%p6450_p1), %v8046_v3, %v8046_v3  ;;  %v8416_v31 = vrot.slane (!%p6450_p1), %v5013_v29, %v7414_v42  ;;  %v5110_v16 = vrot.slane (!%p6450_p1), %v5096_v43, %v7414_v42  ;;  %v5111_v11 = vcombine.high (!%p6450_p1), %v5103_v58, %v5103_v58 }
 0x43e   : > { %3543 = vst.msk [vmem:[#allocation12 + $0x60] sm:$0x3] %vm3542_vm7, %v3516_v28  ;;  %v5159_v37 = vrot.slane (!%p6450_p1), %v5145_v48, %v7414_v42  ;;  %v8421_v22 = vrot.slane (!%p6450_p1), %v5014_v44, %v7414_v42  ;;  %v8424_v28 = vrot.slane (!%p6450_p1), %v5054_v6, %v7414_v42  ;;  %v5250_v51 = vrot.slane (!%p6450_p1), %v8050_v25, %v7414_v42 }
 0x43f   : > { %3541 = vst.msk [vmem:[#allocation12 + $0x58] sm:$0xff] %vm793_vm4, %v3514_v62  ;;  %v8427_v62 = vrot.slane (!%p6450_p1), %v5061_v35, %v7414_v42  ;;  %v5292_v39 = vcombine.high (!%p6450_p1), %v8059_v41, %v8059_v41  ;;  %v5299_v18 = vrot.slane (!%p6450_p1), %v8059_v41, %v7414_v42 }
 0x440   : > { %v8478_v63 = vrot.slane (!%p6450_p1), %v5250_v51, %v7414_v42 }
 0x441   : > { %v5306_v6 = vrot.slane (!%p6450_p1), %v5292_v39, %v7414_v42  ;;  %v5307_v29 = vcombine.high (!%p6450_p1), %v5299_v18, %v5299_v18  ;;  %v8498_v43 = vrot.slane (!%p6450_p1), %v5299_v18, %v7414_v42  ;;  %v5439_v39 = vcombine.high (!%p6450_p1), %v8066_v13, %v8066_v13 }
 0x45f   : > { %v4840_v10 = vpop.permute.xlu1 %4839 }
 0x460   : > { %4882 = vst.msk [vmem:[#allocation2 + $0x11] sm:$0x7f] %vm4881_vm8, %v4840_v10  ;;  %v5201_v10 = vrot.slane (!%p6450_p1), %v8046_v3, %v7414_v42  ;;  %v8448_v3 = vrot.slane (!%p6450_p1), %v5111_v11, %v7414_v42  ;;  %v5341_v11 = vcombine.high (!%p6450_p1), %v8057_v36, %v8057_v36 }
 0x462   : > { %v8456_v45 = vrot.slane (!%p6450_p1), %v5201_v10, %v7414_v42 }
 0x463   : > { %v4844_v8 = vpop.permute.xlu1 %4843 }
 0x464   : > { %4884 = vst.msk [vmem:[#allocation2 + $0x31] sm:$0x7f] %vm4881_vm8, %v4844_v8  ;;  %v8432_v8 = vrot.slane (!%p6450_p1), %v5062_v33, %v7414_v42  ;;  %v5239_v44 = vcombine.high (!%p6450_p1), %v8456_v45, %v8456_v45  ;;  %v5308_v33 = vcombine.high (!%p6450_p1), %v5306_v6, %v5306_v6 }
 0x465   : > { %v4842_v34 = vpop.permute.xlu0 %4841 }
 0x466   : > { %4883 = vst.msk [vmem:[#allocation2 + $0x21] sm:$0x7f] %vm4881_vm8, %v4842_v34  ;;  %v8435_v34 = vrot.slane (!%p6450_p1), %v5063_v5, %v7414_v42  ;;  %v6453_v5 = vcombine.high (!%p6450_p1), %v8381_v56, %v8390_v9 }
 0x467   : > { %v4848_v0 = vpop.permute.xlu1 %4847 }
 0x468   : > { %4886 = vst.msk [vmem:[#allocation2 + $0x51] sm:$0x7f] %vm4881_vm8, %v4848_v0  ;;  %v8438_v0 = vrot.slane (!%p6450_p1), %v5103_v58, %v7414_v42 }
 0x469   : > { %v4846_v60 = vpop.permute.xlu0 %4845 }
 0x46a   : > { %4885 = vst.msk [vmem:[#allocation2 + $0x41] sm:$0x7f] %vm4881_vm8, %v4846_v60  ;;  %v5160_v60 = vcombine.high (!%p6450_p1), %v5152_v12, %v5152_v12 }
 0x46c   : > { %v8469_v24 = vrot.slane (!%p6450_p1), %v5160_v60, %v7414_v42  ;;  %v8521_v60 = vrot.slane (!%p6450_p1), %v5307_v29, %v7414_v42 }
 0x46d   : > { %v4850_v2 = vpop.permute.xlu0 %4849 }
 0x46e   : > { %4887 = vst.msk [vmem:[#allocation2 + $0x61] sm:$0x7f] %vm4881_vm8, %v4850_v2  ;;  %v5112_v2 = vcombine.high (!%p6450_p1), %v5110_v16, %v5110_v16 }
 0x470   : > { %v8485_v41 = vrot.slane (!%p6450_p1), %v5112_v2, %v7414_v42  ;;  %v5390_v2 = vcombine.high (!%p6450_p1), %v8072_v32, %v8072_v32 }
 0x471   : > { %v4852_v7 = vpop.permute.xlu1 %4851 }
 0x472   : > { %4888 = vst.msk [vmem:[#allocation2 + $0x71] sm:$0x7f] %vm4881_vm8, %v4852_v7  ;;  %v8441_v7 = vrot.slane (!%p6450_p1), %v5152_v12, %v7414_v42 }
 0x476   : > { %v4854_v14 = vpop.permute.xlu0 %4853  ;;  %v4856_v19 = vpop.permute.xlu1 %4855 }
 0x477   : > { %4889 = vst.msk [vmem:[#allocation2 + $0xa1] sm:$0x7f] %vm4881_vm8, %v4854_v14  ;;  %4890 = vst.msk [vmem:[#allocation2 + $0xb1] sm:$0x7f] %vm4881_vm8, %v4856_v19  ;;  %v5208_v14 = vrot.slane (!%p6450_p1), %v5194_v49, %v7414_v42  ;;  %v5209_v19 = vcombine.high (!%p6450_p1), %v5201_v10, %v5201_v10  ;;  %v8518_v10 = vrot.slane (!%p6450_p1), %v5306_v6, %v7414_v42 }
 0x478   : > { %v5512_v49 = vcombine.low (!%p6450_p1), %v8378_v15, %v8393_v46 }
 0x479   : > { %v8461_v61 = vrot.slane (!%p6450_p1), %v5208_v14, %v7414_v42  ;;  %v8472_v54 = vrot.slane (!%p6450_p1), %v5209_v19, %v7414_v42  ;;  %v8528_v19 = vrot.slane (!%p6450_p1), %v5308_v33, %v7414_v42 }
 0x47b   : > { %v5241_v58 = vcombine.high (!%p6450_p1), %v8472_v54, %v8472_v54 }
 0x499   : > { %v4860_v38 = vpop.permute.xlu1 %4859  ;;  %v4858_v53 = vpop.permute.xlu0 %4857 }
 0x49a   : > { %4892 = vst.msk [vmem:[#allocation2 + $0xd1] sm:$0x7f] %vm4881_vm8, %v4860_v38  ;;  %4891 = vst.msk [vmem:[#allocation2 + $0xc1] sm:$0x7f] %vm4881_vm8, %v4858_v53  ;;  %v8445_v38 = vrot.slane (!%p6450_p1), %v5110_v16, %v7414_v42  ;;  %v5161_v53 = vcombine.high (!%p6450_p1), %v5159_v37, %v5159_v37 }
 0x49c   : > { %v8488_v4 = vrot.slane (!%p6450_p1), %v5161_v53, %v7414_v42 }
 0x4a7   : > { %v4862_v52 = vpop.permute.xlu0 %4861 }
 0x4a8   : > { %4893 = vst.msk [vmem:[#allocation2 + $0xe1] sm:$0x7f] %vm4881_vm8, %v4862_v52  ;;  %v4864_v47 = vpop.permute.xlu1 %4863  ;;  %4899 = sbr.rel (%p6450_p1) target bundleno = 1606 (0x646), region = 60  ;;  %v5243_v52 = vcombine.high (!%p6450_p1), %v8050_v25, %v8050_v25  ;;  %v5258_v25 = vcombine.high (!%p6450_p1), %v5250_v51, %v5250_v51  ;;  %v5404_v51 = vrot.slane (!%p6450_p1), %v5390_v2, %v7414_v42 }
 0x4a9   : > { %4894 = vst.msk [vmem:[#allocation2 + $0xf1] sm:$0x7f] %vm4881_vm8, %v4864_v47  ;;  %v8453_v47 = vrot.slane (!%p6450_p1), %v5159_v37, %v7414_v42  ;;  %v5348_v37 = vrot.slane (!%p6450_p1), %v8057_v36, %v7414_v42  ;;  %v5355_v36 = vrot.slane (!%p6450_p1), %v5341_v11, %v7414_v42 }
 0x4aa   : > { %v5257_v59 = vrot.slane (!%p6450_p1), %v5243_v52, %v7414_v42  ;;  %v8491_v1 = vrot.slane (!%p6450_p1), %v5258_v25, %v7414_v42  ;;  %v5406_v33 = vcombine.high (!%p6450_p1), %v5404_v51, %v5404_v51  ;;  %v8553_v11 = vrot.slane (!%p6450_p1), %v5404_v51, %v7414_v42 }
 0x4ab   : > { %v5356_v52 = vcombine.high (!%p6450_p1), %v5348_v37, %v5348_v37  ;;  %v5357_v18 = vcombine.high (!%p6450_p1), %v5355_v36, %v5355_v36  ;;  %v8542_v25 = vrot.slane (!%p6450_p1), %v5355_v36, %v7414_v42 }
 0x4ac   : > { %v5259_v20 = vcombine.high (!%p6450_p1), %v5257_v59, %v5257_v59  ;;  %v8481_v30 = vrot.slane (!%p6450_p1), %v5257_v59, %v7414_v42  ;;  %v8570_v51 = vrot.slane (!%p6450_p1), %v5406_v33, %v7414_v42  ;;  %v8586_v33 = vrot.slane (!%p6450_p1), %v8076_v23, %v7414_v42 }
 0x4ad   : > { %v4866_v50 = vpop.permute.xlu0 %4865  ;;  %v8550_v29 = vrot.slane (!%p6450_p1), %v5356_v52, %v7414_v42  ;;  %v8558_v2 = vrot.slane (!%p6450_p1), %v5357_v18, %v7414_v42  ;;  %v6451_v23 = vcombine.high (!%p6450_p1), %v8375_v55, %v8384_v26  ;;  %v6452_v18 = vcombine.high (!%p6450_p1), %v8378_v15, %v8393_v46 }
 0x4ae   : > { %4895 = vst.msk [vmem:[#allocation2 + $0x101] sm:$0x7f] %vm4881_vm8, %v4866_v50  ;;  %v5210_v50 = vcombine.high (!%p6450_p1), %v5208_v14, %v5208_v14  ;;  %v8505_v12 = vrot.slane (!%p6450_p1), %v5259_v20, %v7414_v42  ;;  %v5397_v14 = vrot.slane (!%p6450_p1), %v8072_v32, %v7414_v42  ;;  %v5561_v15 = vcombine.low (!%p6450_p1), %v8387_v21, %v8408_v40 }
 0x4af   : > { %v5527_v16 = vrot.slane %v6451_v23, %v7414_v42  ;;  %v6454_v46 = vcombine.high %v8387_v21, %v8408_v40  ;;  %v6455_v23 = vcombine.high %v8396_v17, %v8416_v31  ;;  %v5610_v21 = vcombine.low %v8411_v57, %v8421_v22 }
 0x4b0   : > { %v8475_v27 = vrot.slane %v5210_v50, %v7414_v42  ;;  %v8534_v50 = vrot.slane %v5348_v37, %v7414_v42  ;;  %v5405_v59 = vcombine.high %v5397_v14, %v5397_v14  ;;  %v8545_v20 = vrot.slane %v5397_v14, %v7414_v42 }
 0x4b1   : > { %v5446_v14 = vrot.slane %v8066_v13, %v7414_v42  ;;  %v5453_v37 = vrot.slane %v5439_v39, %v7414_v42  ;;  %v5510_v39 = vcombine.low %v8375_v55, %v8384_v26  ;;  %v5534_v55 = vrot.slane %v5512_v49, %v7414_v42 }
 0x4b2   : > { %v8561_v36 = vrot.slane %v5405_v59, %v7414_v42  ;;  %v5559_v26 = vcombine.low %v8381_v56, %v8390_v9  ;;  %v5541_v59 = vrot.slane %v6452_v18, %v7414_v42  ;;  %v5608_v49 = vcombine.low %v8396_v17, %v8416_v31 }
 0x4b3   : > { %v5454_v53 = vcombine.high %v5446_v14, %v5446_v14  ;;  %v8578_v13 = vrot.slane %v5446_v14, %v7414_v42  ;;  %v5455_v52 = vcombine.high %v5453_v37, %v5453_v37  ;;  %v8597_v32 = vrot.slane %v5453_v37, %v7414_v42 }
 0x4b4   : > { %v5495_v14 = vcombine.high %v8586_v33, %v8586_v33  ;;  %v5520_v37 = vrot.slane %v5510_v39, %v7414_v42  ;;  %v5543_v48 = vcombine.low %v5534_v55, %v5541_v59  ;;  %v5576_v18 = vrot.slane %v6453_v5, %v7414_v42 }
 0x4b5   : > { %v8600_v6 = vrot.slane %v5454_v53, %v7414_v42  ;;  %v5569_v53 = vrot.slane %v5559_v26, %v7414_v42  ;;  %v5583_v56 = vrot.slane %v5561_v15, %v7414_v42  ;;  %v5590_v9 = vrot.slane %v6454_v46, %v7414_v42 }
 0x4b6   : > { %v5542_v39 = vcombine.low %v5520_v37, %v5527_v16  ;;  %v8635_v35 = vrot.slane %v5455_v52, %v7414_v42  ;;  %v6456_v40 = vcombine.high %v8411_v57, %v8421_v22  ;;  %v5618_v16 = vrot.slane %v5608_v49, %v7414_v42 }
 0x4b7   : > { %v5485_v17 = vcombine.high %v8597_v32, %v8597_v32  ;;  %v5591_v31 = vcombine.low %v5569_v53, %v5576_v18  ;;  %v5592_v5 = vcombine.low %v5583_v56, %v5590_v9  ;;  %v5625_v59 = vrot.slane %v6455_v23, %v7414_v42 }
 0x4b8   : > { %v5632_v37 = vrot.slane %v5610_v21, %v7414_v42  ;;  %v5639_v52 = vrot.slane %v6456_v40, %v7414_v42  ;;  %v5657_v55 = vcombine.low %v8424_v28, %v8432_v8  ;;  %v6457_v26 = vcombine.high %v8424_v28, %v8432_v8 }
 0x4b9   : > { %v5486_v57 = vcombine.high %v8600_v6, %v8600_v6  ;;  %v8654_v22 = vrot.slane %v5542_v39, %v7414_v42  ;;  %v8657_v53 = vrot.slane %v5543_v48, %v7414_v42  ;;  %v5640_v15 = vcombine.low %v5618_v16, %v5625_v59 }
 0x4ba   : > { %v5641_v46 = vcombine.low %v5632_v37, %v5639_v52  ;;  %v5659_v49 = vcombine.low %v8427_v62, %v8435_v34  ;;  %v6458_v23 = vcombine.high %v8427_v62, %v8435_v34  ;;  %v5667_v18 = vrot.slane %v5657_v55, %v7414_v42 }
 0x4bb   : > { %v8665_v28 = vrot.slane %v5591_v31, %v7414_v42  ;;  %v8668_v8 = vrot.slane %v5592_v5, %v7414_v42  ;;  %v5674_v39 = vrot.slane %v6457_v26, %v7414_v42  ;;  %v5706_v48 = vcombine.low %v8438_v0, %v8448_v3 }
 0x4bc   : > { %v8674_v56 = vrot.slane %v5640_v15, %v7414_v42  ;;  %v5681_v9 = vrot.slane %v5659_v49, %v7414_v42  ;;  %v5688_v62 = vrot.slane %v6458_v23, %v7414_v42  ;;  %v6459_v34 = vcombine.high %v8438_v0, %v8448_v3 }
 0x4bd   : > { %v5689_v21 = vcombine.low %v5667_v18, %v5674_v39  ;;  %v5708_v40 = vcombine.low %v8445_v38, %v8485_v41  ;;  %v6460_v16 = vcombine.high %v8445_v38, %v8485_v41  ;;  %v5716_v31 = vrot.slane %v5706_v48, %v7414_v42 }
 0x4be   : > { %v8686_v5 = vrot.slane %v5641_v46, %v7414_v42  ;;  %v5690_v59 = vcombine.low %v5681_v9, %v5688_v62  ;;  %v5723_v37 = vrot.slane %v6459_v34, %v7414_v42  ;;  %v5755_v52 = vcombine.low %v8441_v7, %v8469_v24 }
 0x4bf   : > { %v8692_v0 = vrot.slane %v5689_v21, %v7414_v42  ;;  %v5730_v3 = vrot.slane %v5708_v40, %v7414_v42  ;;  %v5737_v55 = vrot.slane %v6460_v16, %v7414_v42  ;;  %v6461_v38 = vcombine.high %v8441_v7, %v8469_v24 }
 0x4c0   : > { %v8699_v41 = vrot.slane %v5495_v14, %v7414_v42  ;;  %v8702_v26 = vrot.slane %v5690_v59, %v7414_v42  ;;  %v5757_v15 = vcombine.low %v8453_v47, %v8488_v4  ;;  %v6462_v46 = vcombine.high %v8453_v47, %v8488_v4 }
 0x4c1   : > { %v5487_v49 = vcombine.high %v8635_v35, %v8635_v35  ;;  %v5558_v23 = vcombine.low %v8654_v22, %v8657_v53  ;;  %v5738_v18 = vcombine.low %v5716_v31, %v5723_v37  ;;  %v5739_v7 = vcombine.low %v5730_v3, %v5737_v55 }
 0x4c2   : > { %v5607_v24 = vcombine.low %v8665_v28, %v8668_v8  ;;  %v5656_v14 = vcombine.low %v8674_v56, %v8686_v5  ;;  %v5765_v39 = vrot.slane %v5755_v52, %v7414_v42  ;;  %v5772_v48 = vrot.slane %v6461_v38, %v7414_v42 }
 0x4c3   : > { %v5705_v47 = vcombine.low %v8692_v0, %v8702_v26  ;;  %v5779_v4 = vrot.slane %v5757_v15, %v7414_v42  ;;  %v5810_v9 = vrot.slane %v8456_v45, %v7414_v42  ;;  %v5818_v62 = vcombine.low %v8472_v54, %v5239_v44 }
 0x4c4   : > { %v5786_v34 = vrot.slane %v6462_v46, %v7414_v42  ;;  %v5819_v21 = vcombine.low %v5241_v58, %v8461_v61  ;;  %v8990_v40 = vcombine.high %v8461_v61, %v8461_v61  ;;  %v8991_v31 = vcombine.high %v8475_v27, %v8475_v27 }
 0x4c5   : > { %v8741_v37 = vrot.slane %v5738_v18, %v7414_v42  ;;  %v8744_v44 = vrot.slane %v5739_v7, %v7414_v42  ;;  %v5828_v52 = vrot.slane %v5818_v62, %v7414_v42  ;;  %v8992_v54 = vcombine.high %v8478_v63, %v8478_v63 }
 0x4c6   : > { %v5820_v16 = vcombine.low %v8475_v27, %v8990_v40  ;;  %v5821_v59 = vcombine.low %v8991_v31, %v8478_v63  ;;  %v5787_v58 = vcombine.low %v5765_v39, %v5772_v48  ;;  %v5835_v3 = vrot.slane %v5819_v21, %v7414_v42 }
 0x4c7   : > { %v5867_v61 = vcombine.low %v8491_v1, %v8992_v54  ;;  %v8993_v38 = vcombine.high %v8491_v1, %v8491_v1  ;;  %v8994_v46 = vcombine.high %v8481_v30, %v8481_v30  ;;  %v8995_v63 = vcombine.high %v8505_v12, %v8505_v12 }
 0x4c8   : > { %v5842_v55 = vrot.slane %v5820_v16, %v7414_v42  ;;  %v5849_v27 = vrot.slane %v5821_v59, %v7414_v42  ;;  %v5788_v48 = vcombine.low %v5779_v4, %v5786_v34  ;;  %v5850_v62 = vcombine.low %v5828_v52, %v5835_v3 }
 0x4c9   : > { %v5868_v15 = vcombine.low %v8993_v38, %v8481_v30  ;;  %v5869_v18 = vcombine.low %v8505_v12, %v8994_v46  ;;  %v5870_v7 = vcombine.low %v8995_v63, %v8498_v43  ;;  %v5877_v39 = vrot.slane %v5867_v61, %v7414_v42 }
 0x4ca   : > { %v5851_v21 = vcombine.low %v5842_v55, %v5849_v27  ;;  %v8996_v40 = vcombine.high %v8498_v43, %v8498_v43  ;;  %v8997_v12 = vcombine.high %v8521_v60, %v8521_v60  ;;  %v5754_v4 = vcombine.low %v8741_v37, %v8744_v44 }
 0x4cb   : > { %v5884_v16 = vrot.slane %v5868_v15, %v7414_v42  ;;  %v5891_v30 = vrot.slane %v5869_v18, %v7414_v42  ;;  %v5898_v31 = vrot.slane %v5870_v7, %v7414_v42  ;;  %v8781_v34 = vrot.slane %v5787_v58, %v7414_v42 }
 0x4cc   : > { %v5916_v1 = vcombine.low %v8521_v60, %v8996_v40  ;;  %v5917_v59 = vcombine.low %v8997_v12, %v8518_v10  ;;  %v8998_v43 = vcombine.high %v8518_v10, %v8518_v10  ;;  %v8999_v54 = vcombine.high %v8528_v19, %v8528_v19 }
 0x4cd   : > { %v5899_v3 = vcombine.low %v5877_v39, %v5884_v16  ;;  %v5900_v55 = vcombine.low %v5891_v30, %v5898_v31  ;;  %v8794_v38 = vrot.slane %v5788_v48, %v7414_v42  ;;  %v9000_v15 = vcombine.high %v8534_v50, %v8534_v50 }
 0x4ce   : > { %v5918_v52 = vcombine.low %v8528_v19, %v8998_v43  ;;  %v5919_v61 = vcombine.low %v8999_v54, %v8534_v50  ;;  %v5926_v60 = vrot.slane %v5916_v1, %v7414_v42  ;;  %v5933_v27 = vrot.slane %v5917_v59, %v7414_v42 }
 0x4cf   : > { %v5965_v46 = vcombine.low %v8550_v29, %v9000_v15  ;;  %v5858_v19 = vrot.slane %v5850_v62, %v7414_v42  ;;  %v5865_v18 = vrot.slane %v5851_v21, %v7414_v42  ;;  %v9001_v7 = vcombine.high %v8550_v29, %v8550_v29 }
 0x4d0   : > { %v5940_v58 = vrot.slane %v5918_v52, %v7414_v42  ;;  %v5947_v10 = vrot.slane %v5919_v61, %v7414_v42  ;;  %v5948_v63 = vcombine.low %v5926_v60, %v5933_v27  ;;  %v9002_v40 = vcombine.high %v8542_v25, %v8542_v25 }
 0x4d1   : > { %v5966_v39 = vcombine.low %v9001_v7, %v8542_v25  ;;  %v9003_v50 = vcombine.high %v8558_v2, %v8558_v2  ;;  %v5975_v62 = vrot.slane %v5965_v46, %v7414_v42  ;;  %v5907_v21 = vrot.slane %v5899_v3, %v7414_v42 }
 0x4d2   : > { %v5949_v48 = vcombine.low %v5940_v58, %v5947_v10  ;;  %v5967_v1 = vcombine.low %v8558_v2, %v9002_v40  ;;  %v5914_v30 = vrot.slane %v5900_v55, %v7414_v42  ;;  %v9004_v31 = vcombine.high %v8545_v20, %v8545_v20 }
 0x4d3   : > { %v5968_v16 = vcombine.low %v9003_v50, %v8545_v20  ;;  %v5982_v29 = vrot.slane %v5966_v39, %v7414_v42  ;;  %v5956_v12 = vrot.slane %v5948_v63, %v7414_v42  ;;  %v9005_v43 = vcombine.high %v8561_v36, %v8561_v36 }
 0x4d4   : > { %v6014_v25 = vcombine.low %v8561_v36, %v9004_v31  ;;  %v5989_v59 = vrot.slane %v5967_v1, %v7414_v42  ;;  %v9006_v61 = vcombine.high %v8553_v11, %v8553_v11  ;;  %v9007_v20 = vcombine.high %v8570_v51, %v8570_v51 }
 0x4d5   : > { %v5996_v2 = vrot.slane %v5968_v16, %v7414_v42  ;;  %v6015_v52 = vcombine.low %v9005_v43, %v8553_v11  ;;  %v5997_v54 = vcombine.low %v5975_v62, %v5982_v29  ;;  %v5963_v27 = vrot.slane %v5949_v48, %v7414_v42  ;;  %v6186_v43 = vld [vmem:[#allocation8 + $0x18] sm:$0xff] }
 0x4d6   : > { %v6016_v3 = vcombine.low %v8570_v51, %v9006_v61  ;;  %v6017_v55 = vcombine.low %v9007_v20, %v8578_v13  ;;  %v6024_v60 = vrot.slane %v6014_v25, %v7414_v42  ;;  %v9008_v36 = vcombine.high %v8578_v13, %v8578_v13 }
 0x4d7   : > { %v5998_v58 = vcombine.low %v5989_v59, %v5996_v2  ;;  %v6031_v10 = vrot.slane %v6015_v52, %v7414_v42  ;;  %v5866_v11 = vcombine.low %v5858_v19, %v5865_v18  ;;  %v6064_v51 = vcombine.low %v5486_v57, %v8597_v32  ;;  %v6185_v2 = vld [vmem:[#allocation8 + $0x10] sm:$0xff] }
 0x4d8   : > { %v6063_v15 = vcombine.low %v8600_v6, %v9008_v36  ;;  %v6038_v46 = vrot.slane %v6016_v3, %v7414_v42  ;;  %v6045_v63 = vrot.slane %v6017_v55, %v7414_v42  ;;  %v6005_v7 = vrot.slane %v5997_v54, %v7414_v42 }
 0x4d9   : > { %v6046_v39 = vcombine.low %v6024_v60, %v6031_v10  ;;  %v6065_v13 = vcombine.low %v8635_v35, %v5485_v17  ;;  %v9009_v19 = vrot.slane %v8586_v33, %v7414_v42  ;;  %v6012_v48 = vrot.slane %v5998_v58, %v7414_v42 }
 0x4da   : > { %v6047_v40 = vcombine.low %v6038_v46, %v6045_v63  ;;  %v6073_v6 = vrot.slane %v6063_v15, %v7414_v42  ;;  %v6080_v57 = vrot.slane %v6064_v51, %v7414_v42  ;;  %v5915_v1 = vcombine.low %v5907_v21, %v5914_v30 }
 0x4db   : > { %v6066_v18 = vcombine.low %v5487_v49, %v9009_v19  ;;  %v5964_v50 = vcombine.low %v5956_v12, %v5963_v27  ;;  %v6087_v32 = vrot.slane %v6065_v13, %v7414_v42  ;;  %v6054_v16 = vrot.slane %v6046_v39, %v7414_v42 }
 0x4dc   : > { %v6061_v33 = vrot.slane %v6047_v40, %v7414_v42  ;;  %v6095_v62 = vcombine.low %v6073_v6, %v6080_v57  ;;  %v6141_v49 = vsel %vm6140_vm9, %v5558_v23, 0.0  ;;  %v6142_v21 = vsel %vm6140_vm9, %v5607_v24, 0.0  ;;  %v6183_v24 = vld [vmem:[#allocation8] sm:$0xff] }
 0x4dd   : > { %v6094_v17 = vrot.slane %v6066_v18, %v7414_v42  ;;  %v6144_v30 = vsel %vm6140_vm9, %v5656_v14, 0.0  ;;  %v6013_v29 = vcombine.low %v6005_v7, %v6012_v48  ;;  %v6143_v25 = vadd.f32 %v6142_v21, %v6141_v49  ;;  %v6184_v14 = vld [vmem:[#allocation8 + $0x8] sm:$0xff] }
 0x4de   : > { %v6103_v31 = vrot.slane %v6095_v62, %v7414_v42  ;;  %v5803_v12 = vcombine.low %v8781_v34, %v8794_v38  ;;  %v6118_v53 = vrot.slane %v8699_v41, %v7414_v42  ;;  %v6146_v28 = vsel %vm6140_vm9, %v5705_v47, 0.0 }
 0x4df   : > { %v6096_v35 = vcombine.low %v6087_v32, %v6094_v17  ;;  %v6062_v8 = vcombine.low %v6054_v16, %v6061_v33  ;;  %v6145_v56 = vadd.f32 %v6144_v30, %v6143_v25  ;;  %v6161_v5 = vsel %vm6140_vm9, %v5866_v11, 0.0  ;;  %v6463_v17 = vld [vmem:[#allocation9] ss:$0 sm:$0xff] }
 0x4e0   : > { %v6162_v23 = vsel %vm6140_vm9, %v5915_v1, 0.0  ;;  %v5817_v34 = vrot.slane %v5810_v9, %v7414_v42  ;;  %v6148_v0 = vsel %vm6140_vm9, %v5754_v4, 0.0  ;;  %v6164_v26 = vsel %vm6140_vm9, %v5964_v50, 0.0 }
 0x4e1   : > { %v6110_v22 = vrot.slane %v6096_v35, %v7414_v42  ;;  %v6163_v41 = vadd.f32 %v6162_v23, %v6161_v5  ;;  %v6147_v38 = vadd.f32 %v6146_v28, %v6145_v56  ;;  %v6166_v59 = vsel %vm6140_vm9, %v6013_v29, 0.0 }
 0x4e2   : > { %v6150_v52 = vsel %vm6140_vm9, %v5803_v12, 0.0  ;;  %v6587_v45 = vpack.c.bf16 %v6184_v14, %v6183_v24  ;;  %v6125_v9 = vrot.slane %v6118_v53, %v7414_v42  ;;  %v6168_v37 = vsel %vm6140_vm9, %v6062_v8, 0.0 }
 0x4e3   : > { %v6111_v47 = vcombine.low %v6103_v31, %v6110_v22  ;;  %v6165_v54 = vadd.f32 %v6164_v26, %v6163_v41  ;;  %v6149_v61 = vadd.f32 %v6148_v0, %v6147_v38  ;;  %v7065_v44 = vmov 0.0|0.0  }
 0x4e4   : > { %6586 = vmatprep.subr.bf16.mxu0 %v7065_v44  ;;  %v6153_v4 = vsel %vm6152_vm10, %v5817_v34, 0.0  ;;  %v6590_v20 = vpack.c.bf16 %v6186_v43, %v6185_v2  ;;  %v6172_v10 = vsel %vm6152_vm10, %v6125_v9, 0.0  ;;  %v7067_v51 = vmov 0.0  }
 0x4e5   : > { %v6167_v3 = vadd.f32 %v6166_v59, %v6165_v54  ;;  %6588 = vmatpush3.bf16.msra.mxu0 %v6587_v45  ;;  %v6151_v55 = vadd.f32 %v6150_v52, %v6149_v61  ;;  %v6170_v60 = vsel %vm6140_vm9, %v6111_v47, 0.0  ;;  %6583 = vmatprep.mubr.msk.f32.mxu0 %vm7066_vm11, %v7067_v51 }
 0x4e6   : > { %6589 = vmatprep.subr.bf16.mxu0 %v7065_v44 }
 0x4e7   : > { %v6169_v27 = vadd.f32 %v6168_v37, %v6167_v3  ;;  %v6154_v58 = vadd.f32 %v6153_v4, %v6151_v55 }
 0x4e9   : > { %v6171_v36 = vadd.f32 %v6170_v60, %v6169_v27  ;;  %6591 = vmatpush3.bf16.msra.mxu0 %v6590_v20  ;;  %v6155_v42 = vrot.slane %v6154_v58, 4 }
 0x4eb   : > { %v6173_v15 = vadd.f32 %v6172_v10, %v6171_v36  ;;  %v6156_v11 = vadd.f32 %v6155_v42, %v6154_v58 }
 0x4ed   : > { %v6174_v46 = vrot.slane %v6173_v15, 4  ;;  %v6157_v63 = vrot.slane %v6156_v11, 2 }
 0x4ef   : > { %v6175_v7 = vadd.f32 %v6174_v46, %v6173_v15  ;;  %v6158_v39 = vadd.f32 %v6157_v63, %v6156_v11 }
 0x4f1   : > { %v6176_v13 = vrot.slane %v6175_v7, 2  ;;  %v6159_v19 = vrot.slane %v6158_v39, 1 }
 0x4f3   : > { %v6177_v18 = vadd.f32 %v6176_v13, %v6175_v7  ;;  %v6160_v48 = vadd.f32 %v6159_v19, %v6158_v39 }
 0x4f5   : > { %v6178_v40 = vrot.slane %v6177_v18, 1  ;;  %v6181_v57 = vmul.f32 0.020408163, %v6160_v48 }
 0x4f7   : > { %v6179_v6 = vadd.f32 %v6178_v40, %v6177_v18 }
 0x4f9   : > { %v6182_v1 = vmul.f32 0.020408163, %v6179_v6 }
 0x4fb   : > { %v6197_v50 = vsel %vm6196_vm12, %v6182_v1, %v6181_v57 }
 0x4fc   : > { %6198 = vrot.lane.b32.xlu0 %v6197_v50, %s7068_s11 }
 0x56e   : > { %v6199_v32 = vpop.permute.xlu0 %6198 }
 0x56f   : > { %6584 = vmatmul.mubr.msk.f32.vlgmr.msra.gmra.mrb[0].mxu0 %vm793_vm4, %v6199_v32 }
 0x642   : > { %v6268_v16 = vpop.f32.mrb[0].mxu0 }
 0x643   : > { %v6269_v33 = vadd.f32 %v6463_v17, %v6268_v16  ;;  %v6585_v62 = vpop.f32.mrb[1].mxu0 }
 0x645   : > { %6272 = vst [vmem:[#allocation11] sm:$0x3] %v6269_v33 }
 0x646 PF: > { %p6638_p4 = scmp.eq.s32.totalorder %s7122_s22, 2  ;;  %s7069_s25 = smov [#allocation11]  }
 0x647   : > { %s6280_s15 = sshll.u32 %s7069_s25, 4  ;;  %s7070_s7 = smov [#allocation12]   ;;  %s6281_s15 = int_to_ptr.vmem [resolvable:$true] %s6280_s15 }
 0x648   : > { %s6290_s21 = sshll.u32 %s7070_s7, 4  ;;  %s6946_s26 = scalar_lea.vmem %s6281_s15, 32  ;;  %s6291_s21 = int_to_ptr.vmem [resolvable:$true] %s6290_s21 }
 0x649   : > { %p6947_p5 = scmp.ne.s32.totalorder %s6281_s15, %s6946_s26  ;;  %p6953_p0 = scmp.lt.s32.totalorder %s6281_s15, %s6281_s15 }
 0x64a   : > { %p6954_p2 = scmp.lt.s32.totalorder %s6946_s26, %s6946_s26 }
 0x64b   : > { %p6948_p8 = pnand %p6947_p5, %p6638_p4 }
 0x64c   : > { %p6955_p11 = por %p6954_p2, %p6953_p0 }
 0x64d   : > { %p6949_p12 = pneg %p6948_p8 }
 0x64f   : > { %p6956_p13 = pnand %p6955_p11, %p6949_p12 }
 0x651   : > { %6959 = shalt.err (!%p6956_p13)
}
 0x652   : > { %s6960_s13 = scalar_lea.hbm %s8973_s4, 32 }
 0x653   : > { %p6961_p3 = scmp.ne.s32.totalorder %s8973_s4, %s6960_s13  ;;  %p6966_p10 = scmp.lt.u32.totalorder %s6960_s13, %s8973_s4 }
 0x655   : > { %p6962_p6 = pnand %p6961_p3, %p6638_p4 }
 0x657   : > { %p6963_p7 = pneg %p6962_p6 }
 0x659   : > { %p6968_p9 = pnand %p6966_p10, %p6963_p7 }
 0x65b   : > { %6971 = shalt.err (!%p6968_p9)
}
 0x65c   : > { %6610 = dma.vmem_to_hbm [thread:$0]  (%p6638_p4), %s6281_s15, 32, %s8973_s4, [#allocation5]  }
 0x65d   : > { %s6972_s29 = scalar_lea.vmem %s6291_s21, 1664  ;;  %p6979_p12 = scmp.lt.s32.totalorder %s6291_s21, %s6291_s21 }
 0x65e   : > { %p6973_p1 = scmp.ne.s32.totalorder %s6291_s21, %s6972_s29  ;;  %p6980_p0 = scmp.lt.s32.totalorder %s6972_s29, %s6972_s29 }
 0x660   : > { %p6974_p5 = pnand %p6973_p1, %p6638_p4  ;;  %p6981_p2 = por %p6980_p0, %p6979_p12 }
 0x662   : > { %p6975_p8 = pneg %p6974_p5 }
 0x664   : > { %p6982_p11 = pnand %p6981_p2, %p6975_p8 }
 0x666   : > { %6985 = shalt.err (!%p6982_p11)
}
 0x667   : > { %s6986_s24 = scalar_lea.hbm %s8974_s5, 1664 }
 0x668   : > { %p6987_p13 = scmp.ne.s32.totalorder %s8974_s5, %s6986_s24  ;;  %p6992_p7 = scmp.lt.u32.totalorder %s6986_s24, %s8974_s5 }
 0x66a   : > { %p6988_p3 = pnand %p6987_p13, %p6638_p4 }
 0x66c   : > { %p6989_p6 = pneg %p6988_p3 }
 0x66e   : > { %p6994_p10 = pnand %p6992_p7, %p6989_p6 }
 0x670   : > { %6997 = shalt.err (!%p6994_p10)
}
 0x671   : > { %s7071_s7 = smov 128   ;;  %s7072_s26 = smov 8  }
 0x672   : > { %6612 = dma.vmem_to_hbm [thread:$0]  (%p6638_p4), %s6291_s21, 1664, %s8974_s5, [#allocation13], %s7071_s7, %s7071_s7, %s7072_s26  }
 0x673   : > { %7027 = dma.done.wait (%p6638_p4), [#allocation5], 32  }
 0x674   : > { %7029 = vsyncadd (%p6638_p4), [#allocation5], 4294967264 }
 0x675   : > { %7031 = dma.done.wait (%p6638_p4), [#allocation13], 1664  }
 0x676   : > { %7033 = vsyncadd (%p6638_p4), [#allocation13], 4294965632 }
 0x677 PF: > { %p20_p9 = scmp.ge.s32.totalorder %s7200_s16, 5   ;;  %s9010_s18 = smov %s7040_s19 }
 0x678   : > { %s9011_s19 = smov %s7044_s20  ;;  %s9012_s20 = smov %s7228_s27 }
 0x679   : > { %s9013_s21 = smov %s7200_s16  ;;  %22 = sbr.rel (!%p20_p9) target bundleno = 7 (0x7), region = 103 }
 0x680   :  { %6310 = vsyncpa [#allocation4], 1 }
 0x681   :  { %6312 = vsyncpa [#allocation4 + $0x1], 1 }
 0x682   :  { %6313 = vsyncpa [#allocation7], 1 }
 0x683   :  { %6314 = vsyncpa [#allocation10], 1 }
 0x684   :  { %6315 = vsyncpa [#allocation5], 1 }
 0x685   :  { %6317 = vsyncpa [#allocation5 + $0x1], 1 }
 0x686   :  { %6318 = vsyncpa [#allocation13], 1 }

</bundles_post_ra>
